<compile_context>
chip_gen: v7x
topology: tpu7x:2x2x1
jax: 0.10.0
libtpu: 0.0.40
codegen_flags: <defaults>
</compile_context>

<pallas_src>
import functools

import numpy as np
import jax
import jax.numpy as jnp
from jax.experimental import pallas as pl
from jax.experimental.pallas import tpu as pltpu


D_LIST = (1, 2, 5, 7)   # dilations of the multi-scale blocks (module default, k_size=3)
LN_EPS = 1e-6

_SQRT_2_OVER_PI = 0.7978845608028654


def _gelu_tanh(x):
    # TODO(synk): nn.GELU() is erf-exact; tanh-approximate GELU is used here (and in
    # the reference below) because erf lowering in Mosaic is not guaranteed.
    return 0.5 * x * (1.0 + jnp.tanh(_SQRT_2_OVER_PI * (x + 0.044715 * x * x * x)))


def _gab_kernel(xl_ref, masks_ref,
                ca_w1t_ref, ca_w2_ref,
                ln_w_ref, ln_b_ref, dw_w_ref, dw_b_ref,
                fln_w_ref, fln_b_ref, fw_ref, fb_ref, rw_ref, rb_ref,
                out_ref, *, H, W, d_list, eps):
    """One batch sample per grid step.  All maps are (channels, H*W) in VMEM."""
    C = xl_ref.shape[1]
    HW = H * W
    Cr = C // 4

    x = xl_ref[0].astype(jnp.float32)          # (C, HW)

    # ---------------- channel attention (global avg/max pool + shared MLP) -------
    avg = jnp.mean(x, axis=1, keepdims=True)   # (C, 1)
    mx = jnp.max(x, axis=1, keepdims=True)     # (C, 1)

    ca_w1t = ca_w1t_ref[...]                   # (C, C//16)  == W1.T
    ca_w2 = ca_w2_ref[...]                     # (C, C//16)

    def shared_mlp(p):                         # (C, 1) -> (C, 1)
        h = jnp.sum(ca_w1t * p, axis=0, keepdims=True)       # (1, C//16)
        h = jnp.maximum(h, 0.0)
        return jnp.sum(ca_w2 * h, axis=1, keepdims=True)     # (C, 1)

    att = jax.nn.sigmoid(shared_mlp(avg) + shared_mlp(mx))   # (C, 1)
    xa = x * att                                              # (C, HW)

    # ---------------- multi-scale dilated depthwise branch -----------------------
    # All four scale blocks LayerNorm the SAME first channel chunk of xa, so the
    # normalisation statistics are computed once; only the affine differs.
    y = xa[0:Cr, :]                                           # (Cr, HW)
    u = jnp.mean(y, axis=0, keepdims=True)                    # (1, HW)
    var = jnp.mean((y - u) ** 2, axis=0, keepdims=True)
    yhat = (y - u) * jax.lax.rsqrt(var + eps)                 # (Cr, HW)

    ln_w = ln_w_ref[...]                                      # (Cr, 4)
    ln_b = ln_b_ref[...]                                      # (Cr, 4)
    dw_w = dw_w_ref[...]                                      # (Cr, 4*9)
    dw_b = dw_b_ref[...]                                      # (Cr, 4)

    feats = []
    for s, d in enumerate(d_list):
        yn = ln_w[:, s:s + 1] * yhat + ln_b[:, s:s + 1]       # (Cr, HW)
        acc = jnp.zeros((Cr, HW), jnp.float32)
        for i in range(3):
            for j in range(3):
                oh = d * (i - 1)
                ow = d * (j - 1)
                t = s * 9 + i * 3 + j
                tap = dw_w[:, t:t + 1]                        # (Cr, 1)
                if oh == 0 and ow == 0:
                    src = yn
                else:
                    # Circular lane rotation (XLU): src[p] = yn[(p + oh*W + ow) mod HW].
                    # Out-of-image contributions are zeroed by the precomputed mask;
                    # for in-image positions the flat index never wraps, so the
                    # rotation is exact.
                    shift = (-(oh * W + ow)) % HW
                    src = pltpu.roll(yn, shift, 1) * masks_ref[t:t + 1, :]
                acc = acc + tap * src
        feats.append(acc + dw_b[:, s:s + 1])                  # depthwise conv bias

    xcat = jnp.concatenate(feats, axis=0)                     # (C, HW)

    # ---------------- fusion: LayerNorm -> 1x1 conv -> GELU ----------------------
    u2 = jnp.mean(xcat, axis=0, keepdims=True)
    var2 = jnp.mean((xcat - u2) ** 2, axis=0, keepdims=True)
    xn = (xcat - u2) * jax.lax.rsqrt(var2 + eps)
    xn = fln_w_ref[...] * xn + fln_b_ref[...]                 # per-channel affine
    xf = jnp.dot(fw_ref[...], xn, preferred_element_type=jnp.float32) + fb_ref[...]
    xf = _gelu_tanh(xf)

    # ---------------- residual 1x1 conv on the attention-weighted xl -------------
    res = jnp.dot(rw_ref[...], xa, preferred_element_type=jnp.float32) + rb_ref[...]

    out_ref[0, :, :] = (xf + res).astype(out_ref.dtype)


def group_aggregation_bridge_forward(xh, xl, mask, params, d_list=D_LIST):
    """Pallas forward of group_aggregation_bridge.forward(xh, xl, mask).

    `pre_project(xh)` + bilinear interpolation and `mask` are dead code in the
    reference module (never used by the output), so they are not computed.
    # TODO(synk): wire xh/mask in if the upstream model ever consumes them.
    """
    del xh, mask
    B, C, H, W = xl.shape
    assert C % 4 == 0 and C % 16 == 0, "dim_xl must be divisible by 16"
    assert len(d_list) == 4, "module concatenates exactly 4 scale branches"
    Cr = C // 4
    HW = H * W
    n_taps = len(d_list) * 9

    xl_flat = xl.reshape(B, C, HW).astype(jnp.float32)

    # Host-precomputed boundary masks, one lane-row per (scale, tap): 1 where the
    # dilated-tap source pixel is inside the image, 0 otherwise.  Removes all
    # integer compare chains from the kernel hot loop.
    p = np.arange(HW)
    r = p // W
    c = p % W
    rows = []
    for d in d_list:
        for i in range(3):
            for j in range(3):
                oh = d * (i - 1)
                ow = d * (j - 1)
                valid = ((r + oh >= 0) & (r + oh < H) & (c + ow >= 0) & (c + ow < W))
                rows.append(valid.astype(np.float32))
    tap_masks = jnp.asarray(np.stack(rows, axis=0))                   # (36, HW)

    # Pack parameters into kernel-friendly 2D layouts: channel on sublanes,
    # "which scale / which tap" on lanes, so a single static lane-slice yields a
    # (channels, 1) column that broadcasts along the lane (spatial) axis.
    ca_w1t = params["ca_w1"].T.astype(jnp.float32)                    # (C, C//16)
    ca_w2 = params["ca_w2"].astype(jnp.float32)                       # (C, C//16)
    ln_w = params["ln_w"].T.astype(jnp.float32)                       # (Cr, 4)
    ln_b = params["ln_b"].T.astype(jnp.float32)                       # (Cr, 4)
    dw_w = jnp.transpose(params["dw_w"], (1, 0, 2, 3)).reshape(
        Cr, n_taps).astype(jnp.float32)                               # (Cr, 36)
    dw_b = params["dw_b"].T.astype(jnp.float32)                       # (Cr, 4)
    fln_w = params["fln_w"].reshape(C, 1).astype(jnp.float32)
    fln_b = params["fln_b"].reshape(C, 1).astype(jnp.float32)
    fw = params["fw"].astype(jnp.float32)                             # (C, C)
    fb = params["fb"].reshape(C, 1).astype(jnp.float32)
    rw = params["rw"].astype(jnp.float32)                             # (C, C)
    rb = params["rb"].reshape(C, 1).astype(jnp.float32)

    def _const_spec(a):
        zeros = (0,) * a.ndim
        return pl.BlockSpec(a.shape, lambda b, _z=zeros: _z)

    consts = (tap_masks, ca_w1t, ca_w2, ln_w, ln_b, dw_w, dw_b,
              fln_w, fln_b, fw, fb, rw, rb)

    kernel = functools.partial(
        _gab_kernel, H=H, W=W, d_list=tuple(d_list), eps=LN_EPS)

    out = pl.pallas_call(
        kernel,
        out_shape=jax.ShapeDtypeStruct((B, C, HW), jnp.float32),
        grid=(B,),
        in_specs=[pl.BlockSpec((1, C, HW), lambda b: (b, 0, 0))]
                 + [_const_spec(a) for a in consts],
        out_specs=pl.BlockSpec((1, C, HW), lambda b: (b, 0, 0)),
        compiler_params=pltpu.CompilerParams(
            dimension_semantics=("parallel",),   # samples independent -> megacore
        ),
    )(xl_flat, *consts)

    return out.reshape(B, C, H, W)


def group_aggregation_bridge_reference(xl, params, d_list=D_LIST, eps=LN_EPS):
    """Pure-JAX reference matching the PyTorch module (NCHW)."""
    B, C, H, W = xl.shape
    Cr = C // 4
    hp = jax.lax.Precision.HIGHEST

    # channel attention
    avg = xl.mean(axis=(2, 3))                               # (B, C)
    mx = xl.max(axis=(2, 3))                                 # (B, C)

    def mlp(v):
        h = jnp.maximum(jnp.einsum("rc,bc->br", params["ca_w1"], v, precision=hp), 0.0)
        return jnp.einsum("cr,br->bc", params["ca_w2"], h, precision=hp)

    att = jax.nn.sigmoid(mlp(avg) + mlp(mx))
    xa = xl * att[:, :, None, None]

    # multi-scale dilated depthwise branch on the first channel chunk
    y = xa[:, :Cr]
    u = y.mean(axis=1, keepdims=True)
    var = ((y - u) ** 2).mean(axis=1, keepdims=True)
    yhat = (y - u) * jax.lax.rsqrt(var + eps)

    feats = []
    for s, d in enumerate(d_list):
        yn = (params["ln_w"][s][None, :, None, None] * yhat
              + params["ln_b"][s][None, :, None, None])
        ypad = jnp.pad(yn, ((0, 0), (0, 0), (d, d), (d, d)))
        acc = jnp.zeros_like(yn)
        for i in range(3):
            for j in range(3):
                tap = params["dw_w"][s, :, i, j][None, :, None, None]
                acc = acc + tap * ypad[:, :, i * d:i * d + H, j * d:j * d + W]
        feats.append(acc + params["dw_b"][s][None, :, None, None])
    x = jnp.concatenate(feats, axis=1)

    # fusion conv
    u2 = x.mean(axis=1, keepdims=True)
    var2 = ((x - u2) ** 2).mean(axis=1, keepdims=True)
    xn = (x - u2) * jax.lax.rsqrt(var2 + eps)
    xn = (params["fln_w"][None, :, None, None] * xn
          + params["fln_b"][None, :, None, None])
    xf = (jnp.einsum("oc,bchw->bohw", params["fw"], xn, precision=hp)
          + params["fb"][None, :, None, None])
    xf = _gelu_tanh(xf)

    res = (jnp.einsum("oc,bchw->bohw", params["rw"], xa, precision=hp)
           + params["rb"][None, :, None, None])
    return xf + res


if __name__ == "__main__":
    key = jax.random.PRNGKey(0)
    ks = jax.random.split(key, 16)

    B = 2
    dim_xh, dim_xl = 64, 32
    H = W = 16
    C = dim_xl
    Cr = C // 4
    n_scales = len(D_LIST)

    # xh / mask are accepted for interface parity but are dead code in the forward.
    xh = jax.random.normal(ks[0], (B, dim_xh, H // 2, W // 2), jnp.float32)
    xl = jax.random.normal(ks[1], (B, C, H, W), jnp.float32)
    mask = (jax.random.uniform(ks[2], (B, 1, H, W)) > 0.5).astype(jnp.float32)

    params = {
        "ca_w1": jax.random.normal(ks[3], (C // 16, C), jnp.float32) / (C ** 0.5),
        "ca_w2": jax.random.normal(ks[4], (C, C // 16), jnp.float32) / ((C // 16) ** 0.5),
        "ln_w": 1.0 + 0.1 * jax.random.normal(ks[5], (n_scales, Cr), jnp.float32),
        "ln_b": 0.1 * jax.random.normal(ks[6], (n_scales, Cr), jnp.float32),
        "dw_w": 0.3 * jax.random.normal(ks[7], (n_scales, Cr, 3, 3), jnp.float32),
        "dw_b": 0.1 * jax.random.normal(ks[8], (n_scales, Cr), jnp.float32),
        "fln_w": 1.0 + 0.1 * jax.random.normal(ks[9], (C,), jnp.float32),
        "fln_b": 0.1 * jax.random.normal(ks[10], (C,), jnp.float32),
        "fw": jax.random.normal(ks[11], (C, C), jnp.float32) / (C ** 0.5),
        "fb": 0.1 * jax.random.normal(ks[12], (C,), jnp.float32),
        "rw": jax.random.normal(ks[13], (C, C), jnp.float32) / (C ** 0.5),
        "rb": 0.1 * jax.random.normal(ks[14], (C,), jnp.float32),
    }

    out = group_aggregation_bridge_forward(xh, xl, mask, params)
    out = jax.block_until_ready(out)

    ref = group_aggregation_bridge_reference(xl, params)
    assert out.shape == ref.shape, (out.shape, ref.shape)
    max_err = float(jnp.max(jnp.abs(out - ref)))
    assert jnp.allclose(out, ref, atol=5e-3, rtol=5e-3), f"max abs err = {max_err}"

    print("KERNEL_OK")
</pallas_src>

<mosaic_0001>
module attributes {stable_mosaic.version = 11 : i64} {
  func.func @_gab_kernel(%arg0: i32, %arg1: memref<1x32x256xf32, #tpu.memory_space<vmem>>, %arg2: memref<36x256xf32, #tpu.memory_space<vmem>>, %arg3: memref<32x2xf32, #tpu.memory_space<vmem>>, %arg4: memref<32x2xf32, #tpu.memory_space<vmem>>, %arg5: memref<8x4xf32, #tpu.memory_space<vmem>>, %arg6: memref<8x4xf32, #tpu.memory_space<vmem>>, %arg7: memref<8x36xf32, #tpu.memory_space<vmem>>, %arg8: memref<8x4xf32, #tpu.memory_space<vmem>>, %arg9: memref<32x1xf32, #tpu.memory_space<vmem>>, %arg10: memref<32x1xf32, #tpu.memory_space<vmem>>, %arg11: memref<32x32xf32, #tpu.memory_space<vmem>>, %arg12: memref<32x1xf32, #tpu.memory_space<vmem>>, %arg13: memref<32x32xf32, #tpu.memory_space<vmem>>, %arg14: memref<32x1xf32, #tpu.memory_space<vmem>>, %arg15: memref<1x32x256xf32, #tpu.memory_space<vmem>>) attributes {dimension_semantics = [#tpu.dimension_semantics<parallel>], iteration_bounds = array<i64: 2>, scalar_prefetch = 0 : i64, scratch_operands = 0 : i64, tpu.core_type = #tpu.core_type<tc>, window_params = [{transform_indices = @transform_0, window_bounds = array<i64: 1, 32, 256>}, {pipeline_mode = #tpu.pipeline_mode<synchronous>, transform_indices = @transform_1, window_bounds = array<i64: 36, 256>}, {pipeline_mode = #tpu.pipeline_mode<synchronous>, transform_indices = @transform_2, window_bounds = array<i64: 32, 2>}, {pipeline_mode = #tpu.pipeline_mode<synchronous>, transform_indices = @transform_3, window_bounds = array<i64: 32, 2>}, {pipeline_mode = #tpu.pipeline_mode<synchronous>, transform_indices = @transform_4, window_bounds = array<i64: 8, 4>}, {pipeline_mode = #tpu.pipeline_mode<synchronous>, transform_indices = @transform_5, window_bounds = array<i64: 8, 4>}, {pipeline_mode = #tpu.pipeline_mode<synchronous>, transform_indices = @transform_6, window_bounds = array<i64: 8, 36>}, {pipeline_mode = #tpu.pipeline_mode<synchronous>, transform_indices = @transform_7, window_bounds = array<i64: 8, 4>}, {pipeline_mode = #tpu.pipeline_mode<synchronous>, transform_indices = @transform_8, window_bounds = array<i64: 32, 1>}, {pipeline_mode = #tpu.pipeline_mode<synchronous>, transform_indices = @transform_9, window_bounds = array<i64: 32, 1>}, {pipeline_mode = #tpu.pipeline_mode<synchronous>, transform_indices = @transform_10, window_bounds = array<i64: 32, 32>}, {pipeline_mode = #tpu.pipeline_mode<synchronous>, transform_indices = @transform_11, window_bounds = array<i64: 32, 1>}, {pipeline_mode = #tpu.pipeline_mode<synchronous>, transform_indices = @transform_12, window_bounds = array<i64: 32, 32>}, {pipeline_mode = #tpu.pipeline_mode<synchronous>, transform_indices = @transform_13, window_bounds = array<i64: 32, 1>}, {transform_indices = @transform_14, window_bounds = array<i64: 1, 32, 256>}]} {
    %c0 = arith.constant 0 : index
    %c0_0 = arith.constant 0 : index
    %c0_1 = arith.constant 0 : index
    %0 = vector.load %arg1[%c0, %c0_0, %c0_1] : memref<1x32x256xf32, #tpu.memory_space<vmem>>, vector<1x32x256xf32>
    %1 = vector.shape_cast %0 : vector<1x32x256xf32> to vector<32x256xf32>
    %cst = arith.constant dense<0.000000e+00> : vector<32xf32>
    %2 = vector.multi_reduction <add>, %1, %cst [1] : vector<32x256xf32> to vector<32xf32>
    %3 = vector.shape_cast %2 : vector<32xf32> to vector<32x1xf32>
    %cst_2 = arith.constant 2.560000e+02 : f32
    %4 = vector.broadcast %cst_2 : f32 to vector<32x1xf32>
    %5 = arith.divf %3, %4 : vector<32x1xf32>
    %cst_3 = arith.constant dense<0xFF800000> : vector<32xf32>
    %6 = vector.multi_reduction <maximumf>, %1, %cst_3 [1] : vector<32x256xf32> to vector<32xf32>
    %7 = vector.shape_cast %6 : vector<32xf32> to vector<32x1xf32>
    %c0_4 = arith.constant 0 : index
    %c0_5 = arith.constant 0 : index
    %8 = vector.load %arg3[%c0_4, %c0_5] : memref<32x2xf32, #tpu.memory_space<vmem>>, vector<32x2xf32>
    %c0_6 = arith.constant 0 : index
    %c0_7 = arith.constant 0 : index
    %9 = vector.load %arg4[%c0_6, %c0_7] : memref<32x2xf32, #tpu.memory_space<vmem>>, vector<32x2xf32>
    %10 = vector.broadcast %5 : vector<32x1xf32> to vector<32x2xf32>
    %11 = arith.mulf %8, %10 : vector<32x2xf32>
    %cst_8 = arith.constant dense<0.000000e+00> : vector<2xf32>
    %12 = vector.multi_reduction <add>, %11, %cst_8 [0] : vector<32x2xf32> to vector<2xf32>
    %13 = vector.shape_cast %12 : vector<2xf32> to vector<1x2xf32>
    %cst_9 = arith.constant 0.000000e+00 : f32
    %14 = vector.broadcast %cst_9 : f32 to vector<1x2xf32>
    %15 = arith.maximumf %13, %14 : vector<1x2xf32>
    %16 = vector.broadcast %15 : vector<1x2xf32> to vector<32x2xf32>
    %17 = arith.mulf %9, %16 : vector<32x2xf32>
    %cst_10 = arith.constant dense<0.000000e+00> : vector<32xf32>
    %18 = vector.multi_reduction <add>, %17, %cst_10 [1] : vector<32x2xf32> to vector<32xf32>
    %19 = vector.shape_cast %18 : vector<32xf32> to vector<32x1xf32>
    %20 = vector.broadcast %7 : vector<32x1xf32> to vector<32x2xf32>
    %21 = arith.mulf %8, %20 : vector<32x2xf32>
    %cst_11 = arith.constant dense<0.000000e+00> : vector<2xf32>
    %22 = vector.multi_reduction <add>, %21, %cst_11 [0] : vector<32x2xf32> to vector<2xf32>
    %23 = vector.shape_cast %22 : vector<2xf32> to vector<1x2xf32>
    %cst_12 = arith.constant 0.000000e+00 : f32
    %24 = vector.broadcast %cst_12 : f32 to vector<1x2xf32>
    %25 = arith.maximumf %23, %24 : vector<1x2xf32>
    %26 = vector.broadcast %25 : vector<1x2xf32> to vector<32x2xf32>
    %27 = arith.mulf %9, %26 : vector<32x2xf32>
    %cst_13 = arith.constant dense<0.000000e+00> : vector<32xf32>
    %28 = vector.multi_reduction <add>, %27, %cst_13 [1] : vector<32x2xf32> to vector<32xf32>
    %29 = vector.shape_cast %28 : vector<32xf32> to vector<32x1xf32>
    %30 = arith.addf %19, %29 : vector<32x1xf32>
    %31 = arith.negf %30 : vector<32x1xf32>
    %32 = math.exp %31 : vector<32x1xf32>
    %cst_14 = arith.constant 1.000000e+00 : f32
    %33 = vector.broadcast %cst_14 : f32 to vector<32x1xf32>
    %34 = arith.addf %33, %32 : vector<32x1xf32>
    %35 = arith.divf %33, %34 : vector<32x1xf32>
    %36 = vector.broadcast %35 : vector<32x1xf32> to vector<32x256xf32>
    %37 = arith.mulf %1, %36 : vector<32x256xf32>
    %38 = vector.extract_strided_slice %37 {offsets = [0, 0], sizes = [8, 256], strides = [1, 1]} : vector<32x256xf32> to vector<8x256xf32>
    %cst_15 = arith.constant dense<0.000000e+00> : vector<256xf32>
    %39 = vector.multi_reduction <add>, %38, %cst_15 [0] : vector<8x256xf32> to vector<256xf32>
    %40 = vector.shape_cast %39 : vector<256xf32> to vector<1x256xf32>
    %cst_16 = arith.constant 8.000000e+00 : f32
    %41 = vector.broadcast %cst_16 : f32 to vector<1x256xf32>
    %42 = arith.divf %40, %41 : vector<1x256xf32>
    %43 = vector.broadcast %42 : vector<1x256xf32> to vector<8x256xf32>
    %44 = arith.subf %38, %43 : vector<8x256xf32>
    %45 = arith.mulf %44, %44 : vector<8x256xf32>
    %cst_17 = arith.constant dense<0.000000e+00> : vector<256xf32>
    %46 = vector.multi_reduction <add>, %45, %cst_17 [0] : vector<8x256xf32> to vector<256xf32>
    %47 = vector.shape_cast %46 : vector<256xf32> to vector<1x256xf32>
    %cst_18 = arith.constant 8.000000e+00 : f32
    %48 = vector.broadcast %cst_18 : f32 to vector<1x256xf32>
    %49 = arith.divf %47, %48 : vector<1x256xf32>
    %50 = vector.broadcast %42 : vector<1x256xf32> to vector<8x256xf32>
    %51 = arith.subf %38, %50 : vector<8x256xf32>
    %cst_19 = arith.constant 9.99999997E-7 : f32
    %52 = vector.broadcast %cst_19 : f32 to vector<1x256xf32>
    %53 = arith.addf %49, %52 : vector<1x256xf32>
    %54 = math.rsqrt %53 : vector<1x256xf32>
    %55 = vector.broadcast %54 : vector<1x256xf32> to vector<8x256xf32>
    %56 = arith.mulf %51, %55 : vector<8x256xf32>
    %c0_20 = arith.constant 0 : index
    %c0_21 = arith.constant 0 : index
    %57 = vector.load %arg5[%c0_20, %c0_21] : memref<8x4xf32, #tpu.memory_space<vmem>>, vector<8x4xf32>
    %c0_22 = arith.constant 0 : index
    %c0_23 = arith.constant 0 : index
    %58 = vector.load %arg6[%c0_22, %c0_23] : memref<8x4xf32, #tpu.memory_space<vmem>>, vector<8x4xf32>
    %c0_24 = arith.constant 0 : index
    %c0_25 = arith.constant 0 : index
    %59 = vector.load %arg7[%c0_24, %c0_25] : memref<8x36xf32, #tpu.memory_space<vmem>>, vector<8x36xf32>
    %c0_26 = arith.constant 0 : index
    %c0_27 = arith.constant 0 : index
    %60 = vector.load %arg8[%c0_26, %c0_27] : memref<8x4xf32, #tpu.memory_space<vmem>>, vector<8x4xf32>
    %61 = vector.extract_strided_slice %57 {offsets = [0, 0], sizes = [8, 1], strides = [1, 1]} : vector<8x4xf32> to vector<8x1xf32>
    %62 = vector.broadcast %61 : vector<8x1xf32> to vector<8x256xf32>
    %63 = arith.mulf %62, %56 : vector<8x256xf32>
    %64 = vector.extract_strided_slice %58 {offsets = [0, 0], sizes = [8, 1], strides = [1, 1]} : vector<8x4xf32> to vector<8x1xf32>
    %65 = vector.broadcast %64 : vector<8x1xf32> to vector<8x256xf32>
    %66 = arith.addf %63, %65 : vector<8x256xf32>
    %cst_28 = arith.constant 0.000000e+00 : f32
    %67 = vector.broadcast %cst_28 : f32 to vector<8x256xf32>
    %68 = vector.extract_strided_slice %59 {offsets = [0, 0], sizes = [8, 1], strides = [1, 1]} : vector<8x36xf32> to vector<8x1xf32>
    %c17_i32 = arith.constant 17 : i32
    %69 = tpu.dynamic_rotate %66 by %c17_i32 dim 1 : vector<8x256xf32>, i32 -> vector<8x256xf32>
    %c0_29 = arith.constant 0 : index
    %c0_30 = arith.constant 0 : index
    %70 = vector.load %arg2[%c0_29, %c0_30] : memref<36x256xf32, #tpu.memory_space<vmem>>, vector<1x256xf32>
    %71 = vector.broadcast %70 : vector<1x256xf32> to vector<8x256xf32>
    %72 = arith.mulf %69, %71 : vector<8x256xf32>
    %73 = vector.broadcast %68 : vector<8x1xf32> to vector<8x256xf32>
    %74 = arith.mulf %73, %72 : vector<8x256xf32>
    %75 = arith.addf %67, %74 : vector<8x256xf32>
    %76 = vector.extract_strided_slice %59 {offsets = [0, 1], sizes = [8, 1], strides = [1, 1]} : vector<8x36xf32> to vector<8x1xf32>
    %c16_i32 = arith.constant 16 : i32
    %77 = tpu.dynamic_rotate %66 by %c16_i32 dim 1 : vector<8x256xf32>, i32 -> vector<8x256xf32>
    %c1 = arith.constant 1 : index
    %c0_31 = arith.constant 0 : index
    %78 = vector.load %arg2[%c1, %c0_31] : memref<36x256xf32, #tpu.memory_space<vmem>>, vector<1x256xf32>
    %79 = vector.broadcast %78 : vector<1x256xf32> to vector<8x256xf32>
    %80 = arith.mulf %77, %79 : vector<8x256xf32>
    %81 = vector.broadcast %76 : vector<8x1xf32> to vector<8x256xf32>
    %82 = arith.mulf %81, %80 : vector<8x256xf32>
    %83 = arith.addf %75, %82 : vector<8x256xf32>
    %84 = vector.extract_strided_slice %59 {offsets = [0, 2], sizes = [8, 1], strides = [1, 1]} : vector<8x36xf32> to vector<8x1xf32>
    %c15_i32 = arith.constant 15 : i32
    %85 = tpu.dynamic_rotate %66 by %c15_i32 dim 1 : vector<8x256xf32>, i32 -> vector<8x256xf32>
    %c2 = arith.constant 2 : index
    %c0_32 = arith.constant 0 : index
    %86 = vector.load %arg2[%c2, %c0_32] : memref<36x256xf32, #tpu.memory_space<vmem>>, vector<1x256xf32>
    %87 = vector.broadcast %86 : vector<1x256xf32> to vector<8x256xf32>
    %88 = arith.mulf %85, %87 : vector<8x256xf32>
    %89 = vector.broadcast %84 : vector<8x1xf32> to vector<8x256xf32>
    %90 = arith.mulf %89, %88 : vector<8x256xf32>
    %91 = arith.addf %83, %90 : vector<8x256xf32>
    %92 = vector.extract_strided_slice %59 {offsets = [0, 3], sizes = [8, 1], strides = [1, 1]} : vector<8x36xf32> to vector<8x1xf32>
    %c1_i32 = arith.constant 1 : i32
    %93 = tpu.dynamic_rotate %66 by %c1_i32 dim 1 : vector<8x256xf32>, i32 -> vector<8x256xf32>
    %c3 = arith.constant 3 : index
    %c0_33 = arith.constant 0 : index
    %94 = vector.load %arg2[%c3, %c0_33] : memref<36x256xf32, #tpu.memory_space<vmem>>, vector<1x256xf32>
    %95 = vector.broadcast %94 : vector<1x256xf32> to vector<8x256xf32>
    %96 = arith.mulf %93, %95 : vector<8x256xf32>
    %97 = vector.broadcast %92 : vector<8x1xf32> to vector<8x256xf32>
    %98 = arith.mulf %97, %96 : vector<8x256xf32>
    %99 = arith.addf %91, %98 : vector<8x256xf32>
    %100 = vector.extract_strided_slice %59 {offsets = [0, 4], sizes = [8, 1], strides = [1, 1]} : vector<8x36xf32> to vector<8x1xf32>
    %101 = vector.broadcast %100 : vector<8x1xf32> to vector<8x256xf32>
    %102 = arith.mulf %101, %66 : vector<8x256xf32>
    %103 = arith.addf %99, %102 : vector<8x256xf32>
    %104 = vector.extract_strided_slice %59 {offsets = [0, 5], sizes = [8, 1], strides = [1, 1]} : vector<8x36xf32> to vector<8x1xf32>
    %c255_i32 = arith.constant 255 : i32
    %105 = tpu.dynamic_rotate %66 by %c255_i32 dim 1 : vector<8x256xf32>, i32 -> vector<8x256xf32>
    %c5 = arith.constant 5 : index
    %c0_34 = arith.constant 0 : index
    %106 = vector.load %arg2[%c5, %c0_34] : memref<36x256xf32, #tpu.memory_space<vmem>>, vector<1x256xf32>
    %107 = vector.broadcast %106 : vector<1x256xf32> to vector<8x256xf32>
    %108 = arith.mulf %105, %107 : vector<8x256xf32>
    %109 = vector.broadcast %104 : vector<8x1xf32> to vector<8x256xf32>
    %110 = arith.mulf %109, %108 : vector<8x256xf32>
    %111 = arith.addf %103, %110 : vector<8x256xf32>
    %112 = vector.extract_strided_slice %59 {offsets = [0, 6], sizes = [8, 1], strides = [1, 1]} : vector<8x36xf32> to vector<8x1xf32>
    %c241_i32 = arith.constant 241 : i32
    %113 = tpu.dynamic_rotate %66 by %c241_i32 dim 1 : vector<8x256xf32>, i32 -> vector<8x256xf32>
    %c6 = arith.constant 6 : index
    %c0_35 = arith.constant 0 : index
    %114 = vector.load %arg2[%c6, %c0_35] : memref<36x256xf32, #tpu.memory_space<vmem>>, vector<1x256xf32>
    %115 = vector.broadcast %114 : vector<1x256xf32> to vector<8x256xf32>
    %116 = arith.mulf %113, %115 : vector<8x256xf32>
    %117 = vector.broadcast %112 : vector<8x1xf32> to vector<8x256xf32>
    %118 = arith.mulf %117, %116 : vector<8x256xf32>
    %119 = arith.addf %111, %118 : vector<8x256xf32>
    %120 = vector.extract_strided_slice %59 {offsets = [0, 7], sizes = [8, 1], strides = [1, 1]} : vector<8x36xf32> to vector<8x1xf32>
    %c240_i32 = arith.constant 240 : i32
    %121 = tpu.dynamic_rotate %66 by %c240_i32 dim 1 : vector<8x256xf32>, i32 -> vector<8x256xf32>
    %c7 = arith.constant 7 : index
    %c0_36 = arith.constant 0 : index
    %122 = vector.load %arg2[%c7, %c0_36] : memref<36x256xf32, #tpu.memory_space<vmem>>, vector<1x256xf32>
    %123 = vector.broadcast %122 : vector<1x256xf32> to vector<8x256xf32>
    %124 = arith.mulf %121, %123 : vector<8x256xf32>
    %125 = vector.broadcast %120 : vector<8x1xf32> to vector<8x256xf32>
    %126 = arith.mulf %125, %124 : vector<8x256xf32>
    %127 = arith.addf %119, %126 : vector<8x256xf32>
    %128 = vector.extract_strided_slice %59 {offsets = [0, 8], sizes = [8, 1], strides = [1, 1]} : vector<8x36xf32> to vector<8x1xf32>
    %c239_i32 = arith.constant 239 : i32
    %129 = tpu.dynamic_rotate %66 by %c239_i32 dim 1 : vector<8x256xf32>, i32 -> vector<8x256xf32>
    %c8 = arith.constant 8 : index
    %c0_37 = arith.constant 0 : index
    %130 = vector.load %arg2[%c8, %c0_37] : memref<36x256xf32, #tpu.memory_space<vmem>>, vector<1x256xf32>
    %131 = vector.broadcast %130 : vector<1x256xf32> to vector<8x256xf32>
    %132 = arith.mulf %129, %131 : vector<8x256xf32>
    %133 = vector.broadcast %128 : vector<8x1xf32> to vector<8x256xf32>
    %134 = arith.mulf %133, %132 : vector<8x256xf32>
    %135 = arith.addf %127, %134 : vector<8x256xf32>
    %136 = vector.extract_strided_slice %60 {offsets = [0, 0], sizes = [8, 1], strides = [1, 1]} : vector<8x4xf32> to vector<8x1xf32>
    %137 = vector.broadcast %136 : vector<8x1xf32> to vector<8x256xf32>
    %138 = arith.addf %135, %137 : vector<8x256xf32>
    %139 = vector.extract_strided_slice %57 {offsets = [0, 1], sizes = [8, 1], strides = [1, 1]} : vector<8x4xf32> to vector<8x1xf32>
    %140 = vector.broadcast %139 : vector<8x1xf32> to vector<8x256xf32>
    %141 = arith.mulf %140, %56 : vector<8x256xf32>
    %142 = vector.extract_strided_slice %58 {offsets = [0, 1], sizes = [8, 1], strides = [1, 1]} : vector<8x4xf32> to vector<8x1xf32>
    %143 = vector.broadcast %142 : vector<8x1xf32> to vector<8x256xf32>
    %144 = arith.addf %141, %143 : vector<8x256xf32>
    %cst_38 = arith.constant 0.000000e+00 : f32
    %145 = vector.broadcast %cst_38 : f32 to vector<8x256xf32>
    %146 = vector.extract_strided_slice %59 {offsets = [0, 9], sizes = [8, 1], strides = [1, 1]} : vector<8x36xf32> to vector<8x1xf32>
    %c34_i32 = arith.constant 34 : i32
    %147 = tpu.dynamic_rotate %144 by %c34_i32 dim 1 : vector<8x256xf32>, i32 -> vector<8x256xf32>
    %c9 = arith.constant 9 : index
    %c0_39 = arith.constant 0 : index
    %148 = vector.load %arg2[%c9, %c0_39] : memref<36x256xf32, #tpu.memory_space<vmem>>, vector<1x256xf32>
    %149 = vector.broadcast %148 : vector<1x256xf32> to vector<8x256xf32>
    %150 = arith.mulf %147, %149 : vector<8x256xf32>
    %151 = vector.broadcast %146 : vector<8x1xf32> to vector<8x256xf32>
    %152 = arith.mulf %151, %150 : vector<8x256xf32>
    %153 = arith.addf %145, %152 : vector<8x256xf32>
    %154 = vector.extract_strided_slice %59 {offsets = [0, 10], sizes = [8, 1], strides = [1, 1]} : vector<8x36xf32> to vector<8x1xf32>
    %c32_i32 = arith.constant 32 : i32
    %155 = tpu.dynamic_rotate %144 by %c32_i32 dim 1 : vector<8x256xf32>, i32 -> vector<8x256xf32>
    %c10 = arith.constant 10 : index
    %c0_40 = arith.constant 0 : index
    %156 = vector.load %arg2[%c10, %c0_40] : memref<36x256xf32, #tpu.memory_space<vmem>>, vector<1x256xf32>
    %157 = vector.broadcast %156 : vector<1x256xf32> to vector<8x256xf32>
    %158 = arith.mulf %155, %157 : vector<8x256xf32>
    %159 = vector.broadcast %154 : vector<8x1xf32> to vector<8x256xf32>
    %160 = arith.mulf %159, %158 : vector<8x256xf32>
    %161 = arith.addf %153, %160 : vector<8x256xf32>
    %162 = vector.extract_strided_slice %59 {offsets = [0, 11], sizes = [8, 1], strides = [1, 1]} : vector<8x36xf32> to vector<8x1xf32>
    %c30_i32 = arith.constant 30 : i32
    %163 = tpu.dynamic_rotate %144 by %c30_i32 dim 1 : vector<8x256xf32>, i32 -> vector<8x256xf32>
    %c11 = arith.constant 11 : index
    %c0_41 = arith.constant 0 : index
    %164 = vector.load %arg2[%c11, %c0_41] : memref<36x256xf32, #tpu.memory_space<vmem>>, vector<1x256xf32>
    %165 = vector.broadcast %164 : vector<1x256xf32> to vector<8x256xf32>
    %166 = arith.mulf %163, %165 : vector<8x256xf32>
    %167 = vector.broadcast %162 : vector<8x1xf32> to vector<8x256xf32>
    %168 = arith.mulf %167, %166 : vector<8x256xf32>
    %169 = arith.addf %161, %168 : vector<8x256xf32>
    %170 = vector.extract_strided_slice %59 {offsets = [0, 12], sizes = [8, 1], strides = [1, 1]} : vector<8x36xf32> to vector<8x1xf32>
    %c2_i32 = arith.constant 2 : i32
    %171 = tpu.dynamic_rotate %144 by %c2_i32 dim 1 : vector<8x256xf32>, i32 -> vector<8x256xf32>
    %c12 = arith.constant 12 : index
    %c0_42 = arith.constant 0 : index
    %172 = vector.load %arg2[%c12, %c0_42] : memref<36x256xf32, #tpu.memory_space<vmem>>, vector<1x256xf32>
    %173 = vector.broadcast %172 : vector<1x256xf32> to vector<8x256xf32>
    %174 = arith.mulf %171, %173 : vector<8x256xf32>
    %175 = vector.broadcast %170 : vector<8x1xf32> to vector<8x256xf32>
    %176 = arith.mulf %175, %174 : vector<8x256xf32>
    %177 = arith.addf %169, %176 : vector<8x256xf32>
    %178 = vector.extract_strided_slice %59 {offsets = [0, 13], sizes = [8, 1], strides = [1, 1]} : vector<8x36xf32> to vector<8x1xf32>
    %179 = vector.broadcast %178 : vector<8x1xf32> to vector<8x256xf32>
    %180 = arith.mulf %179, %144 : vector<8x256xf32>
    %181 = arith.addf %177, %180 : vector<8x256xf32>
    %182 = vector.extract_strided_slice %59 {offsets = [0, 14], sizes = [8, 1], strides = [1, 1]} : vector<8x36xf32> to vector<8x1xf32>
    %c254_i32 = arith.constant 254 : i32
    %183 = tpu.dynamic_rotate %144 by %c254_i32 dim 1 : vector<8x256xf32>, i32 -> vector<8x256xf32>
    %c14 = arith.constant 14 : index
    %c0_43 = arith.constant 0 : index
    %184 = vector.load %arg2[%c14, %c0_43] : memref<36x256xf32, #tpu.memory_space<vmem>>, vector<1x256xf32>
    %185 = vector.broadcast %184 : vector<1x256xf32> to vector<8x256xf32>
    %186 = arith.mulf %183, %185 : vector<8x256xf32>
    %187 = vector.broadcast %182 : vector<8x1xf32> to vector<8x256xf32>
    %188 = arith.mulf %187, %186 : vector<8x256xf32>
    %189 = arith.addf %181, %188 : vector<8x256xf32>
    %190 = vector.extract_strided_slice %59 {offsets = [0, 15], sizes = [8, 1], strides = [1, 1]} : vector<8x36xf32> to vector<8x1xf32>
    %c226_i32 = arith.constant 226 : i32
    %191 = tpu.dynamic_rotate %144 by %c226_i32 dim 1 : vector<8x256xf32>, i32 -> vector<8x256xf32>
    %c15 = arith.constant 15 : index
    %c0_44 = arith.constant 0 : index
    %192 = vector.load %arg2[%c15, %c0_44] : memref<36x256xf32, #tpu.memory_space<vmem>>, vector<1x256xf32>
    %193 = vector.broadcast %192 : vector<1x256xf32> to vector<8x256xf32>
    %194 = arith.mulf %191, %193 : vector<8x256xf32>
    %195 = vector.broadcast %190 : vector<8x1xf32> to vector<8x256xf32>
    %196 = arith.mulf %195, %194 : vector<8x256xf32>
    %197 = arith.addf %189, %196 : vector<8x256xf32>
    %198 = vector.extract_strided_slice %59 {offsets = [0, 16], sizes = [8, 1], strides = [1, 1]} : vector<8x36xf32> to vector<8x1xf32>
    %c224_i32 = arith.constant 224 : i32
    %199 = tpu.dynamic_rotate %144 by %c224_i32 dim 1 : vector<8x256xf32>, i32 -> vector<8x256xf32>
    %c16 = arith.constant 16 : index
    %c0_45 = arith.constant 0 : index
    %200 = vector.load %arg2[%c16, %c0_45] : memref<36x256xf32, #tpu.memory_space<vmem>>, vector<1x256xf32>
    %201 = vector.broadcast %200 : vector<1x256xf32> to vector<8x256xf32>
    %202 = arith.mulf %199, %201 : vector<8x256xf32>
    %203 = vector.broadcast %198 : vector<8x1xf32> to vector<8x256xf32>
    %204 = arith.mulf %203, %202 : vector<8x256xf32>
    %205 = arith.addf %197, %204 : vector<8x256xf32>
    %206 = vector.extract_strided_slice %59 {offsets = [0, 17], sizes = [8, 1], strides = [1, 1]} : vector<8x36xf32> to vector<8x1xf32>
    %c222_i32 = arith.constant 222 : i32
    %207 = tpu.dynamic_rotate %144 by %c222_i32 dim 1 : vector<8x256xf32>, i32 -> vector<8x256xf32>
    %c17 = arith.constant 17 : index
    %c0_46 = arith.constant 0 : index
    %208 = vector.load %arg2[%c17, %c0_46] : memref<36x256xf32, #tpu.memory_space<vmem>>, vector<1x256xf32>
    %209 = vector.broadcast %208 : vector<1x256xf32> to vector<8x256xf32>
    %210 = arith.mulf %207, %209 : vector<8x256xf32>
    %211 = vector.broadcast %206 : vector<8x1xf32> to vector<8x256xf32>
    %212 = arith.mulf %211, %210 : vector<8x256xf32>
    %213 = arith.addf %205, %212 : vector<8x256xf32>
    %214 = vector.extract_strided_slice %60 {offsets = [0, 1], sizes = [8, 1], strides = [1, 1]} : vector<8x4xf32> to vector<8x1xf32>
    %215 = vector.broadcast %214 : vector<8x1xf32> to vector<8x256xf32>
    %216 = arith.addf %213, %215 : vector<8x256xf32>
    %217 = vector.extract_strided_slice %57 {offsets = [0, 2], sizes = [8, 1], strides = [1, 1]} : vector<8x4xf32> to vector<8x1xf32>
    %218 = vector.broadcast %217 : vector<8x1xf32> to vector<8x256xf32>
    %219 = arith.mulf %218, %56 : vector<8x256xf32>
    %220 = vector.extract_strided_slice %58 {offsets = [0, 2], sizes = [8, 1], strides = [1, 1]} : vector<8x4xf32> to vector<8x1xf32>
    %221 = vector.broadcast %220 : vector<8x1xf32> to vector<8x256xf32>
    %222 = arith.addf %219, %221 : vector<8x256xf32>
    %cst_47 = arith.constant 0.000000e+00 : f32
    %223 = vector.broadcast %cst_47 : f32 to vector<8x256xf32>
    %224 = vector.extract_strided_slice %59 {offsets = [0, 18], sizes = [8, 1], strides = [1, 1]} : vector<8x36xf32> to vector<8x1xf32>
    %c85_i32 = arith.constant 85 : i32
    %225 = tpu.dynamic_rotate %222 by %c85_i32 dim 1 : vector<8x256xf32>, i32 -> vector<8x256xf32>
    %c18 = arith.constant 18 : index
    %c0_48 = arith.constant 0 : index
    %226 = vector.load %arg2[%c18, %c0_48] : memref<36x256xf32, #tpu.memory_space<vmem>>, vector<1x256xf32>
    %227 = vector.broadcast %226 : vector<1x256xf32> to vector<8x256xf32>
    %228 = arith.mulf %225, %227 : vector<8x256xf32>
    %229 = vector.broadcast %224 : vector<8x1xf32> to vector<8x256xf32>
    %230 = arith.mulf %229, %228 : vector<8x256xf32>
    %231 = arith.addf %223, %230 : vector<8x256xf32>
    %232 = vector.extract_strided_slice %59 {offsets = [0, 19], sizes = [8, 1], strides = [1, 1]} : vector<8x36xf32> to vector<8x1xf32>
    %c80_i32 = arith.constant 80 : i32
    %233 = tpu.dynamic_rotate %222 by %c80_i32 dim 1 : vector<8x256xf32>, i32 -> vector<8x256xf32>
    %c19 = arith.constant 19 : index
    %c0_49 = arith.constant 0 : index
    %234 = vector.load %arg2[%c19, %c0_49] : memref<36x256xf32, #tpu.memory_space<vmem>>, vector<1x256xf32>
    %235 = vector.broadcast %234 : vector<1x256xf32> to vector<8x256xf32>
    %236 = arith.mulf %233, %235 : vector<8x256xf32>
    %237 = vector.broadcast %232 : vector<8x1xf32> to vector<8x256xf32>
    %238 = arith.mulf %237, %236 : vector<8x256xf32>
    %239 = arith.addf %231, %238 : vector<8x256xf32>
    %240 = vector.extract_strided_slice %59 {offsets = [0, 20], sizes = [8, 1], strides = [1, 1]} : vector<8x36xf32> to vector<8x1xf32>
    %c75_i32 = arith.constant 75 : i32
    %241 = tpu.dynamic_rotate %222 by %c75_i32 dim 1 : vector<8x256xf32>, i32 -> vector<8x256xf32>
    %c20 = arith.constant 20 : index
    %c0_50 = arith.constant 0 : index
    %242 = vector.load %arg2[%c20, %c0_50] : memref<36x256xf32, #tpu.memory_space<vmem>>, vector<1x256xf32>
    %243 = vector.broadcast %242 : vector<1x256xf32> to vector<8x256xf32>
    %244 = arith.mulf %241, %243 : vector<8x256xf32>
    %245 = vector.broadcast %240 : vector<8x1xf32> to vector<8x256xf32>
    %246 = arith.mulf %245, %244 : vector<8x256xf32>
    %247 = arith.addf %239, %246 : vector<8x256xf32>
    %248 = vector.extract_strided_slice %59 {offsets = [0, 21], sizes = [8, 1], strides = [1, 1]} : vector<8x36xf32> to vector<8x1xf32>
    %c5_i32 = arith.constant 5 : i32
    %249 = tpu.dynamic_rotate %222 by %c5_i32 dim 1 : vector<8x256xf32>, i32 -> vector<8x256xf32>
    %c21 = arith.constant 21 : index
    %c0_51 = arith.constant 0 : index
    %250 = vector.load %arg2[%c21, %c0_51] : memref<36x256xf32, #tpu.memory_space<vmem>>, vector<1x256xf32>
    %251 = vector.broadcast %250 : vector<1x256xf32> to vector<8x256xf32>
    %252 = arith.mulf %249, %251 : vector<8x256xf32>
    %253 = vector.broadcast %248 : vector<8x1xf32> to vector<8x256xf32>
    %254 = arith.mulf %253, %252 : vector<8x256xf32>
    %255 = arith.addf %247, %254 : vector<8x256xf32>
    %256 = vector.extract_strided_slice %59 {offsets = [0, 22], sizes = [8, 1], strides = [1, 1]} : vector<8x36xf32> to vector<8x1xf32>
    %257 = vector.broadcast %256 : vector<8x1xf32> to vector<8x256xf32>
    %258 = arith.mulf %257, %222 : vector<8x256xf32>
    %259 = arith.addf %255, %258 : vector<8x256xf32>
    %260 = vector.extract_strided_slice %59 {offsets = [0, 23], sizes = [8, 1], strides = [1, 1]} : vector<8x36xf32> to vector<8x1xf32>
    %c251_i32 = arith.constant 251 : i32
    %261 = tpu.dynamic_rotate %222 by %c251_i32 dim 1 : vector<8x256xf32>, i32 -> vector<8x256xf32>
    %c23 = arith.constant 23 : index
    %c0_52 = arith.constant 0 : index
    %262 = vector.load %arg2[%c23, %c0_52] : memref<36x256xf32, #tpu.memory_space<vmem>>, vector<1x256xf32>
    %263 = vector.broadcast %262 : vector<1x256xf32> to vector<8x256xf32>
    %264 = arith.mulf %261, %263 : vector<8x256xf32>
    %265 = vector.broadcast %260 : vector<8x1xf32> to vector<8x256xf32>
    %266 = arith.mulf %265, %264 : vector<8x256xf32>
    %267 = arith.addf %259, %266 : vector<8x256xf32>
    %268 = vector.extract_strided_slice %59 {offsets = [0, 24], sizes = [8, 1], strides = [1, 1]} : vector<8x36xf32> to vector<8x1xf32>
    %c181_i32 = arith.constant 181 : i32
    %269 = tpu.dynamic_rotate %222 by %c181_i32 dim 1 : vector<8x256xf32>, i32 -> vector<8x256xf32>
    %c24 = arith.constant 24 : index
    %c0_53 = arith.constant 0 : index
    %270 = vector.load %arg2[%c24, %c0_53] : memref<36x256xf32, #tpu.memory_space<vmem>>, vector<1x256xf32>
    %271 = vector.broadcast %270 : vector<1x256xf32> to vector<8x256xf32>
    %272 = arith.mulf %269, %271 : vector<8x256xf32>
    %273 = vector.broadcast %268 : vector<8x1xf32> to vector<8x256xf32>
    %274 = arith.mulf %273, %272 : vector<8x256xf32>
    %275 = arith.addf %267, %274 : vector<8x256xf32>
    %276 = vector.extract_strided_slice %59 {offsets = [0, 25], sizes = [8, 1], strides = [1, 1]} : vector<8x36xf32> to vector<8x1xf32>
    %c176_i32 = arith.constant 176 : i32
    %277 = tpu.dynamic_rotate %222 by %c176_i32 dim 1 : vector<8x256xf32>, i32 -> vector<8x256xf32>
    %c25 = arith.constant 25 : index
    %c0_54 = arith.constant 0 : index
    %278 = vector.load %arg2[%c25, %c0_54] : memref<36x256xf32, #tpu.memory_space<vmem>>, vector<1x256xf32>
    %279 = vector.broadcast %278 : vector<1x256xf32> to vector<8x256xf32>
    %280 = arith.mulf %277, %279 : vector<8x256xf32>
    %281 = vector.broadcast %276 : vector<8x1xf32> to vector<8x256xf32>
    %282 = arith.mulf %281, %280 : vector<8x256xf32>
    %283 = arith.addf %275, %282 : vector<8x256xf32>
    %284 = vector.extract_strided_slice %59 {offsets = [0, 26], sizes = [8, 1], strides = [1, 1]} : vector<8x36xf32> to vector<8x1xf32>
    %c171_i32 = arith.constant 171 : i32
    %285 = tpu.dynamic_rotate %222 by %c171_i32 dim 1 : vector<8x256xf32>, i32 -> vector<8x256xf32>
    %c26 = arith.constant 26 : index
    %c0_55 = arith.constant 0 : index
    %286 = vector.load %arg2[%c26, %c0_55] : memref<36x256xf32, #tpu.memory_space<vmem>>, vector<1x256xf32>
    %287 = vector.broadcast %286 : vector<1x256xf32> to vector<8x256xf32>
    %288 = arith.mulf %285, %287 : vector<8x256xf32>
    %289 = vector.broadcast %284 : vector<8x1xf32> to vector<8x256xf32>
    %290 = arith.mulf %289, %288 : vector<8x256xf32>
    %291 = arith.addf %283, %290 : vector<8x256xf32>
    %292 = vector.extract_strided_slice %60 {offsets = [0, 2], sizes = [8, 1], strides = [1, 1]} : vector<8x4xf32> to vector<8x1xf32>
    %293 = vector.broadcast %292 : vector<8x1xf32> to vector<8x256xf32>
    %294 = arith.addf %291, %293 : vector<8x256xf32>
    %295 = vector.extract_strided_slice %57 {offsets = [0, 3], sizes = [8, 1], strides = [1, 1]} : vector<8x4xf32> to vector<8x1xf32>
    %296 = vector.broadcast %295 : vector<8x1xf32> to vector<8x256xf32>
    %297 = arith.mulf %296, %56 : vector<8x256xf32>
    %298 = vector.extract_strided_slice %58 {offsets = [0, 3], sizes = [8, 1], strides = [1, 1]} : vector<8x4xf32> to vector<8x1xf32>
    %299 = vector.broadcast %298 : vector<8x1xf32> to vector<8x256xf32>
    %300 = arith.addf %297, %299 : vector<8x256xf32>
    %cst_56 = arith.constant 0.000000e+00 : f32
    %301 = vector.broadcast %cst_56 : f32 to vector<8x256xf32>
    %302 = vector.extract_strided_slice %59 {offsets = [0, 27], sizes = [8, 1], strides = [1, 1]} : vector<8x36xf32> to vector<8x1xf32>
    %c119_i32 = arith.constant 119 : i32
    %303 = tpu.dynamic_rotate %300 by %c119_i32 dim 1 : vector<8x256xf32>, i32 -> vector<8x256xf32>
    %c27 = arith.constant 27 : index
    %c0_57 = arith.constant 0 : index
    %304 = vector.load %arg2[%c27, %c0_57] : memref<36x256xf32, #tpu.memory_space<vmem>>, vector<1x256xf32>
    %305 = vector.broadcast %304 : vector<1x256xf32> to vector<8x256xf32>
    %306 = arith.mulf %303, %305 : vector<8x256xf32>
    %307 = vector.broadcast %302 : vector<8x1xf32> to vector<8x256xf32>
    %308 = arith.mulf %307, %306 : vector<8x256xf32>
    %309 = arith.addf %301, %308 : vector<8x256xf32>
    %310 = vector.extract_strided_slice %59 {offsets = [0, 28], sizes = [8, 1], strides = [1, 1]} : vector<8x36xf32> to vector<8x1xf32>
    %c112_i32 = arith.constant 112 : i32
    %311 = tpu.dynamic_rotate %300 by %c112_i32 dim 1 : vector<8x256xf32>, i32 -> vector<8x256xf32>
    %c28 = arith.constant 28 : index
    %c0_58 = arith.constant 0 : index
    %312 = vector.load %arg2[%c28, %c0_58] : memref<36x256xf32, #tpu.memory_space<vmem>>, vector<1x256xf32>
    %313 = vector.broadcast %312 : vector<1x256xf32> to vector<8x256xf32>
    %314 = arith.mulf %311, %313 : vector<8x256xf32>
    %315 = vector.broadcast %310 : vector<8x1xf32> to vector<8x256xf32>
    %316 = arith.mulf %315, %314 : vector<8x256xf32>
    %317 = arith.addf %309, %316 : vector<8x256xf32>
    %318 = vector.extract_strided_slice %59 {offsets = [0, 29], sizes = [8, 1], strides = [1, 1]} : vector<8x36xf32> to vector<8x1xf32>
    %c105_i32 = arith.constant 105 : i32
    %319 = tpu.dynamic_rotate %300 by %c105_i32 dim 1 : vector<8x256xf32>, i32 -> vector<8x256xf32>
    %c29 = arith.constant 29 : index
    %c0_59 = arith.constant 0 : index
    %320 = vector.load %arg2[%c29, %c0_59] : memref<36x256xf32, #tpu.memory_space<vmem>>, vector<1x256xf32>
    %321 = vector.broadcast %320 : vector<1x256xf32> to vector<8x256xf32>
    %322 = arith.mulf %319, %321 : vector<8x256xf32>
    %323 = vector.broadcast %318 : vector<8x1xf32> to vector<8x256xf32>
    %324 = arith.mulf %323, %322 : vector<8x256xf32>
    %325 = arith.addf %317, %324 : vector<8x256xf32>
    %326 = vector.extract_strided_slice %59 {offsets = [0, 30], sizes = [8, 1], strides = [1, 1]} : vector<8x36xf32> to vector<8x1xf32>
    %c7_i32 = arith.constant 7 : i32
    %327 = tpu.dynamic_rotate %300 by %c7_i32 dim 1 : vector<8x256xf32>, i32 -> vector<8x256xf32>
    %c30 = arith.constant 30 : index
    %c0_60 = arith.constant 0 : index
    %328 = vector.load %arg2[%c30, %c0_60] : memref<36x256xf32, #tpu.memory_space<vmem>>, vector<1x256xf32>
    %329 = vector.broadcast %328 : vector<1x256xf32> to vector<8x256xf32>
    %330 = arith.mulf %327, %329 : vector<8x256xf32>
    %331 = vector.broadcast %326 : vector<8x1xf32> to vector<8x256xf32>
    %332 = arith.mulf %331, %330 : vector<8x256xf32>
    %333 = arith.addf %325, %332 : vector<8x256xf32>
    %334 = vector.extract_strided_slice %59 {offsets = [0, 31], sizes = [8, 1], strides = [1, 1]} : vector<8x36xf32> to vector<8x1xf32>
    %335 = vector.broadcast %334 : vector<8x1xf32> to vector<8x256xf32>
    %336 = arith.mulf %335, %300 : vector<8x256xf32>
    %337 = arith.addf %333, %336 : vector<8x256xf32>
    %338 = vector.extract_strided_slice %59 {offsets = [0, 32], sizes = [8, 1], strides = [1, 1]} : vector<8x36xf32> to vector<8x1xf32>
    %c249_i32 = arith.constant 249 : i32
    %339 = tpu.dynamic_rotate %300 by %c249_i32 dim 1 : vector<8x256xf32>, i32 -> vector<8x256xf32>
    %c32 = arith.constant 32 : index
    %c0_61 = arith.constant 0 : index
    %340 = vector.load %arg2[%c32, %c0_61] : memref<36x256xf32, #tpu.memory_space<vmem>>, vector<1x256xf32>
    %341 = vector.broadcast %340 : vector<1x256xf32> to vector<8x256xf32>
    %342 = arith.mulf %339, %341 : vector<8x256xf32>
    %343 = vector.broadcast %338 : vector<8x1xf32> to vector<8x256xf32>
    %344 = arith.mulf %343, %342 : vector<8x256xf32>
    %345 = arith.addf %337, %344 : vector<8x256xf32>
    %346 = vector.extract_strided_slice %59 {offsets = [0, 33], sizes = [8, 1], strides = [1, 1]} : vector<8x36xf32> to vector<8x1xf32>
    %c151_i32 = arith.constant 151 : i32
    %347 = tpu.dynamic_rotate %300 by %c151_i32 dim 1 : vector<8x256xf32>, i32 -> vector<8x256xf32>
    %c33 = arith.constant 33 : index
    %c0_62 = arith.constant 0 : index
    %348 = vector.load %arg2[%c33, %c0_62] : memref<36x256xf32, #tpu.memory_space<vmem>>, vector<1x256xf32>
    %349 = vector.broadcast %348 : vector<1x256xf32> to vector<8x256xf32>
    %350 = arith.mulf %347, %349 : vector<8x256xf32>
    %351 = vector.broadcast %346 : vector<8x1xf32> to vector<8x256xf32>
    %352 = arith.mulf %351, %350 : vector<8x256xf32>
    %353 = arith.addf %345, %352 : vector<8x256xf32>
    %354 = vector.extract_strided_slice %59 {offsets = [0, 34], sizes = [8, 1], strides = [1, 1]} : vector<8x36xf32> to vector<8x1xf32>
    %c144_i32 = arith.constant 144 : i32
    %355 = tpu.dynamic_rotate %300 by %c144_i32 dim 1 : vector<8x256xf32>, i32 -> vector<8x256xf32>
    %c34 = arith.constant 34 : index
    %c0_63 = arith.constant 0 : index
    %356 = vector.load %arg2[%c34, %c0_63] : memref<36x256xf32, #tpu.memory_space<vmem>>, vector<1x256xf32>
    %357 = vector.broadcast %356 : vector<1x256xf32> to vector<8x256xf32>
    %358 = arith.mulf %355, %357 : vector<8x256xf32>
    %359 = vector.broadcast %354 : vector<8x1xf32> to vector<8x256xf32>
    %360 = arith.mulf %359, %358 : vector<8x256xf32>
    %361 = arith.addf %353, %360 : vector<8x256xf32>
    %362 = vector.extract_strided_slice %59 {offsets = [0, 35], sizes = [8, 1], strides = [1, 1]} : vector<8x36xf32> to vector<8x1xf32>
    %c137_i32 = arith.constant 137 : i32
    %363 = tpu.dynamic_rotate %300 by %c137_i32 dim 1 : vector<8x256xf32>, i32 -> vector<8x256xf32>
    %c35 = arith.constant 35 : index
    %c0_64 = arith.constant 0 : index
    %364 = vector.load %arg2[%c35, %c0_64] : memref<36x256xf32, #tpu.memory_space<vmem>>, vector<1x256xf32>
    %365 = vector.broadcast %364 : vector<1x256xf32> to vector<8x256xf32>
    %366 = arith.mulf %363, %365 : vector<8x256xf32>
    %367 = vector.broadcast %362 : vector<8x1xf32> to vector<8x256xf32>
    %368 = arith.mulf %367, %366 : vector<8x256xf32>
    %369 = arith.addf %361, %368 : vector<8x256xf32>
    %370 = vector.extract_strided_slice %60 {offsets = [0, 3], sizes = [8, 1], strides = [1, 1]} : vector<8x4xf32> to vector<8x1xf32>
    %371 = vector.broadcast %370 : vector<8x1xf32> to vector<8x256xf32>
    %372 = arith.addf %369, %371 : vector<8x256xf32>
    %373 = tpu.concatenate %138, %216, %294, %372 in 0 : vector<8x256xf32>, vector<8x256xf32>, vector<8x256xf32>, vector<8x256xf32> -> vector<32x256xf32>
    %cst_65 = arith.constant dense<0.000000e+00> : vector<256xf32>
    %374 = vector.multi_reduction <add>, %373, %cst_65 [0] : vector<32x256xf32> to vector<256xf32>
    %375 = vector.shape_cast %374 : vector<256xf32> to vector<1x256xf32>
    %cst_66 = arith.constant 3.200000e+01 : f32
    %376 = vector.broadcast %cst_66 : f32 to vector<1x256xf32>
    %377 = arith.divf %375, %376 : vector<1x256xf32>
    %378 = vector.broadcast %377 : vector<1x256xf32> to vector<32x256xf32>
    %379 = arith.subf %373, %378 : vector<32x256xf32>
    %380 = arith.mulf %379, %379 : vector<32x256xf32>
    %cst_67 = arith.constant dense<0.000000e+00> : vector<256xf32>
    %381 = vector.multi_reduction <add>, %380, %cst_67 [0] : vector<32x256xf32> to vector<256xf32>
    %382 = vector.shape_cast %381 : vector<256xf32> to vector<1x256xf32>
    %cst_68 = arith.constant 3.200000e+01 : f32
    %383 = vector.broadcast %cst_68 : f32 to vector<1x256xf32>
    %384 = arith.divf %382, %383 : vector<1x256xf32>
    %385 = vector.broadcast %377 : vector<1x256xf32> to vector<32x256xf32>
    %386 = arith.subf %373, %385 : vector<32x256xf32>
    %cst_69 = arith.constant 9.99999997E-7 : f32
    %387 = vector.broadcast %cst_69 : f32 to vector<1x256xf32>
    %388 = arith.addf %384, %387 : vector<1x256xf32>
    %389 = math.rsqrt %388 : vector<1x256xf32>
    %390 = vector.broadcast %389 : vector<1x256xf32> to vector<32x256xf32>
    %391 = arith.mulf %386, %390 : vector<32x256xf32>
    %c0_70 = arith.constant 0 : index
    %c0_71 = arith.constant 0 : index
    %392 = vector.load %arg9[%c0_70, %c0_71] : memref<32x1xf32, #tpu.memory_space<vmem>>, vector<32x1xf32>
    %393 = vector.broadcast %392 : vector<32x1xf32> to vector<32x256xf32>
    %394 = arith.mulf %393, %391 : vector<32x256xf32>
    %c0_72 = arith.constant 0 : index
    %c0_73 = arith.constant 0 : index
    %395 = vector.load %arg10[%c0_72, %c0_73] : memref<32x1xf32, #tpu.memory_space<vmem>>, vector<32x1xf32>
    %396 = vector.broadcast %395 : vector<32x1xf32> to vector<32x256xf32>
    %397 = arith.addf %394, %396 : vector<32x256xf32>
    %c0_74 = arith.constant 0 : index
    %c0_75 = arith.constant 0 : index
    %398 = vector.load %arg11[%c0_74, %c0_75] : memref<32x32xf32, #tpu.memory_space<vmem>>, vector<32x32xf32>
    %cst_76 = arith.constant dense<0.000000e+00> : vector<32x256xf32>
    %399 = tpu.matmul %398, %397, %cst_76 {dimension_numbers = #tpu.dot_dimension_numbers<[1], [0], [0], [1], [0, 0, 1, 1], [], []>} : vector<32x32xf32>, vector<32x256xf32>, vector<32x256xf32> -> vector<32x256xf32>
    %c0_77 = arith.constant 0 : index
    %c0_78 = arith.constant 0 : index
    %400 = vector.load %arg12[%c0_77, %c0_78] : memref<32x1xf32, #tpu.memory_space<vmem>>, vector<32x1xf32>
    %401 = vector.broadcast %400 : vector<32x1xf32> to vector<32x256xf32>
    %402 = arith.addf %399, %401 : vector<32x256xf32>
    %cst_79 = arith.constant 5.000000e-01 : f32
    %403 = vector.broadcast %cst_79 : f32 to vector<32x256xf32>
    %404 = arith.mulf %403, %402 : vector<32x256xf32>
    %cst_80 = arith.constant 4.471500e-02 : f32
    %405 = vector.broadcast %cst_80 : f32 to vector<32x256xf32>
    %406 = arith.mulf %405, %402 : vector<32x256xf32>
    %407 = arith.mulf %406, %402 : vector<32x256xf32>
    %408 = arith.mulf %407, %402 : vector<32x256xf32>
    %409 = arith.addf %402, %408 : vector<32x256xf32>
    %cst_81 = arith.constant 0.797884583 : f32
    %410 = vector.broadcast %cst_81 : f32 to vector<32x256xf32>
    %411 = arith.mulf %410, %409 : vector<32x256xf32>
    %412 = math.tanh %411 : vector<32x256xf32>
    %cst_82 = arith.constant 1.000000e+00 : f32
    %413 = vector.broadcast %cst_82 : f32 to vector<32x256xf32>
    %414 = arith.addf %413, %412 : vector<32x256xf32>
    %415 = arith.mulf %404, %414 : vector<32x256xf32>
    %c0_83 = arith.constant 0 : index
    %c0_84 = arith.constant 0 : index
    %416 = vector.load %arg13[%c0_83, %c0_84] : memref<32x32xf32, #tpu.memory_space<vmem>>, vector<32x32xf32>
    %cst_85 = arith.constant dense<0.000000e+00> : vector<32x256xf32>
    %417 = tpu.matmul %416, %37, %cst_85 {dimension_numbers = #tpu.dot_dimension_numbers<[1], [0], [0], [1], [0, 0, 1, 1], [], []>} : vector<32x32xf32>, vector<32x256xf32>, vector<32x256xf32> -> vector<32x256xf32>
    %c0_86 = arith.constant 0 : index
    %c0_87 = arith.constant 0 : index
    %418 = vector.load %arg14[%c0_86, %c0_87] : memref<32x1xf32, #tpu.memory_space<vmem>>, vector<32x1xf32>
    %419 = vector.broadcast %418 : vector<32x1xf32> to vector<32x256xf32>
    %420 = arith.addf %417, %419 : vector<32x256xf32>
    %421 = arith.addf %415, %420 : vector<32x256xf32>
    %c0_88 = arith.constant 0 : index
    %c0_89 = arith.constant 0 : index
    %c0_90 = arith.constant 0 : index
    %422 = vector.load %arg15[%c0_88, %c0_89, %c0_90] : memref<1x32x256xf32, #tpu.memory_space<vmem>>, vector<1x32x256xf32>
    %423 = vector.shape_cast %422 : vector<1x32x256xf32> to vector<32x256xf32>
    %424 = vector.shape_cast %421 : vector<32x256xf32> to vector<1x32x256xf32>
    tpu.vector_store %arg15[%c0_88, %c0_89, %c0_90], %424 {strides = array<i32>} : memref<1x32x256xf32, #tpu.memory_space<vmem>>, vector<1x32x256xf32>,
    return
  }
  func.func @transform_0(%arg0: i32) -> (i32, i32, i32) {
    %c0_i32 = arith.constant 0 : i32
    %c0_i32_0 = arith.constant 0 : i32
    %c0_i32_1 = arith.constant 0 : i32
    return %arg0, %c0_i32, %c0_i32_0 : i32, i32, i32
  }
  func.func @transform_1(%arg0: i32) -> (i32, i32) {
    %c0_i32 = arith.constant 0 : i32
    %c0_i32_0 = arith.constant 0 : i32
    %c0_i32_1 = arith.constant 0 : i32
    return %c0_i32, %c0_i32_0 : i32, i32
  }
  func.func @transform_2(%arg0: i32) -> (i32, i32) {
    %c0_i32 = arith.constant 0 : i32
    %c0_i32_0 = arith.constant 0 : i32
    %c0_i32_1 = arith.constant 0 : i32
    return %c0_i32, %c0_i32_0 : i32, i32
  }
  func.func @transform_3(%arg0: i32) -> (i32, i32) {
    %c0_i32 = arith.constant 0 : i32
    %c0_i32_0 = arith.constant 0 : i32
    %c0_i32_1 = arith.constant 0 : i32
    return %c0_i32, %c0_i32_0 : i32, i32
  }
  func.func @transform_4(%arg0: i32) -> (i32, i32) {
    %c0_i32 = arith.constant 0 : i32
    %c0_i32_0 = arith.constant 0 : i32
    %c0_i32_1 = arith.constant 0 : i32
    return %c0_i32, %c0_i32_0 : i32, i32
  }
  func.func @transform_5(%arg0: i32) -> (i32, i32) {
    %c0_i32 = arith.constant 0 : i32
    %c0_i32_0 = arith.constant 0 : i32
    %c0_i32_1 = arith.constant 0 : i32
    return %c0_i32, %c0_i32_0 : i32, i32
  }
  func.func @transform_6(%arg0: i32) -> (i32, i32) {
    %c0_i32 = arith.constant 0 : i32
    %c0_i32_0 = arith.constant 0 : i32
    %c0_i32_1 = arith.constant 0 : i32
    return %c0_i32, %c0_i32_0 : i32, i32
  }
  func.func @transform_7(%arg0: i32) -> (i32, i32) {
    %c0_i32 = arith.constant 0 : i32
    %c0_i32_0 = arith.constant 0 : i32
    %c0_i32_1 = arith.constant 0 : i32
    return %c0_i32, %c0_i32_0 : i32, i32
  }
  func.func @transform_8(%arg0: i32) -> (i32, i32) {
    %c0_i32 = arith.constant 0 : i32
    %c0_i32_0 = arith.constant 0 : i32
    %c0_i32_1 = arith.constant 0 : i32
    return %c0_i32, %c0_i32_0 : i32, i32
  }
  func.func @transform_9(%arg0: i32) -> (i32, i32) {
    %c0_i32 = arith.constant 0 : i32
    %c0_i32_0 = arith.constant 0 : i32
    %c0_i32_1 = arith.constant 0 : i32
    return %c0_i32, %c0_i32_0 : i32, i32
  }
  func.func @transform_10(%arg0: i32) -> (i32, i32) {
    %c0_i32 = arith.constant 0 : i32
    %c0_i32_0 = arith.constant 0 : i32
    %c0_i32_1 = arith.constant 0 : i32
    return %c0_i32, %c0_i32_0 : i32, i32
  }
  func.func @transform_11(%arg0: i32) -> (i32, i32) {
    %c0_i32 = arith.constant 0 : i32
    %c0_i32_0 = arith.constant 0 : i32
    %c0_i32_1 = arith.constant 0 : i32
    return %c0_i32, %c0_i32_0 : i32, i32
  }
  func.func @transform_12(%arg0: i32) -> (i32, i32) {
    %c0_i32 = arith.constant 0 : i32
    %c0_i32_0 = arith.constant 0 : i32
    %c0_i32_1 = arith.constant 0 : i32
    return %c0_i32, %c0_i32_0 : i32, i32
  }
  func.func @transform_13(%arg0: i32) -> (i32, i32) {
    %c0_i32 = arith.constant 0 : i32
    %c0_i32_0 = arith.constant 0 : i32
    %c0_i32_1 = arith.constant 0 : i32
    return %c0_i32, %c0_i32_0 : i32, i32
  }
  func.func @transform_14(%arg0: i32) -> (i32, i32, i32) {
    %c0_i32 = arith.constant 0 : i32
    %c0_i32_0 = arith.constant 0 : i32
    %c0_i32_1 = arith.constant 0 : i32
    return %arg0, %c0_i32, %c0_i32_0 : i32, i32, i32
  }
}

</mosaic_0001>

<bundles_post_ra>
// kernel: tpu_custom_call.1
= control target key start
LH: loop header
LB: loop body
LE: loop exit
PB: predicated region body
PF: predicated region fallthrough
CT: control target
= control target key end

     0   :  { %s4167_s0 = inlined_call_operand.vmem [shape: f32[2,32,256], index: 0, kind: input, shape index: {}]   ;;  %s4168_s1 = inlined_call_operand.vmem [shape: f32[36,256], index: 1, kind: input, shape index: {}]   ;;  %s4169_s2 = inlined_call_operand.vmem [shape: f32[32,2], index: 2, kind: input, shape index: {}]   ;;  %s4170_s3 = inlined_call_operand.vmem [shape: f32[32,2], index: 3, kind: input, shape index: {}]   ;;  %s4171_s4 = inlined_call_operand.vmem [shape: f32[8,4], index: 4, kind: input, shape index: {}]   ;;  %s4172_s5 = inlined_call_operand.vmem [shape: f32[8,4], index: 5, kind: input, shape index: {}]   ;;  %s4173_s6 = inlined_call_operand.hbm [shape: f32[8,36], index: 6, kind: input, shape index: {}]   ;;  %s4174_s7 = inlined_call_operand.vmem [shape: f32[8,4], index: 7, kind: input, shape index: {}]   ;;  %s4175_s8 = inlined_call_operand.vmem [shape: f32[32,1], index: 8, kind: input, shape index: {}]   ;;  %s4176_s9 = inlined_call_operand.vmem [shape: f32[32,1], index: 9, kind: input, shape index: {}]   ;;  %s4177_s10 = inlined_call_operand.vmem [shape: f32[32,32], index: 10, kind: input, shape index: {}]   ;;  %s4178_s11 = inlined_call_operand.vmem [shape: f32[32,1], index: 11, kind: input, shape index: {}]   ;;  %s4179_s12 = inlined_call_operand.vmem [shape: f32[32,32], index: 12, kind: input, shape index: {}]   ;;  %s4180_s13 = inlined_call_operand.vmem [shape: f32[32,1], index: 13, kind: input, shape index: {}]   ;;  %s4181_s14 = inlined_call_operand.hbm [shape: f32[2,32,256], index: 14, kind: output, shape index: {}]  }
   0x1   :  { %4242 = sst [smem:[#allocation56_spill]] %s4167_s0 }
   0x2   :  { %19 = vsyncpa [#allocation3], 0 }
   0x3   :  { %20 = vsyncpa [#allocation4], 0 }
   0x4   :  { %22 = vsyncpa [#allocation4 + $0x1], 0  ;;  %s2828_s29 = smov 0   ;;  %s2830_s30 = smov 0  }
   0x5   :  { %s2832_s15 = smov 0   ;;  %s2834_s16 = smov 0  }
   0x6 LB: > { %4243 = sst [smem:[#allocation8_spill]] %s2677_s15  ;;  %s2849_s17 = sadd.s32 4294967295, %s2681_s16   ;;  %s2681_s16 = sphi %s2834_s16, %s4370_s16   ;;  %s2677_s15 = sphi %s2832_s15, %s4372_s15   ;;  %s2673_s30 = sphi %s2830_s30, %s4374_s30   ;;  %s2669_s29 = sphi %s2828_s29, %s4373_s29  }
   0x7   : > { %s2307_s18 = sadd.s32 4294967294, %s2681_s16   ;;  %s2853_s19 = sadd.s32 1, %s2681_s16  }
   0x8   : > { %4244 = sst [smem:[#allocation9_spill]] %s2853_s19  ;;  %s334_s20 = sadd.s32 1, %s2677_s15 }
   0x9   : > { %s331_s21 = ssub.s32 %s2681_s16, %s2853_s19  ;;  %p344_p0 = scmp.ne.s32.totalorder %s2677_s15, %s2673_s30 }
   0xa   : > { %p332_p1 = scmp.eq.s32.totalorder %s331_s21, 0  ;;  %p345_p2 = scmp.eq.s32.totalorder %s2849_s17, 1 }
   0xb   : > { %p350_p3 = scmp.ne.s32.totalorder %s2673_s30, %s2669_s29  ;;  %p351_p4 = scmp.eq.s32.totalorder %s2307_s18, 1 }
   0xc   : > { %s2864_s22 = scalar_select %p332_p1, %s2677_s15, %s334_s20  }
   0xd   : > { %p2866_p5 = por %p345_p2, %p344_p0  ;;  %p2870_p6 = por %p351_p4, %p350_p3 }
   0xe   : > { %4245 = sst [smem:[#allocation10_spill]] %s2864_s22  ;;  %p2308_p7 = scmp.ge.s32.totalorder %s2681_s16, 1 }
   0xf   : > { %s4246_s23 = scalar_select %p2866_p5, 1, 0 }
  0x10   : > { %s4247_s24 = scalar_select %p2870_p6, 1, 0 }
  0x11   : > { %p358_p8 = scmp.lt.s32.totalorder %s2681_s16, 3  ;;  %p4186_p9 = scmp.eq.s32.totalorder %s2849_s17, 0 }
  0x12   : > { %4248 = sst [smem:[#allocation11_spill]] %s4247_s24  ;;  %s2683_s26 = smov [#allocation2]  }
  0x13   : > { %p2877_p10 = pnand %p2308_p7, %p358_p8  ;;  %s386_s27 = sshll.u32 %s2683_s26, 4  ;;  %s387_s27 = int_to_ptr.vmem [resolvable:$true] %s386_s27 }
  0x14   : > { %s2587_s21 = scalar_lea.hbm %s4173_s6, 128 }
  0x15   : > { %s4249_s25 = scalar_select %p2877_p10, 1, 0 }
  0x16   : > { %p2388_p11 = pneg %p2877_p10  ;;  %p2588_p13 = scmp.ne.s32.totalorder %s4173_s6, %s2587_s21 }
  0x17   : > { %p2594_p3 = scmp.lt.u32.totalorder %s2587_s21, %s4173_s6 }
  0x18   : > { %p2885_p12 = pnand %p4186_p9, %p2388_p11 }
  0x1a   : > { %p2589_p0 = pneg %p2885_p12 }
  0x1c   : > { %p2590_p1 = pnand %p2589_p0, %p2588_p13 }
  0x1e   : > { %p2591_p2 = pneg %p2590_p1 }
  0x20   : > { %p2596_p4 = pnand %p2594_p3, %p2591_p2 }
  0x22   : > { %2599 = shalt.err (!%p2596_p4)
}
  0x23   : > { %s2600_s24 = scalar_lea.vmem %s387_s27, 128  ;;  %p2608_p9 = scmp.lt.s32.totalorder %s387_s27, %s387_s27 }
  0x24   : > { %p2601_p7 = scmp.ne.s32.totalorder %s387_s27, %s2600_s24  ;;  %p2609_p6 = scmp.lt.s32.totalorder %s2600_s24, %s2600_s24 }
  0x26   : > { %p2603_p8 = pnand %p2601_p7, %p2589_p0  ;;  %p2610_p5 = por %p2609_p6, %p2608_p9 }
  0x28   : > { %p2604_p11 = pneg %p2603_p8 }
  0x2a   : > { %p2611_p10 = pnand %p2610_p5, %p2604_p11 }
  0x2c   : > { %2614 = shalt.err (!%p2611_p10)
}
  0x2d   : > { %2391 = dma.hbm_to_vmem [thread:$0]  (!%p2885_p12), %s4173_s6, 128, %s387_s27, [#allocation3]  }
  0x2e   : > { %p4251_p13 = scmp.ne.s32.totalorder %s4249_s25, 0 }
  0x30   : > { %428 = sbr.rel (%p4251_p13) target bundleno = 1145 (0x479), region = 76 }
  0x37   : > { %p4252_p1 = scmp.eq.s32.totalorder %s2849_s17, 0 }
  0x39   : > { %2660 = dma.done.wait (%p4252_p1), [#allocation3], 128   ;;  %p4253_p0 = pmov %p4252_p1 }
  0x3a   : > { %p474_p6 = scmp.lt.s32.totalorder %s2849_s17, 1  ;;  %v2684_v0 = vmov 1   ;;  %v2685_v1 = vmov 19   ;;  %s4254_s0 = sld [smem:[#allocation56_spill]]  ;;  %v2946_v18 = vld [vmem:[%s4171_s4] sm:$0xff]  ;;  %v2686_v21 = vmov 0  }
  0x3b   : > { %2662 = vsyncadd (%p4253_p0), [#allocation3], 4294967168  ;;  %2500 = vset.pattern.permute.xlu1 %v2684_v0  ;;  %2510 = vset.pattern.permute.xlu0 %v2685_v1  ;;  %v669_v19 = vld [vmem:[%s4172_s5] sm:$0xff]  ;;  %v2687_v22 = vmov 12   ;;  %v2688_v23 = vmov 2   ;;  %v2689_v24 = vmov 28  }
  0x3c   : > { %s475_s19 = scalar_select %p474_p6, %s2849_s17, 1  ;;  %v2952_v20 = vld [vmem:[#allocation2] sm:$0xff]  ;;  %v2690_v25 = vmov 4   ;;  %v2691_v26 = vmov 3   ;;  %v2692_v27 = vmov 13   ;;  %v2693_v28 = vmov 21  }
  0x3d   : > { %v2694_v29 = vmov 14   ;;  %v2695_v30 = vmov 9   ;;  %v2696_v31 = vmov 22   ;;  %v2697_v32 = vmov 10   ;;  %v2995_v52 = vld [vmem:[%s4174_s7] sm:$0xff]  ;;  %v517_v63 = vld [vmem:[%s4169_s2 + $0x8] sm:$0xff] }
  0x3e   : > { %s2364_s24 = sshll.u32 %s475_s19, 6  ;;  %v2698_v33 = vmov 30   ;;  %v2699_v34 = vmov 11   ;;  %v2700_v35 = vmov 23   ;;  %v2701_v36 = vmov 18   ;;  %v516_v59 = vld [vmem:[%s4169_s2] sm:$0xff] }
  0x3f   : > { %v2702_v37 = vmov 31   ;;  %v2703_v38 = vmov 20   ;;  %v2704_v39 = vmov 7   ;;  %v2705_v40 = vmov 27   ;;  %s4200_s21 = smov 16   ;;  %s2721_s26 = smov 17  }
  0x40   : > { %s2917_s25 = scalar_lea.vmem %s4254_s0, %s2364_s24  ;;  %v2706_v41 = vmov 16   ;;  %v2707_v42 = vmov 29   ;;  %v2708_v43 = vmov 8   ;;  %v2709_v44 = vmov 5   ;;  %s2722_s15 = smov 32  }
  0x41   : > { %v483_v2 = vld [vmem:[%s2917_s25 + $0x20] sm:$0xff]  ;;  %v484_v3 = vld [vmem:[%s2917_s25 + $0x28] sm:$0xff]  ;;  %v2928_v7 = vld [vmem:[%s2917_s25 + $0x10] sm:$0xff]  ;;  %v2710_v45 = vmov 17   ;;  %v2711_v46 = vmov 6   ;;  %v2712_v47 = vmov 25  }
  0x42   : > { %v2922_v4 = vld [vmem:[%s2917_s25] sm:$0xff]  ;;  %v493_v5 = vadd.f32 %v484_v3, %v483_v2  ;;  %v2925_v6 = vld [vmem:[%s2917_s25 + $0x8] sm:$0xff]  ;;  %v2931_v8 = vld [vmem:[%s2917_s25 + $0x18] sm:$0xff]  ;;  %v510_v17 = vmax.f32 %v483_v2, %v484_v3  ;;  %v2713_v48 = vmov 15   ;;  %v2714_v49 = vmov 34   ;;  %s2723_s22 = smov 80  }
  0x43   : > { %v487_v9 = vadd.f32 %v2925_v6, %v2922_v4  ;;  %v504_v10 = vmax.f32 %v2922_v4, %v2925_v6  ;;  %v490_v11 = vadd.f32 %v2931_v8, %v2928_v7  ;;  %v485_v12 = vld [vmem:[%s2917_s25 + $0x30] sm:$0xff]  ;;  %v486_v13 = vld [vmem:[%s2917_s25 + $0x38] sm:$0xff]  ;;  %v507_v15 = vmax.f32 %v2928_v7, %v2931_v8  ;;  %s2724_s19 = smov 1   ;;  %s2725_s24 = smov 34  }
  0x44   : > { %494 = vadd.xlane.f32.xlu1 %v493_v5  ;;  %v496_v14 = vadd.f32 %v486_v13, %v485_v12  ;;  %v513_v16 = vmax.f32 %v485_v12, %v486_v13  ;;  %v2715_v50 = vmov 24   ;;  %v2716_v51 = vmov 32   ;;  %s2726_s27 = smov 2   ;;  %s2727_s28 = smov 112  }
  0x45   : > { %488 = vadd.xlane.f32.xlu0 %v487_v9  ;;  %v2717_v53 = vmov 33   ;;  %v2718_v54 = vmov 35   ;;  %v2719_v55 = vmov 26   ;;  %vm528_vm0 = vcmask 15360   ;;  %s2728_s18 = smov 5   ;;  %s2729_s20 = smov 15  }
  0x46   : > { %p4367_p9 = scmp.ne.s32.totalorder %s4246_s23, 0 }
  0x48   : > { %505 = vmax.xlane.f32.xlu1 %v504_v10  ;;  %v519_v10 = vld [vmem:[%s4169_s2 + $0x18] sm:$0xff] }
  0x49   : > { %491 = vadd.xlane.f32.xlu0 %v490_v11 }
  0x4c   : > { %497 = vadd.xlane.f32.xlu1 %v496_v14 }
  0x4d   : > { %508 = vmax.xlane.f32.xlu0 %v507_v15 }
  0x50   : > { %514 = vmax.xlane.f32.xlu1 %v513_v16 }
  0x51   : > { %511 = vmax.xlane.f32.xlu0 %v510_v17 }
  0x61   : > { %944 = vperm.xlu1 %2500, %v2946_v18  }
  0x65   : > { %2501 = vset.pattern.permute.xlu1 %v2686_v21 }
  0x66   : > { %681 = vperm.xlu1 %2501, %v669_v19  }
  0x67   : > { %1274 = vperm.xlu0 %2510, %v2952_v20  }
  0x6a   : > { %2502 = vset.pattern.permute.xlu1 %v2684_v0 }
  0x6b   : > { %950 = vperm.xlu1 %2502, %v669_v19   ;;  %2511 = vset.pattern.permute.xlu0 %v2687_v22 }
  0x6c   : > { %1068 = vperm.xlu0 %2511, %v2952_v20  }
  0x6f   : > { %2503 = vset.pattern.permute.xlu1 %v2688_v23 }
  0x70   : > { %1210 = vperm.xlu1 %2503, %v2946_v18   ;;  %2514 = vset.pattern.permute.xlu0 %v2689_v24 }
  0x71   : > { %1539 = vperm.xlu0 %2514, %v2952_v20  }
  0x74   : > { %1216 = vperm.xlu1 %2503, %v669_v19  }
  0x75   : > { %2515 = vset.pattern.permute.xlu0 %v2690_v25 }
  0x76   : > { %809 = vperm.xlu0 %2515, %v2952_v20  }
  0x78   : > { %2504 = vset.pattern.permute.xlu1 %v2691_v26 }
  0x79   : > { %1476 = vperm.xlu1 %2504, %v2946_v18  }
  0x7a   : > { %2516 = vset.pattern.permute.xlu0 %v2692_v27 }
  0x7b   : > { %1076 = vperm.xlu0 %2516, %v2952_v20  }
  0x7d   : > { %1482 = vperm.xlu1 %2504, %v669_v19  }
  0x7f   : > { %2517 = vset.pattern.permute.xlu0 %v2693_v28 }
  0x80   : > { %1334 = vperm.xlu0 %2517, %v2952_v20  }
  0x81   : > { %2505 = vset.pattern.permute.xlu1 %v2686_v21 }
  0x82   : > { %711 = vperm.xlu1 %2505, %v2952_v20  }
  0x84   : > { %2520 = vset.pattern.permute.xlu0 %v2694_v29 }
  0x85   : > { %1106 = vperm.xlu0 %2520, %v2952_v20  }
  0x86   : > { %2506 = vset.pattern.permute.xlu1 %v2695_v30 }
  0x87   : > { %978 = vperm.xlu1 %2506, %v2952_v20  }
  0x89   : > { %2521 = vset.pattern.permute.xlu0 %v2696_v31 }
  0x8a   : > { %1342 = vperm.xlu0 %2521, %v2952_v20  }
  0x8b   : > { %2507 = vset.pattern.permute.xlu1 %v2697_v32 }
  0x8c   : > { %1008 = vperm.xlu1 %2507, %v2952_v20  }
  0x8e   : > { %2522 = vset.pattern.permute.xlu0 %v2698_v33 }
  0x8f   : > { %1599 = vperm.xlu0 %2522, %v2952_v20  }
  0x90   : > { %2508 = vset.pattern.permute.xlu1 %v2699_v34 }
  0x91   : > { %1038 = vperm.xlu1 %2508, %v2952_v20  }
  0x93   : > { %2525 = vset.pattern.permute.xlu0 %v2700_v35 }
  0x94   : > { %1372 = vperm.xlu0 %2525, %v2952_v20  }
  0x95   : > { %2509 = vset.pattern.permute.xlu1 %v2701_v36 }
  0x96   : > { %1244 = vperm.xlu1 %2509, %v2952_v20  }
  0x98   : > { %2526 = vset.pattern.permute.xlu0 %v2702_v37 }
  0x99   : > { %1607 = vperm.xlu0 %2526, %v2952_v20  }
  0x9a   : > { %2512 = vset.pattern.permute.xlu1 %v2703_v38 }
  0x9b   : > { %1304 = vperm.xlu1 %2512, %v2952_v20  }
  0x9d   : > { %2527 = vset.pattern.permute.xlu0 %v2704_v39 }
  0x9e   : > { %899 = vperm.xlu0 %2527, %v2952_v20  }
  0x9f   : > { %2513 = vset.pattern.permute.xlu1 %v2705_v40 }
  0xa0   : > { %1510 = vperm.xlu1 %2513, %v2952_v20  }
  0xa2   : > { %2528 = vset.pattern.permute.xlu0 %v2706_v41 }
  0xa3   : > { %1166 = vperm.xlu0 %2528, %v2952_v20  }
  0xa4   : > { %2518 = vset.pattern.permute.xlu1 %v2707_v42 }
  0xa5   : > { %1569 = vperm.xlu1 %2518, %v2952_v20  }
  0xa7   : > { %2531 = vset.pattern.permute.xlu0 %v2708_v43 }
  0xa8   : > { %929 = vperm.xlu0 %2531, %v2952_v20  }
  0xa9   : > { %2519 = vset.pattern.permute.xlu1 %v2709_v44 }
  0xaa   : > { %839 = vperm.xlu1 %2519, %v2952_v20  }
  0xac   : > { %2532 = vset.pattern.permute.xlu0 %v2710_v45 }
  0xad   : > { %1196 = vperm.xlu0 %2532, %v2952_v20  }
  0xae   : > { %2523 = vset.pattern.permute.xlu1 %v2711_v46 }
  0xaf   : > { %869 = vperm.xlu1 %2523, %v2952_v20  }
  0xb1   : > { %2533 = vset.pattern.permute.xlu0 %v2712_v47 }
  0xb2   : > { %1432 = vperm.xlu0 %2533, %v2952_v20  }
  0xb3   : > { %2524 = vset.pattern.permute.xlu1 %v2713_v48 }
  0xb4   : > { %1136 = vperm.xlu1 %2524, %v2952_v20  }
  0xb6   : > { %2536 = vset.pattern.permute.xlu0 %v2714_v49  ;;  %v520_v49 = vld [vmem:[%s4170_s3] sm:$0xff] }
  0xb7   : > { %1696 = vperm.xlu0 %2536, %v2952_v20  }
  0xb8   : > { %2529 = vset.pattern.permute.xlu1 %v2715_v50 }
  0xb9   : > { %1402 = vperm.xlu1 %2529, %v2952_v20  }
  0xbb   : > { %2537 = vset.pattern.permute.xlu0 %v2684_v0  ;;  %v518_v0 = vld [vmem:[%s4169_s2 + $0x10] sm:$0xff] }
  0xbc   : > { %741 = vperm.xlu0 %2537, %v2952_v20  }
  0xbd   : > { %2530 = vset.pattern.permute.xlu1 %v2716_v51 }
  0xbe   : > { %1637 = vperm.xlu1 %2530, %v2952_v20  }
  0xc0   : > { %1204 = vperm.xlu0 %2537, %v2995_v52  }
  0xc2   : > { %2534 = vset.pattern.permute.xlu1 %v2717_v53  ;;  %v523_v53 = vld [vmem:[%s4170_s3 + $0x18] sm:$0xff] }
  0xc3   : > { %1667 = vperm.xlu1 %2534, %v2952_v20  }
  0xc4   : > { %2538 = vset.pattern.permute.xlu0 %v2718_v54 }
  0xc7   : > { %2535 = vset.pattern.permute.xlu1 %v2719_v55 }
  0xc8   : > { %1462 = vperm.xlu1 %2535, %v2952_v20  }
  0xcc   : > { %2542 = vset.pattern.permute.xlu1 %v2686_v21 }
  0xd1   : > { %v495_v56 = vpop.xlane.xlu1 %494 }
  0xd2   : > { %v489_v57 = vpop.xlane.xlu0 %488  ;;  %v502_v60 = vmul.f32 0.00390625, %v495_v56 }
  0xd3   : > { %v500_v58 = vmul.f32 0.00390625, %v489_v57 }
  0xd4   : > { %v526_v9 = vmul.f32 %v518_v0, %v502_v60  ;;  %v522_v60 = vld [vmem:[%s4170_s3 + $0x10] sm:$0xff] }
  0xd5   : > { %v506_v61 = vpop.xlane.xlu1 %505  ;;  %v524_v1 = vmul.f32 %v516_v59, %v500_v58 }
  0xd6   : > { %v492_v62 = vpop.xlane.xlu0 %491  ;;  %v559_v14 = vmul.f32 %v516_v59, %v506_v61  ;;  %v532_v24 = vsel %vm528_vm0, %v526_v9, 0.0  ;;  %v521_v59 = vld [vmem:[%s4170_s3 + $0x8] sm:$0xff] }
  0xd7   : > { %v501_v2 = vmul.f32 0.00390625, %v492_v62  ;;  %v529_v13 = vsel %vm528_vm0, %v524_v1, 0.0 }
  0xd8   : > { %v563_v31 = vsel %vm528_vm0, %v559_v14, 0.0 }
  0xd9   : > { %v498_v3 = vpop.xlane.xlu1 %497  ;;  %v525_v5 = vmul.f32 %v517_v63, %v501_v2 }
  0xda   : > { %v503_v11 = vmul.f32 0.00390625, %v498_v3  ;;  %v509_v12 = vpop.xlane.xlu0 %508 }
  0xdb   : > { %v530_v15 = vsel %vm528_vm0, %v525_v5, 0.0  ;;  %v560_v16 = vmul.f32 %v517_v63, %v509_v12 }
  0xdc   : > { %v531_v17 = vadd.f32 %v530_v15, %v529_v13  ;;  %v527_v19 = vmul.f32 %v519_v10, %v503_v11 }
  0xdd   : > { %v564_v22 = vsel %vm528_vm0, %v560_v16, 0.0  ;;  %v515_v25 = vpop.xlane.xlu1 %514 }
  0xde   : > { %v533_v27 = vadd.f32 %v532_v24, %v531_v17  ;;  %v512_v28 = vpop.xlane.xlu0 %511  ;;  %v534_v29 = vsel %vm528_vm0, %v527_v19, 0.0  ;;  %v562_v30 = vmul.f32 %v519_v10, %v515_v25  ;;  %v565_v33 = vadd.f32 %v564_v22, %v563_v31 }
  0xdf   : > { %v561_v32 = vmul.f32 %v518_v0, %v512_v28 }
  0xe0   : > { %v535_v34 = vadd.f32 %v534_v29, %v533_v27  ;;  %v568_v36 = vsel %vm528_vm0, %v562_v30, 0.0 }
  0xe1   : > { %v566_v35 = vsel %vm528_vm0, %v561_v32, 0.0  ;;  %v3048_v14 = vpop.permute.xlu1 %944 }
  0xe2   : > { %v567_v37 = vadd.f32 %v566_v35, %v565_v33  ;;  %v536_v38 = vrot.slane %v535_v34, 4 }
  0xe4   : > { %v537_v39 = vadd.f32 %v536_v38, %v535_v34  ;;  %v569_v40 = vadd.f32 %v568_v36, %v567_v37 }
  0xe5   : > { %v3051_v15 = vpop.permute.xlu1 %681 }
  0xe6   : > { %v538_v41 = vrot.slane %v537_v39, 2  ;;  %v570_v42 = vrot.slane %v569_v40, 4  ;;  %v3058_v17 = vpop.permute.xlu0 %1274 }
  0xe8   : > { %v539_v43 = vadd.f32 %v538_v41, %v537_v39  ;;  %v571_v44 = vadd.f32 %v570_v42, %v569_v40 }
  0xea   : > { %v540_v45 = vrot.slane %v539_v43, 1  ;;  %v572_v46 = vrot.slane %v571_v44, 2  ;;  %v3055_v16 = vpop.permute.xlu1 %950 }
  0xeb   : > { %v3064_v22 = vpop.permute.xlu0 %1068 }
  0xec   : > { %v573_v47 = vadd.f32 %v572_v46, %v571_v44  ;;  %v541_v48 = vadd.f32 %v540_v45, %v539_v43  ;;  %4256 = vst [vmem:[#allocation13_spill] sm:$0xff] %v3064_v22 }
  0xee   : > { %v574_v50 = vrot.slane %v573_v47, 1  ;;  %v542_v51 = vmax.f32 %v541_v48, 0.0 }
  0xef   : > { %v3060_v19 = vpop.permute.xlu1 %1210 }
  0xf0   : > { %v575_v54 = vadd.f32 %v574_v50, %v573_v47  ;;  %v543_v55 = vmul.f32 %v542_v51, %v520_v49  ;;  %v546_v56 = vmul.f32 %v542_v51, %v523_v53  ;;  %v544_v2 = vmul.f32 %v542_v51, %v521_v59 }
  0xf1   : > { %v545_v12 = vmul.f32 %v542_v51, %v522_v60 }
  0xf2   : > { %v547_v57 = vsel %vm528_vm0, %v543_v55, 0.0  ;;  %v576_v58 = vmax.f32 %v575_v54, 0.0  ;;  %v3036_v61 = vsel %vm528_vm0, %v546_v56, 0.0  ;;  %v550_v11 = vsel %vm528_vm0, %v544_v2, 0.0 }
  0xf3   : > { %548 = vadd.xlane.f32.xlu0 %v547_v57  ;;  %v553_v13 = vsel %vm528_vm0, %v545_v12, 0.0  ;;  %v3067_v24 = vpop.permute.xlu1 %1216 }
  0xf4   : > { %v577_v62 = vmul.f32 %v576_v58, %v520_v49  ;;  %v578_v63 = vmul.f32 %v576_v58, %v521_v59  ;;  %v580_v0 = vmul.f32 %v576_v58, %v523_v53  ;;  %v579_v1 = vmul.f32 %v576_v58, %v522_v60 }
  0xf6   : > { %v581_v3 = vsel %vm528_vm0, %v577_v62, 0.0  ;;  %v584_v5 = vsel %vm528_vm0, %v578_v63, 0.0  ;;  %v3041_v9 = vsel %vm528_vm0, %v580_v0, 0.0  ;;  %v3044_v10 = vsel %vm528_vm0, %v579_v1, 0.0 }
  0xf7   : > { %4255 = vst [vmem:[#allocation12_spill] sm:$0xff] %v3044_v10  ;;  %582 = vadd.xlane.f32.xlu1 %v581_v3  ;;  %v3416_v10 = vld [vmem:[%s4168_s1 + $0x14] ss:$8 sm:$0x3] }
  0xf8   : > { %v3073_v25 = vpop.permute.xlu1 %1476  ;;  %4302 = vst [vmem:[#allocation54_spill] sm:$0xff] %v3416_v10 }
  0xfb   : > { %551 = vadd.xlane.f32.xlu1 %v550_v11 }
  0xfc   : > { %v3077_v28 = vpop.permute.xlu1 %1482 }
  0xff   : > { %554 = vadd.xlane.f32.xlu1 %v553_v13 }
 0x109   : > { %1726 = vperm.xlu0 %2538, %v2952_v20  }
 0x10d   : > { %2539 = vset.pattern.permute.xlu0 %v2688_v23  ;;  %v3070_v23 = vpop.permute.xlu0 %1539 }
 0x10e   : > { %771 = vperm.xlu0 %2539, %v2952_v20  }
 0x111   : > { %v3075_v27 = vpop.permute.xlu0 %809 }
 0x112   : > { %1470 = vperm.xlu0 %2539, %v2995_v52   ;;  %4257 = vst [vmem:[#allocation14_spill] sm:$0xff] %v3075_v27 }
 0x116   : > { %2540 = vset.pattern.permute.xlu0 %v2691_v26  ;;  %v3079_v26 = vpop.permute.xlu1 %711 }
 0x117   : > { %801 = vperm.xlu0 %2540, %v2952_v20   ;;  %v3081_v20 = vpop.permute.xlu0 %1076 }
 0x118   : > { %4258 = vst [vmem:[#allocation15_spill] sm:$0xff] %v3081_v20 }
 0x11a   : > { %v3083_v29 = vpop.permute.xlu1 %978 }
 0x11b   : > { %1734 = vperm.xlu0 %2540, %v2995_v52   ;;  %4259 = vst [vmem:[#allocation16_spill] sm:$0xff] %v3083_v29  ;;  %v3085_v30 = vpop.permute.xlu0 %1334 }
 0x11e   : > { %v3087_v31 = vpop.permute.xlu1 %1008 }
 0x11f   : > { %2541 = vset.pattern.permute.xlu0 %v2686_v21  ;;  %4260 = vst [vmem:[#allocation17_spill] sm:$0xff] %v3087_v31  ;;  %v3089_v21 = vpop.permute.xlu0 %1106 }
 0x120   : > { %674 = vperm.xlu0 %2541, %v2946_v18   ;;  %4261 = vst [vmem:[#allocation18_spill] sm:$0xff] %v3089_v21 }
 0x122   : > { %v3091_v32 = vpop.permute.xlu1 %1038 }
 0x123   : > { %4262 = vst [vmem:[#allocation19_spill] sm:$0xff] %v3091_v32  ;;  %v3093_v18 = vpop.permute.xlu0 %1342 }
 0x124   : > { %4263 = vst [vmem:[#allocation20_spill] sm:$0xff] %v3093_v18 }
 0x126   : > { %v3095_v33 = vpop.permute.xlu1 %1244 }
 0x127   : > { %v3097_v34 = vpop.permute.xlu0 %1599 }
 0x128   : > { %4264 = vst [vmem:[#allocation21_spill] sm:$0xff] %v3097_v34 }
 0x12a   : > { %v3099_v35 = vpop.permute.xlu1 %1304 }
 0x12b   : > { %v3101_v36 = vpop.permute.xlu0 %1372 }
 0x12c   : > { %4265 = vst [vmem:[#allocation22_spill] sm:$0xff] %v3101_v36 }
 0x12e   : > { %v3103_v37 = vpop.permute.xlu1 %1510 }
 0x12f   : > { %v3105_v38 = vpop.permute.xlu0 %1607 }
 0x130   : > { %4266 = vst [vmem:[#allocation23_spill] sm:$0xff] %v3105_v38 }
 0x132   : > { %v3108_v39 = vpop.permute.xlu1 %1569 }
 0x133   : > { %4267 = vst [vmem:[#allocation24_spill] sm:$0xff] %v3108_v39  ;;  %v3110_v40 = vpop.permute.xlu0 %899 }
 0x134   : > { %4268 = vst [vmem:[#allocation25_spill] sm:$0xff] %v3110_v40 }
 0x136   : > { %v3112_v41 = vpop.permute.xlu1 %839 }
 0x137   : > { %4269 = vst [vmem:[#allocation26_spill] sm:$0xff] %v3112_v41  ;;  %v3114_v42 = vpop.permute.xlu0 %1166 }
 0x138   : > { %4270 = vst [vmem:[#allocation27_spill] sm:$0xff] %v3114_v42  ;;  %v3395_v42 = vld [vmem:[%s4168_s1 + $0x22] ss:$8 sm:$0x3] }
 0x13a   : > { %v3116_v43 = vpop.permute.xlu1 %869 }
 0x13b   : > { %4271 = vst [vmem:[#allocation28_spill] sm:$0xff] %v3116_v43  ;;  %v3118_v44 = vpop.permute.xlu0 %929  ;;  %v3411_v43 = vld [vmem:[%s4168_s1 + $0x3] ss:$8 sm:$0x3] }
 0x13c   : > { %4272 = vst [vmem:[#allocation29_spill] sm:$0xff] %v3118_v44 }
 0x13e   : > { %v3120_v45 = vpop.permute.xlu1 %1136 }
 0x13f   : > { %585 = vadd.xlane.f32.xlu0 %v584_v5  ;;  %4273 = vst [vmem:[#allocation30_spill] sm:$0xff] %v3120_v45  ;;  %v3122_v46 = vpop.permute.xlu0 %1196 }
 0x140   : > { %4274 = vst [vmem:[#allocation31_spill] sm:$0xff] %v3122_v46  ;;  %v3373_v46 = vld [vmem:[%s4168_s1 + $0x13] ss:$8 sm:$0x3] }
 0x141   : > { %4301 = vst [vmem:[#allocation53_spill] sm:$0xff] %v3373_v46 }
 0x142   : > { %v3124_v47 = vpop.permute.xlu1 %1402 }
 0x143   : > { %4275 = vst [vmem:[#allocation32_spill] sm:$0xff] %v3124_v47  ;;  %v3126_v48 = vpop.permute.xlu0 %1432 }
 0x144   : > { %4276 = vst [vmem:[#allocation33_spill] sm:$0xff] %v3126_v48 }
 0x147   : > { %v3130_v49 = vpop.permute.xlu0 %1696 }
 0x148   : > { %4278 = vst [vmem:[#allocation35_spill] sm:$0xff] %v3130_v49 }
 0x14b   : > { %v3134_v51 = vpop.permute.xlu0 %741 }
 0x14f   : > { %v3138_v54 = vpop.permute.xlu0 %1204 }
 0x150   : > { %4281 = vst [vmem:[#allocation38_spill] sm:$0xff] %v3138_v54  ;;  %v3368_v54 = vld [vmem:[%s4168_s1 + $0x2] ss:$8 sm:$0x3] }
 0x155   : > { %938 = vperm.xlu0 %2541, %v2995_v52   ;;  %v3128_v52 = vpop.permute.xlu1 %1637 }
 0x156   : > { %4277 = vst [vmem:[#allocation34_spill] sm:$0xff] %v3128_v52 }
 0x159   : > { %v3132_v50 = vpop.permute.xlu1 %1667 }
 0x15a   : > { %4279 = vst [vmem:[#allocation36_spill] sm:$0xff] %v3132_v50 }
 0x15d   : > { %v3136_v53 = vpop.permute.xlu1 %1462 }
 0x15e   : > { %4280 = vst [vmem:[#allocation37_spill] sm:$0xff] %v3136_v53 }
 0x180   : > { %v549_v55 = vpop.xlane.xlu0 %548 }
 0x184   : > { %v583_v56 = vpop.xlane.xlu1 %582 }
 0x185   : > { %v593_v57 = vadd.f32 %v583_v56, %v549_v55 }
 0x187   : > { %v2316_v58 = vmul.f32 -1.442695, %v593_v57 }
 0x188   : > { %v3150_v13 = vpop.permute.xlu0 %1726 }
 0x189   : > { %2543 = vpow2.f32 %v2316_v58  ;;  %4282 = vst [vmem:[#allocation39_spill] sm:$0xff] %v3150_v13 }
 0x193   : > { %v2544_v59 = vpop.eup %2543 }
 0x194   : > { %v609_v60 = vadd.f32 1.0, %v2544_v59 }
 0x196   : > { %2545 = vrcp.f32 %v609_v60 }
 0x1a0   : > { %v2546_v62 = vpop.eup %2545 }
 0x1a1   : > { %v3141_v63 = vmul.f32 %v2546_v62, %v2922_v4  ;;  %v3144_v0 = vmul.f32 %v2546_v62, %v2925_v6  ;;  %v3152_v6 = vpop.permute.xlu0 %771 }
 0x1a3   : > { %v629_v1 = vrot.slane %v3141_v63, 4  ;;  %v635_v2 = vrot.slane %v3144_v0, 4 }
 0x1a5   : > { %v630_v3 = vadd.f32 %v629_v1, %v3141_v63  ;;  %v636_v5 = vadd.f32 %v635_v2, %v3144_v0  ;;  %v3156_v52 = vpop.permute.xlu0 %1470 }
 0x1a6   : > { %4283 = vst [vmem:[#allocation40_spill] sm:$0xff] %v3156_v52 }
 0x1a7   : > { %v631_v11 = vrot.slane %v630_v3, 2  ;;  %v637_v12 = vrot.slane %v636_v5, 2 }
 0x1a9   : > { %v632_v55 = vadd.f32 %v631_v11, %v630_v3  ;;  %v638_v56 = vadd.f32 %v637_v12, %v636_v5 }
 0x1ab   : > { %v633_v57 = vrot.slane %v632_v55, 1  ;;  %v639_v4 = vrot.slane %v638_v56, 1 }
 0x1ad   : > { %v634_v58 = vadd.f32 %v633_v57, %v632_v55  ;;  %v640_v59 = vadd.f32 %v639_v4, %v638_v56  ;;  %v3158_v55 = vpop.permute.xlu0 %801 }
 0x1af   : > { %v642_v60 = vmul.f32 0.125, %v634_v58  ;;  %v643_v62 = vmul.f32 0.125, %v640_v59 }
 0x1b1   : > { %v644_v49 = vsub.f32 %v3141_v63, %v642_v60  ;;  %v645_v1 = vsub.f32 %v3144_v0, %v643_v62  ;;  %v3160_v38 = vpop.permute.xlu0 %1734 }
 0x1b2   : > { %4284 = vst [vmem:[#allocation41_spill] sm:$0xff] %v3160_v38 }
 0x1b3   : > { %v646_v50 = vmul.f32 %v644_v49, %v644_v49  ;;  %v647_v2 = vmul.f32 %v645_v1, %v645_v1 }
 0x1b5   : > { %v648_v53 = vrot.slane %v646_v50, 4  ;;  %v654_v13 = vrot.slane %v647_v2, 4 }
 0x1b7   : > { %v649_v3 = vadd.f32 %v648_v53, %v646_v50  ;;  %v655_v5 = vadd.f32 %v654_v13, %v647_v2  ;;  %v675_v50 = vpop.permute.xlu0 %674  ;;  %v552_v53 = vpop.xlane.xlu1 %551 }
 0x1b9   : > { %v650_v11 = vrot.slane %v649_v3, 2  ;;  %v656_v12 = vrot.slane %v655_v5, 2 }
 0x1bb   : > { %v651_v56 = vadd.f32 %v650_v11, %v649_v3  ;;  %v657_v57 = vadd.f32 %v656_v12, %v655_v5 }
 0x1bd   : > { %v652_v4 = vrot.slane %v651_v56, 1  ;;  %v658_v58 = vrot.slane %v657_v57, 1 }
 0x1bf   : > { %v653_v59 = vadd.f32 %v652_v4, %v651_v56  ;;  %v659_v60 = vadd.f32 %v658_v58, %v657_v57 }
 0x1c1   : > { %v660_v62 = vmul.f32 0.125, %v653_v59  ;;  %v661_v48 = vmul.f32 0.125, %v659_v60 }
 0x1c3   : > { %v662_v47 = vadd.f32 1e-06, %v660_v62  ;;  %v663_v52 = vadd.f32 1e-06, %v661_v48 }
 0x1c5   : > { %2547 = vrsqrt.f32 %v662_v47 }
 0x1c6   : > { %2549 = vrsqrt.f32 %v663_v52 }
 0x1cc   : > { %v586_v13 = vpop.xlane.xlu0 %585 }
 0x1cd   : > { %v594_v2 = vadd.f32 %v586_v13, %v552_v53  ;;  %v2080_v13 = vld [vmem:[%s4180_s13 + $0x10] sm:$0xff] }
 0x1cf   : > { %v2548_v36 = vpop.eup %2547  ;;  %v2317_v18 = vmul.f32 -1.442695, %v594_v2 }
 0x1d0   : > { %v2550_v3 = vpop.eup %2549  ;;  %v666_v5 = vmul.f32 %v2548_v36, %v644_v49 }
 0x1d1   : > { %v667_v11 = vmul.f32 %v2550_v3, %v645_v1  ;;  %2551 = vpow2.f32 %v2317_v18 }
 0x1d2   : > { %v677_v12 = vmul.f32 %v675_v50, %v666_v5  ;;  %v947_v56 = vmul.f32 %v3048_v14, %v666_v5  ;;  %v1213_v36 = vmul.f32 %v3060_v19, %v666_v5  ;;  %v1479_v58 = vmul.f32 %v3073_v25, %v666_v5 }
 0x1d3   : > { %v678_v57 = vmul.f32 %v675_v50, %v667_v11  ;;  %v1480_v53 = vmul.f32 %v3073_v25, %v667_v11 }
 0x1d4   : > { %v3164_v4 = vadd.f32 %v3051_v15, %v677_v12  ;;  %v3170_v47 = vadd.f32 %v3055_v16, %v947_v56  ;;  %v3179_v52 = vadd.f32 %v3067_v24, %v1213_v36  ;;  %v3312_v36 = vpop.permute.xlu0 %938 }
 0x1d5   : > { %v3174_v18 = vadd.f32 %v3051_v15, %v678_v57  ;;  %v948_v15 = vmul.f32 %v3048_v14, %v667_v11  ;;  %v3197_v14 = vadd.f32 %v3077_v28, %v1479_v58  ;;  %4297 = vst [vmem:[#allocation50_spill] sm:$0xff] %v3312_v36  ;;  %v2337_v36 = vld [vmem:[%s4168_s1 + $0x24] ss:$8 sm:$0x3] }
 0x1d6   : > { %4285 = vst [vmem:[#allocation42_spill] sm:$0xff] %v3164_v4  ;;  %718 = vrot.lane.b32.xlu0 %v3164_v4, %s4200_s21  ;;  %686 = vrot.lane.b32.xlu1 %v3164_v4, %s2721_s26  ;;  %4286 = vst [vmem:[#allocation43_spill] sm:$0xff] %v3170_v47 }
 0x1d7   : > { %4287 = vst [vmem:[#allocation44_spill] sm:$0xff] %v3174_v18  ;;  %4288 = vst [vmem:[#allocation45_spill] sm:$0xff] %v3179_v52  ;;  %v3190_v1 = vadd.f32 %v3055_v16, %v948_v15 }
 0x1d8   : > { %4290 = vst [vmem:[#allocation47_spill] sm:$0xff] %v3197_v14 }
 0x1d9   : > { %4289 = vst [vmem:[#allocation46_spill] sm:$0xff] %v3190_v1 }
 0x1da   : > { %985 = vrot.lane.b32.xlu0 %v3170_v47, %s2722_s15  ;;  %688 = vrot.lane.b32.xlu1 %v3174_v18, %s2721_s26  ;;  %s4202_s26 = smov 7  }
 0x1db   : > { %v2552_v48 = vpop.eup %2551 }
 0x1dc   : > { %v610_v49 = vadd.f32 1.0, %v2552_v48 }
 0x1de   : > { %2553 = vrcp.f32 %v610_v49  ;;  %1251 = vrot.lane.b32.xlu0 %v3179_v52, %s2723_s22  ;;  %720 = vrot.lane.b32.xlu1 %v3174_v18, %s4200_s21  ;;  %s4204_s21 = smov 96  }
 0x1e2   : > { %780 = vrot.lane.b32.xlu0 %v3174_v18, %s2724_s19  ;;  %955 = vrot.lane.b32.xlu1 %v3170_v47, %s2725_s24 }
 0x1e6   : > { %1045 = vrot.lane.b32.xlu0 %v3170_v47, %s2726_s27  ;;  %957 = vrot.lane.b32.xlu1 %v3190_v1, %s2725_s24  ;;  %s2732_s24 = smov 30  }
 0x1e8   : > { %v2554_v59 = vpop.eup %2553 }
 0x1e9   : > { %v624_v60 = vmul.f32 %v2554_v59, %v2931_v8  ;;  %v623_v62 = vmul.f32 %v2554_v59, %v2928_v7  ;;  %v3211_v7 = vadd.f32 %v3077_v28, %v1480_v53  ;;  %v1214_v8 = vmul.f32 %v3060_v19, %v667_v11  ;;  %v3262_v19 = vpop.xlane.xlu1 %554 }
 0x1ea   : > { %1517 = vrot.lane.b32.xlu0 %v3197_v14, %s2727_s28  ;;  %987 = vrot.lane.b32.xlu1 %v3190_v1, %s2722_s15  ;;  %s4203_s15 = smov 113   ;;  %4293 = vst [vmem:[#allocation49_spill] sm:$0xff] %v3262_v19  ;;  %v690_v59 = vlaneseq }
 0x1eb   : > { %v2374_v16 = vpack.c.bf16 %v624_v60, %v3144_v0  ;;  %v2376_v50 = vpack.c.bf16 %v623_v62, %v3141_v63  ;;  %v3227_v25 = vadd.f32 %v3067_v24, %v1214_v8  ;;  %v1878_v24 = vld [vmem:[%s4178_s11 + $0x10] sm:$0xff]  ;;  %v2078_v63 = vld [vmem:[%s4180_s13] sm:$0xff] }
 0x1ed   : > { %2375 = vmatprep.subr.bf16.mxu1 %v2374_v16  ;;  %4291 = vst [vmem:[#allocation48_spill] sm:$0xff] %v3227_v25  ;;  %v698_v16 = vshrl.u32 %v690_v59, 7 }
 0x1ee   : > { %1311 = vrot.lane.b32.xlu0 %v3179_v52, %s2728_s18  ;;  %748 = vrot.lane.b32.xlu1 %v3164_v4, %s2729_s20 }
 0x1ef   : > { %2377 = vmatpush1.bf16.msra.mxu1 %v2376_v50  ;;  %v3330_v50 = vand.u32 127, %v690_v59  ;;  %v3356_v59 = vld [vmem:[%s4168_s1 + $0x11] ss:$8 sm:$0x3] }
 0x1f0   : > { %4300 = vst [vmem:[#allocation52_spill] sm:$0xff] %v3356_v59 }
 0x1f1   : > { %vm692_vm1 = vcmp.lt.s32.totalorder %v3330_v50, 17  ;;  %vm722_vm2 = vcmp.lt.s32.totalorder %v3330_v50, 16  ;;  %vm1285_vm3 = vcmp.lt.s32.totalorder %v3330_v50, 75  ;;  %vm1225_vm4 = vcmp.lt.s32.totalorder %v3330_v50, 85 }
 0x1f2   : > { %1578 = vrot.lane.b32.xlu0 %v3211_v7, %s4202_s26  ;;  %750 = vrot.lane.b32.xlu1 %v3174_v18, %s2729_s20  ;;  %s2734_s26 = smov 85   ;;  %s2735_s20 = smov 53   ;;  %vm1255_vm5 = vcmp.lt.s32.totalorder %v3330_v50, 80  ;;  %vm752_vm6 = vcmp.lt.s32.totalorder %v3330_v50, 15  ;;  %vm1491_vm7 = vcmp.lt.s32.totalorder %v3330_v50, 119  ;;  %vm880_vm8 = vcmp.lt.s32.totalorder %v3330_v50, 112 }
 0x1f3   : > { %vm1315_vm9 = vcmp.lt.s32.totalorder %v3330_v50, 5  ;;  %vm782_vm10 = vcmp.lt.s32.totalorder %v3330_v50, 1  ;;  %vm989_vm11 = vcmp.lt.s32.totalorder %v3330_v50, 32  ;;  %vm959_vm12 = vcmp.lt.s32.totalorder %v3330_v50, 34 }
 0x1f4   : > { %vm1550_vm13 = vcmp.lt.s32.totalorder %v3330_v50, 105  ;;  %vm1019_vm14 = vcmp.lt.s32.totalorder %v3330_v50, 30  ;;  %vm1049_vm15 = vcmp.lt.s32.totalorder %v3330_v50, 2  ;;  %vm820_vm0 = vcmp.lt.s32.totalorder %v3330_v50, 127 }
 0x1f6   : > { %846 = vrot.lane.b32.xlu0 %v3164_v4, %s4203_s15  ;;  %1015 = vrot.lane.b32.xlu1 %v3170_v47, %s2732_s24  ;;  %s4207_s15 = smov 121  }
 0x1fa   : > { %878 = vrot.lane.b32.xlu0 %v3174_v18, %s2727_s28  ;;  %1017 = vrot.lane.b32.xlu1 %v3190_v1, %s2732_s24  ;;  %s4206_s24 = smov 23  }
 0x1fe   : > { %1145 = vrot.lane.b32.xlu0 %v3190_v1, %s4204_s21  ;;  %1221 = vrot.lane.b32.xlu1 %v3179_v52, %s2734_s26  ;;  %s4205_s21 = smov 9  }
 0x202   : > { %1381 = vrot.lane.b32.xlu0 %v3227_v25, %s2735_s20  ;;  %1223 = vrot.lane.b32.xlu1 %v3227_v25, %s2734_s26  ;;  %s2739_s26 = smov 75  }
 0x206   : > { %1614 = vrot.lane.b32.xlu0 %v3197_v14, %s4207_s15  ;;  %1253 = vrot.lane.b32.xlu1 %v3227_v25, %s2723_s22  ;;  %s2740_s22 = smov 119   ;;  %s4295_s15 = smov 96  }
 0x20a   : > { %1644 = vrot.lane.b32.xlu0 %v3197_v14, %s4206_s24  ;;  %778 = vrot.lane.b32.xlu1 %v3164_v4, %s2724_s19  ;;  %s2741_s19 = smov 105   ;;  %s2745_s24 = smov 123  }
 0x20e   : > { %1703 = vrot.lane.b32.xlu0 %v3197_v14, %s4205_s21  ;;  %1047 = vrot.lane.b32.xlu1 %v3190_v1, %s2726_s27  ;;  %s2742_s27 = smov 127   ;;  %s4299_s21 = smov 23  }
 0x212   : > { %1281 = vrot.lane.b32.xlu1 %v3179_v52, %s2739_s26 }
 0x216   : > { %1283 = vrot.lane.b32.xlu1 %v3227_v25, %s2739_s26  ;;  %s2743_s26 = smov 126  }
 0x21a   : > { %1487 = vrot.lane.b32.xlu1 %v3197_v14, %s2740_s22 }
 0x21e   : > { %1489 = vrot.lane.b32.xlu1 %v3211_v7, %s2740_s22  ;;  %s2749_s22 = smov 43  }
 0x222   : > { %1519 = vrot.lane.b32.xlu1 %v3211_v7, %s2727_s28 }
 0x226   : > { %1313 = vrot.lane.b32.xlu1 %v3227_v25, %s2728_s18  ;;  %s4292_s18 = smov 7  }
 0x22a   : > { %1546 = vrot.lane.b32.xlu1 %v3197_v14, %s2741_s19 }
 0x22d   : > { %557 = vadd.xlane.f32.xlu0 %v3036_v61  ;;  %v1809_v61 = vld [vmem:[%s4175_s8 + $0x8] sm:$0xff] }
 0x22e   : > { %1548 = vrot.lane.b32.xlu1 %v3211_v7, %s2741_s19  ;;  %s4294_s19 = smov 113  }
 0x231   : > { %591 = vadd.xlane.f32.xlu0 %v3041_v9 }
 0x232   : > { %816 = vrot.lane.b32.xlu1 %v3164_v4, %s2742_s27 }
 0x236   : > { %818 = vrot.lane.b32.xlu1 %v3174_v18, %s2742_s27  ;;  %s2746_s27 = smov 111  }
 0x23a   : > { %1083 = vrot.lane.b32.xlu1 %v3170_v47, %s2743_s26 }
 0x23e   : > { %1085 = vrot.lane.b32.xlu1 %v3190_v1, %s2743_s26  ;;  %s2744_s26 = smov 98  }
 0x242   : > { %1576 = vrot.lane.b32.xlu1 %v3197_v14, %s4292_s18 }
 0x246   : > { %848 = vrot.lane.b32.xlu1 %v3174_v18, %s4294_s19  ;;  %s4296_s19 = smov 121  }
 0x247   : > { %1819 = vperm.xlu0 %2541, %v1809_v61   ;;  %v3336_v61 = vsub.s32 0, %v698_v16 }
 0x248   : > { %v3269_v9 = vpop.permute.xlu1 %686  ;;  %v3317_v49 = vpop.permute.xlu0 %718 }
 0x249   : > { %v1234_v21 = vrot.slane %v3395_v42, %v3336_v61  ;;  %v1294_v32 = vrot.slane %v2337_v36, %v3336_v61 }
 0x24a   : > { %1113 = vrot.lane.b32.xlu1 %v3170_v47, %s2744_s26 }
 0x24b   : > { %1892 = vperm.xlu0 %2541, %v1878_v24   ;;  %v3341_v24 = vld [vmem:[%s4168_s1] ss:$8 sm:$0x3] }
 0x24c   : > { %v3275_v28 = vpop.permute.xlu1 %688  ;;  %v3324_v60 = vpop.permute.xlu0 %985 }
 0x24e   : > { %1115 = vrot.lane.b32.xlu1 %v3190_v1, %s2744_s26  ;;  %s4304_s26 = smov 16  }
 0x24f   : > { %2084 = vperm.xlu0 %2541, %v2078_v63   ;;  %v3343_v63 = vsub.s32 1, %v698_v16  ;;  %v3361_v16 = vld [vmem:[%s4168_s1 + $0x12] ss:$8 sm:$0x3] }
 0x250   : > { %v3281_v0 = vpop.permute.xlu1 %720  ;;  %v3332_v53 = vpop.permute.xlu0 %1251 }
 0x251   : > { %v1298_v29 = vrot.slane %v2337_v36, %v3343_v63 }
 0x252   : > { %1349 = vrot.lane.b32.xlu1 %v3179_v52, %s2745_s24 }
 0x253   : > { %2094 = vperm.xlu0 %2541, %v2080_v13   ;;  %v3350_v13 = vld [vmem:[%s4168_s1 + $0x1] ss:$8 sm:$0x3] }
 0x254   : > { %v3287_v2 = vpop.permute.xlu1 %955  ;;  %v3380_v44 = vpop.permute.xlu0 %780 }
 0x256   : > { %1351 = vrot.lane.b32.xlu1 %v3227_v25, %s2745_s24  ;;  %s4309_s24 = smov 9  }
 0x258   : > { %v3290_v3 = vpop.permute.xlu1 %957  ;;  %v3449_v41 = vpop.permute.xlu0 %1045 }
 0x259   : > { %4303 = vst [vmem:[#allocation55_spill] sm:$0xff] %v3449_v41  ;;  %v4306_v41 = vrot.slane %v3341_v24, %v3343_v63 }
 0x25a   : > { %876 = vrot.lane.b32.xlu1 %v3164_v4, %s2727_s28  ;;  %s2747_s28 = smov 94  }
 0x25c   : > { %v3294_v5 = vpop.permute.xlu1 %987 }
 0x25e   : > { %1143 = vrot.lane.b32.xlu1 %v3170_v47, %s4295_s15  ;;  %s471_s15 = sand.u32 1, %s2673_s30  }
 0x260   : > { %v3298_v11 = vpop.permute.xlu1 %748 }
 0x262   : > { %1379 = vrot.lane.b32.xlu1 %v3179_v52, %s2735_s20  ;;  %s2748_s20 = smov 48  }
 0x264   : > { %v3302_v12 = vpop.permute.xlu1 %750 }
 0x266   : > { %1616 = vrot.lane.b32.xlu1 %v3211_v7, %s4296_s19  ;;  %s2313_s19 = sshll.u32 %s471_s15, 6 }
 0x268   : > { %v3306_v56 = vpop.permute.xlu1 %1015 }
 0x26a   : > { %906 = vrot.lane.b32.xlu1 %v3164_v4, %s2746_s27 }
 0x26c   : > { %v3309_v57 = vpop.permute.xlu1 %1017 }
 0x26e   : > { %908 = vrot.lane.b32.xlu1 %v3174_v18, %s2746_s27  ;;  %v694_v18 = vsel %vm692_vm1, %v3275_v28, %v3269_v9  ;;  %s4094_s27 = scalar_lea.vmem [#allocation5], %s2313_s19 }
 0x270   : > { %v3314_v48 = vpop.permute.xlu1 %1221 }
 0x272   : > { %1173 = vrot.lane.b32.xlu1 %v3170_v47, %s2747_s28  ;;  %v2343_v47 = vld [vmem:[%s4168_s1 + $0x33] ss:$8 sm:$0x3] }
 0x274   : > { %v3319_v15 = vpop.permute.xlu1 %1223 }
 0x276   : > { %1175 = vrot.lane.b32.xlu1 %v3190_v1, %s2747_s28  ;;  %v1238_v1 = vrot.slane %v3395_v42, %v3343_v63  ;;  %v1500_v42 = vrot.slane %v2343_v47, %v3336_v61  ;;  %s2233_s28 = sshll.u32 %s4094_s27, 4  ;;  %s4114_s28 = int_to_ptr.vmem [resolvable:$true] %s2233_s28 }
 0x278   : > { %v3322_v58 = vpop.permute.xlu1 %1253 }
 0x279   : > { %v1256_v36 = vsel %vm1255_vm5, %v3332_v53, %v3322_v58  ;;  %v1257_v34 = vsel %vm1255_vm5, %v3322_v58, %v3332_v53  ;;  %vm1117_vm5 = vcmp.lt.s32.totalorder %v3330_v50, 98 }
 0x27a   : > { %1409 = vrot.lane.b32.xlu1 %v3179_v52, %s2748_s20 }
 0x27c   : > { %v3327_v62 = vpop.permute.xlu1 %778 }
 0x27e   : > { %1411 = vrot.lane.b32.xlu1 %v3227_v25, %s2748_s20 }
 0x280   : > { %v3334_v8 = vpop.permute.xlu1 %1047 }
 0x281   : > { %4298 = vst [vmem:[#allocation51_spill] sm:$0xff] %v3334_v8 }
 0x282   : > { %1646 = vrot.lane.b32.xlu1 %v3211_v7, %s4299_s21 }
 0x284   : > { %v1282_v19 = vpop.permute.xlu1 %1281 }
 0x286   : > { %1439 = vrot.lane.b32.xlu1 %v3179_v52, %s2749_s22  ;;  %v2336_v52 = vld [vmem:[%s4168_s1 + $0x23] ss:$8 sm:$0x3] }
 0x287   : > { %v1264_v20 = vrot.slane %v2336_v52, %v3336_v61 }
 0x288   : > { %v1284_v38 = vpop.permute.xlu1 %1283 }
 0x289   : > { %v1286_v45 = vsel %vm1285_vm3, %v1282_v19, %v1284_v38  ;;  %v1287_v40 = vsel %vm1285_vm3, %v1284_v38, %v1282_v19  ;;  %v2344_v38 = vld [vmem:[%s4168_s1 + $0x34] ss:$8 sm:$0x3]  ;;  %v1268_v19 = vrot.slane %v2336_v52, %v3343_v63  ;;  %v3459_v52 = vld [vmem:[%s4168_s1 + $0x25] ss:$8 sm:$0x3]  ;;  %v1271_v31 = vmul.f32 %v1264_v20, %v1257_v34 }
 0x28a   : > { %1441 = vrot.lane.b32.xlu1 %v3227_v25, %s2749_s22  ;;  %v1504_v25 = vrot.slane %v2343_v47, %v3343_v63  ;;  %v1529_v22 = vrot.slane %v2344_v38, %v3336_v61  ;;  %v1533_v27 = vrot.slane %v2344_v38, %v3343_v63  ;;  %v693_v47 = vsel %vm692_vm1, %v3269_v9, %v3275_v28  ;;  %v3492_v38 = vld [vmem:[%s4168_s1 + $0x35] ss:$8 sm:$0x3]  ;;  %s2365_s22 = sshll.u32 %s2849_s17, 10  ;;  %s2615_s17 = scalar_lea.vmem %s4114_s28, 1024 }
 0x28b   : > { %v1324_v58 = vrot.slane %v3459_v52, %v3336_v61  ;;  %v1328_v53 = vrot.slane %v3459_v52, %v3343_v63  ;;  %v724_v9 = vsel %vm722_vm2, %v3281_v0, %v3317_v49  ;;  %v1226_v28 = vsel %vm1225_vm4, %v3314_v48, %v3319_v15  ;;  %s4120_s21 = scalar_lea.hbm %s4181_s14, %s2365_s22  ;;  %p2616_p5 = scmp.ne.s32.totalorder %s4114_s28, %s2615_s17 }
 0x28c   : > { %v1488_v4 = vpop.permute.xlu1 %1487  ;;  %v1227_v52 = vsel %vm1225_vm4, %v3319_v15, %v3314_v48  ;;  %v1272_v46 = vmul.f32 %v1268_v19, %v1256_v36  ;;  %v708_v8 = vmul.f32 %v4306_v41, %v693_v47  ;;  %v1518_v48 = vpop.permute.xlu0 %1517  ;;  %v1563_v34 = vrot.slane %v3492_v38, %v3343_v63 }
 0x28d   : > { %v1241_v15 = vmul.f32 %v1234_v21, %v1227_v52  ;;  %v1302_v19 = vmul.f32 %v1298_v29, %v1286_v45  ;;  %v4308_v41 = vrot.slane %v3350_v13, %v3343_v63  ;;  %v1277_v21 = vmul.f32 %v3058_v17, %v1271_v31  ;;  %p2617_p10 = pnand %p2616_p5, %p4367_p9 }
 0x28e   : > { %1674 = vrot.lane.b32.xlu1 %v3197_v14, %s4304_s26  ;;  %v723_v14 = vsel %vm722_vm2, %v3317_v49, %v3281_v0  ;;  %v4305_v49 = vrot.slane %v3341_v24, %v3336_v61  ;;  %v753_v45 = vsel %vm752_vm6, %v3298_v11, %v3302_v12  ;;  %vm1087_vm1 = vcmp.lt.s32.totalorder %v3330_v50, 126 }
 0x28f   : > { %v739_v24 = vmul.f32 %v4308_v41, %v723_v14  ;;  %vm1580_vm3 = vcmp.lt.s32.totalorder %v3330_v50, 7  ;;  %vm850_vm4 = vcmp.lt.s32.totalorder %v3330_v50, 113  ;;  %p2618_p12 = pneg %p2617_p10 }
 0x290   : > { %v1490_v10 = vpop.permute.xlu1 %1489  ;;  %v707_v39 = vmul.f32 %v4305_v49, %v694_v18  ;;  %v4307_v18 = vrot.slane %v3350_v13, %v3336_v61  ;;  %v1308_v13 = vmul.f32 %v3099_v35, %v1302_v19 }
 0x291   : > { %v1492_v59 = vsel %vm1491_vm7, %v1488_v4, %v1490_v10  ;;  %v1493_v0 = vsel %vm1491_vm7, %v1490_v10, %v1488_v4  ;;  %v1242_v10 = vmul.f32 %v1238_v1, %v1226_v28  ;;  %v1301_v4 = vmul.f32 %v1294_v32, %v1287_v40 }
 0x292   : > { %1676 = vrot.lane.b32.xlu1 %v3211_v7, %s4304_s26  ;;  %v738_v36 = vmul.f32 %v4307_v18, %v724_v9  ;;  %v1507_v47 = vmul.f32 %v1500_v42, %v1493_v0  ;;  %v1508_v49 = vmul.f32 %v1504_v25, %v1492_v59  ;;  %v1278_v32 = vmul.f32 %v3058_v17, %v1272_v46  ;;  %v1312_v59 = vpop.permute.xlu0 %1311 }
 0x293   : > { %v754_v1 = vsel %vm752_vm6, %v3302_v12, %v3298_v11  ;;  %v1247_v17 = vmul.f32 %v3095_v33, %v1241_v15  ;;  %v1248_v46 = vmul.f32 %v3095_v33, %v1242_v10  ;;  %v1307_v25 = vmul.f32 %v3099_v35, %v1301_v4 }
 0x294   : > { %v1520_v20 = vpop.permute.xlu1 %1519  ;;  %v1513_v11 = vmul.f32 %v3103_v37, %v1507_v47  ;;  %v745_v15 = vmul.f32 %v3134_v51, %v739_v24  ;;  %v783_v10 = vsel %vm782_vm10, %v3327_v62, %v3380_v44  ;;  %v4311_v24 = vrot.slane %v3368_v54, %v3343_v63 }
 0x295   : > { %v1521_v29 = vsel %vm880_vm8, %v1518_v48, %v1520_v20  ;;  %v1522_v40 = vsel %vm880_vm8, %v1520_v20, %v1518_v48  ;;  %v1279_v9 = vadd.f32 %v1277_v21, %v1247_v17  ;;  %v1280_v28 = vadd.f32 %v1278_v32, %v1248_v46 }
 0x296   : > { %v1536_v14 = vmul.f32 %v1529_v22, %v1522_v40  ;;  %v1537_v31 = vmul.f32 %v1533_v27, %v1521_v29  ;;  %1705 = vrot.lane.b32.xlu1 %v3211_v7, %s4309_s24  ;;  %v1514_v22 = vmul.f32 %v3103_v37, %v1508_v49  ;;  %v3569_v37 = vld [vmem:[%s4168_s1 + $0x5] ss:$8 sm:$0x3]  ;;  %v769_v47 = vmul.f32 %v4311_v24, %v753_v45  ;;  %s2751_s24 = smov [#allocation5]  }
 0x297   : > { %v1310_v4 = vadd.f32 %v1308_v13, %v1280_v28  ;;  %v829_v49 = vrot.slane %v3569_v37, %v3336_v61  ;;  %v715_v21 = vmul.f32 %v3079_v26, %v708_v8  ;;  %v991_v29 = vsel %vm989_vm11, %v3294_v5, %v3324_v60  ;;  %v4319_v28 = vld [vmem:[#allocation24_spill] sm:$0xff]  ;;  %s2619_s19 = sshll.u32 %s2751_s24, 4  ;;  %s2620_s19 = int_to_ptr.vmem [resolvable:$false] %s2619_s19 }
 0x298   : > { %v1542_v27 = vmul.f32 %v3070_v23, %v1536_v14  ;;  %v1543_v12 = vmul.f32 %v3070_v23, %v1537_v31  ;;  %v1314_v42 = vpop.permute.xlu1 %1313  ;;  %v744_v23 = vmul.f32 %v3134_v51, %v738_v36  ;;  %v4310_v51 = vrot.slane %v3368_v54, %v3336_v61  ;;  %s2621_s0 = scalar_lea.vmem %s2620_s19, 2048  ;;  %p2622_p2 = scmp.lt.s32.totalorder %s4114_s28, %s2620_s19 }
 0x299   : > { %v1316_v33 = vsel %vm1315_vm9, %v1312_v59, %v1314_v42  ;;  %v1317_v35 = vsel %vm1315_vm9, %v1314_v42, %v1312_v59  ;;  %v990_v54 = vsel %vm989_vm11, %v3324_v60, %v3294_v5  ;;  %v4313_v8 = vrot.slane %v3411_v43, %v3343_v63  ;;  %v4317_v42 = vld [vmem:[#allocation51_spill] sm:$0xff]  ;;  %p2623_p3 = scmp.lt.s32.totalorder %s2621_s0, %s2615_s17 }
 0x29a   : > { %v1544_v52 = vadd.f32 %v1542_v27, %v1513_v11  ;;  %v1545_v0 = vadd.f32 %v1543_v12, %v1514_v22  ;;  %v1331_v48 = vmul.f32 %v1324_v58, %v1317_v35  ;;  %v1332_v20 = vmul.f32 %v1328_v53, %v1316_v33 }
 0x29b   : > { %v784_v58 = vsel %vm782_vm10, %v3380_v44, %v3327_v62  ;;  %v1309_v53 = vadd.f32 %v1307_v25, %v1279_v9  ;;  %v768_v36 = vmul.f32 %v4310_v51, %v754_v1  ;;  %v833_v44 = vrot.slane %v3569_v37, %v3343_v63  ;;  %v4318_v9 = vld [vmem:[#allocation55_spill] sm:$0xff]  ;;  %v4326_v51 = vld [vmem:[#allocation17_spill] sm:$0xff]  ;;  %p2624_p4 = por %p2623_p3, %p2622_p2 }
 0x29c   : > { %v1337_v19 = vmul.f32 %v3085_v30, %v1331_v48  ;;  %v1338_v18 = vmul.f32 %v3085_v30, %v1332_v20  ;;  %v1547_v41 = vpop.permute.xlu1 %1546  ;;  %v714_v62 = vmul.f32 %v3079_v26, %v707_v39  ;;  %v4312_v39 = vrot.slane %v3411_v43, %v3336_v61 }
 0x29d   : > { %v799_v40 = vmul.f32 %v4313_v8, %v783_v10  ;;  %v747_v1 = vadd.f32 %v745_v15, %v715_v21  ;;  %v960_v14 = vsel %vm959_vm12, %v3287_v2, %v3290_v3  ;;  %v961_v5 = vsel %vm959_vm12, %v3290_v3, %v3287_v2  ;;  %v4323_v10 = vld [vmem:[#allocation53_spill] sm:$0xff]  ;;  %v4330_v8 = vld [vmem:[#allocation44_spill] sm:$0xff]  ;;  %p2625_p7 = pnand %p2624_p4, %p2618_p12 }
 0x29e   : > { %v3595_v30 = vadd.f32 %v1337_v19, %v1309_v53  ;;  %v3597_v32 = vadd.f32 %v1338_v18, %v1310_v4  ;;  %v798_v26 = vmul.f32 %v4312_v39, %v784_v58  ;;  %v746_v45 = vadd.f32 %v744_v23, %v714_v62 }
 0x29f   : > { %v774_v31 = vmul.f32 %v3152_v6, %v768_v36  ;;  %v775_v17 = vmul.f32 %v3152_v6, %v769_v47  ;;  %v4314_v25 = vrot.slane %v3361_v16, %v3336_v61  ;;  %v4315_v59 = vrot.slane %v3361_v16, %v3343_v63  ;;  %v4327_v47 = vld [vmem:[#allocation54_spill] sm:$0xff] }
 0x2a0   : > { %v1549_v60 = vpop.permute.xlu1 %1548  ;;  %v4316_v2 = vrot.slane %v3492_v38, %v3336_v61  ;;  %v1020_v22 = vsel %vm1019_vm14, %v3306_v56, %v3309_v57  ;;  %v1021_v27 = vsel %vm1019_vm14, %v3309_v57, %v3306_v56  ;;  %v804_v16 = vmul.f32 %v3158_v55, %v798_v26  ;;  %v4320_v56 = vld [vmem:[#allocation52_spill] sm:$0xff] }
 0x2a1   : > { %v1551_v43 = vsel %vm1550_vm13, %v1547_v41, %v1549_v60  ;;  %v1552_v46 = vsel %vm1550_vm13, %v1549_v60, %v1547_v41  ;;  %v1005_v13 = vmul.f32 %v4314_v25, %v991_v29  ;;  %v1006_v11 = vmul.f32 %v4315_v59, %v990_v54 }
 0x2a2   : > { %v1566_v3 = vmul.f32 %v4316_v2, %v1552_v46  ;;  %v1567_v6 = vmul.f32 %v1563_v34, %v1551_v43  ;;  %v805_v12 = vmul.f32 %v3158_v55, %v799_v40  ;;  %v1050_v38 = vsel %vm1049_vm15, %v4318_v9, %v4317_v42  ;;  %v4331_v40 = vld [vmem:[#allocation14_spill] sm:$0xff]  ;;  %v4334_v43 = vld [vmem:[#allocation19_spill] sm:$0xff] }
 0x2a3   : > { %v1051_v34 = vsel %vm1049_vm15, %v4317_v42, %v4318_v9  ;;  %v4321_v57 = vrot.slane %v4320_v56, %v3336_v61  ;;  %v4322_v55 = vrot.slane %v4320_v56, %v3343_v63  ;;  %v776_v23 = vadd.f32 %v774_v31, %v746_v45  ;;  %v4336_v42 = vld [vmem:[#allocation26_spill] sm:$0xff] }
 0x2a4   : > { %v1572_v33 = vmul.f32 %v4319_v28, %v1566_v3  ;;  %v1573_v35 = vmul.f32 %v4319_v28, %v1567_v6  ;;  %v817_v48 = vpop.permute.xlu1 %816  ;;  %v777_v15 = vadd.f32 %v775_v17, %v747_v1  ;;  %v4324_v58 = vrot.slane %v4323_v10, %v3336_v61  ;;  %v4335_v6 = vld [vmem:[#allocation13_spill] sm:$0xff] }
 0x2a5   : > { %v975_v20 = vmul.f32 %v4321_v57, %v961_v5  ;;  %v976_v37 = vmul.f32 %v4322_v55, %v960_v14  ;;  %v4325_v4 = vrot.slane %v4323_v10, %v3343_v63  ;;  %v1011_v36 = vmul.f32 %v4326_v51, %v1005_v13  ;;  %v4333_v14 = vld [vmem:[#allocation16_spill] sm:$0xff]  ;;  %v2346_v56 = vld [vmem:[%s4168_s1 + $0x36] ss:$8 sm:$0x3]  ;;  %v4337_v55 = vld [vmem:[#allocation43_spill] sm:$0xff] }
 0x2a6   : > { %v1035_v53 = vmul.f32 %v4324_v58, %v1021_v27  ;;  %v3672_v18 = vadd.f32 %v1572_v33, %v1544_v52  ;;  %v3674_v41 = vadd.f32 %v1573_v35, %v1545_v0  ;;  %v1012_v24 = vmul.f32 %v4326_v51, %v1006_v11  ;;  %v4332_v0 = vld [vmem:[#allocation42_spill] sm:$0xff] }
 0x2a7   : > { %v1036_v19 = vmul.f32 %v4325_v4, %v1020_v22  ;;  %v4328_v62 = vrot.slane %v4327_v47, %v3336_v61  ;;  %v4329_v54 = vrot.slane %v4327_v47, %v3343_v63  ;;  %v806_v39 = vadd.f32 %v804_v16, %v776_v23  ;;  %v2331_v11 = vld [vmem:[%s4168_s1 + $0x16] ss:$8 sm:$0x3] }
 0x2a8   : > { %v807_v26 = vadd.f32 %v805_v12, %v777_v15  ;;  %v813_v52 = vmul.f32 %v4331_v40, %v4330_v8  ;;  %v819_v45 = vpop.permute.xlu1 %818  ;;  %v812_v1 = vmul.f32 %v4331_v40, %v4332_v0  ;;  %v981_v5 = vmul.f32 %v4333_v14, %v975_v20  ;;  %v4339_v10 = vld [vmem:[#allocation46_spill] sm:$0xff] }
 0x2a9   : > { %v1065_v21 = vmul.f32 %v4328_v62, %v1051_v34  ;;  %v1066_v29 = vmul.f32 %v4329_v54, %v1050_v38  ;;  %v982_v60 = vmul.f32 %v4333_v14, %v976_v37  ;;  %v821_v31 = vsel %vm820_vm0, %v817_v48, %v819_v45  ;;  %v4338_v37 = vld [vmem:[#allocation15_spill] sm:$0xff] }
 0x2aa   : > { %v822_v17 = vsel %vm820_vm0, %v819_v45, %v817_v48  ;;  %v1041_v46 = vmul.f32 %v4334_v43, %v1035_v53  ;;  %v1042_v25 = vmul.f32 %v4334_v43, %v1036_v19  ;;  %v836_v13 = vmul.f32 %v829_v49, %v821_v31  ;;  %v1579_v19 = vpop.permute.xlu0 %1578  ;;  %v2324_v62 = vld [vmem:[%s4168_s1 + $0x6] ss:$8 sm:$0x3] }
 0x2ab   : > { %v837_v59 = vmul.f32 %v833_v44, %v822_v17  ;;  %v1013_v2 = vadd.f32 %v1011_v36, %v981_v5  ;;  %v1014_v3 = vadd.f32 %v1012_v24, %v982_v60  ;;  %v1071_v22 = vmul.f32 %v4335_v6, %v1065_v21  ;;  %v4341_v17 = vld [vmem:[#allocation21_spill] sm:$0xff] }
 0x2ac   : > { %v1072_v27 = vmul.f32 %v4335_v6, %v1066_v29  ;;  %v814_v16 = vadd.f32 %v812_v1, %v806_v39  ;;  %v815_v12 = vadd.f32 %v813_v52, %v807_v26  ;;  %v842_v9 = vmul.f32 %v4336_v42, %v836_v13  ;;  %v1084_v34 = vpop.permute.xlu1 %1083  ;;  %v4340_v29 = vld [vmem:[#allocation18_spill] sm:$0xff] }
 0x2ad   : > { %v843_v38 = vmul.f32 %v4336_v42, %v837_v59  ;;  %v1096_v49 = vrot.slane %v2331_v11, %v3336_v61  ;;  %v1100_v44 = vrot.slane %v2331_v11, %v3343_v63  ;;  %v1043_v28 = vadd.f32 %v1041_v46, %v1013_v2 }
 0x2ae   : > { %v1044_v33 = vadd.f32 %v1042_v25, %v1014_v3  ;;  %v844_v35 = vadd.f32 %v842_v9, %v814_v16  ;;  %v1079_v23 = vmul.f32 %v4338_v37, %v4337_v55  ;;  %v1080_v58 = vmul.f32 %v4338_v37, %v4339_v10  ;;  %v847_v31 = vpop.permute.xlu0 %846  ;;  %v4343_v16 = vld [vmem:[#allocation28_spill] sm:$0xff] }
 0x2af   : > { %v845_v48 = vadd.f32 %v843_v38, %v815_v12  ;;  %v1073_v57 = vadd.f32 %v1071_v22, %v1043_v28  ;;  %v1589_v24 = vrot.slane %v2346_v56, %v3336_v61  ;;  %v1593_v47 = vrot.slane %v2346_v56, %v3343_v63  ;;  %v4342_v22 = vld [vmem:[#allocation12_spill] sm:$0xff] }
 0x2b0   : > { %v1074_v20 = vadd.f32 %v1072_v27, %v1044_v33  ;;  %v1086_v15 = vpop.permute.xlu1 %1085  ;;  %v859_v45 = vrot.slane %v2324_v62, %v3336_v61  ;;  %v863_v0 = vrot.slane %v2324_v62, %v3343_v63  ;;  %v2332_v27 = vld [vmem:[%s4168_s1 + $0x17] ss:$8 sm:$0x3]  ;;  %vm1147_vm6 = vcmp.lt.s32.totalorder %v3330_v50, 96 }
 0x2b1   : > { %v1088_v53 = vsel %vm1087_vm1, %v1084_v34, %v1086_v15  ;;  %v1089_v4 = vsel %vm1087_vm1, %v1086_v15, %v1084_v34  ;;  %v1081_v21 = vadd.f32 %v1079_v23, %v1073_v57  ;;  %v1130_v34 = vrot.slane %v2332_v27, %v3343_v63  ;;  %v4344_v57 = vld [vmem:[#allocation30_spill] sm:$0xff]  ;;  %v1808_v15 = vld [vmem:[%s4175_s8] sm:$0xff] }
 0x2b2   : > { %v1103_v51 = vmul.f32 %v1096_v49, %v1088_v53  ;;  %v1104_v36 = vmul.f32 %v1100_v44, %v1089_v4  ;;  %v1082_v54 = vadd.f32 %v1080_v58, %v1074_v20  ;;  %v1840_v58 = vld [vmem:[%s4176_s9] sm:$0xff]  ;;  %v1841_v4 = vld [vmem:[%s4176_s9 + $0x8] sm:$0xff]  ;;  %vm910_vm7 = vcmp.lt.s32.totalorder %v3330_v50, 111 }
 0x2b3   : > { %vm1353_vm9 = vcmp.lt.s32.totalorder %v3330_v50, 123  ;;  %vm1383_vm10 = vcmp.lt.s32.totalorder %v3330_v50, 53  ;;  %vm1413_vm11 = vcmp.lt.s32.totalorder %v3330_v50, 48  ;;  %vm1618_vm12 = vcmp.lt.s32.totalorder %v3330_v50, 121 }
 0x2b4   : > { %v1109_v39 = vmul.f32 %v4340_v29, %v1103_v51  ;;  %v1110_v26 = vmul.f32 %v4340_v29, %v1104_v36  ;;  %v1577_v8 = vpop.permute.xlu1 %1576  ;;  %v1810_v51 = vld [vmem:[%s4175_s8 + $0x10] sm:$0xff]  ;;  %v2325_v36 = vld [vmem:[%s4168_s1 + $0x7] ss:$8 sm:$0x3]  ;;  %vm1648_vm13 = vcmp.lt.s32.totalorder %v3330_v50, 23  ;;  %vm1443_vm14 = vcmp.lt.s32.totalorder %v3330_v50, 43 }
 0x2b5   : > { %v1581_v40 = vsel %vm1580_vm3, %v1577_v8, %v1579_v19  ;;  %v1582_v52 = vsel %vm1580_vm3, %v1579_v19, %v1577_v8  ;;  %v2326_v29 = vld [vmem:[%s4168_s1 + $0x10] ss:$8 sm:$0x3]  ;;  %vm1707_vm15 = vcmp.lt.s32.totalorder %v3330_v50, 9 }
 0x2b6   : > { %v1111_v1 = vadd.f32 %v1109_v39, %v1081_v21  ;;  %v1112_v14 = vadd.f32 %v1110_v26, %v1082_v54  ;;  %v1596_v5 = vmul.f32 %v1589_v24, %v1582_v52  ;;  %v1597_v60 = vmul.f32 %v1593_v47, %v1581_v40  ;;  %v879_v24 = vpop.permute.xlu0 %878  ;;  %v1811_v21 = vld [vmem:[%s4175_s8 + $0x18] sm:$0xff]  ;;  %v2333_v26 = vld [vmem:[%s4168_s1 + $0x20] ss:$8 sm:$0x3]  ;;  %v1842_v40 = vld [vmem:[%s4176_s9 + $0x10] sm:$0xff] }
 0x2b7   : > { %v889_v47 = vrot.slane %v2325_v36, %v3336_v61  ;;  %v893_v52 = vrot.slane %v2325_v36, %v3343_v63 }
 0x2b8   : > { %v1602_v43 = vmul.f32 %v4341_v17, %v1596_v5  ;;  %v1603_v46 = vmul.f32 %v4341_v17, %v1597_v60  ;;  %v849_v25 = vpop.permute.xlu1 %848  ;;  %v4345_v5 = vld [vmem:[#allocation25_spill] sm:$0xff] }
 0x2b9   : > { %v851_v13 = vsel %vm850_vm4, %v847_v31, %v849_v25  ;;  %v852_v59 = vsel %vm850_vm4, %v849_v25, %v847_v31  ;;  %v1160_v31 = vrot.slane %v2333_v26, %v3343_v63  ;;  %v1843_v25 = vld [vmem:[%s4176_s9 + $0x18] sm:$0xff] }
 0x2ba   : > { %v3731_v11 = vadd.f32 %v1602_v43, %v3672_v18  ;;  %v3734_v2 = vadd.f32 %v1603_v46, %v3674_v41  ;;  %v866_v3 = vmul.f32 %v859_v45, %v851_v13  ;;  %v867_v6 = vmul.f32 %v863_v0, %v852_v59  ;;  %588 = vadd.xlane.f32.xlu1 %v4342_v22  ;;  %v1146_v0 = vpop.permute.xlu0 %1145 }
 0x2bb   : > { %v1126_v41 = vrot.slane %v2332_v27, %v3336_v61  ;;  %v919_v45 = vrot.slane %v2326_v29, %v3336_v61  ;;  %v923_v43 = vrot.slane %v2326_v29, %v3343_v63 }
 0x2bc   : > { %v872_v12 = vmul.f32 %v4343_v16, %v866_v3  ;;  %v873_v42 = vmul.f32 %v4343_v16, %v867_v6  ;;  %v1114_v9 = vpop.permute.xlu1 %1113  ;;  %v2334_v16 = vld [vmem:[%s4168_s1 + $0x21] ss:$8 sm:$0x3] }
 0x2be   : > { %v874_v18 = vadd.f32 %v872_v12, %v844_v35  ;;  %v3743_v38 = vadd.f32 %v873_v42, %v845_v48 }
 0x2c0   : > { %v1116_v49 = vpop.permute.xlu1 %1115 }
 0x2c1   : > { %v1118_v44 = vsel %vm1117_vm5, %v1114_v9, %v1116_v49  ;;  %v1119_v28 = vsel %vm1117_vm5, %v1116_v49, %v1114_v9 }
 0x2c2   : > { %v1133_v33 = vmul.f32 %v1126_v41, %v1118_v44  ;;  %v1134_v56 = vmul.f32 %v1130_v34, %v1119_v28  ;;  %v4346_v41 = vld [vmem:[#allocation29_spill] sm:$0xff]  ;;  %v1876_v44 = vld [vmem:[%s4178_s11] sm:$0xff] }
 0x2c4   : > { %v1139_v20 = vmul.f32 %v4344_v57, %v1133_v33  ;;  %v1140_v55 = vmul.f32 %v4344_v57, %v1134_v56  ;;  %v3749_v37 = vpop.permute.xlu1 %1349  ;;  %v1186_v56 = vrot.slane %v2334_v16, %v3336_v61  ;;  %v1190_v57 = vrot.slane %v2334_v16, %v3343_v63 }
 0x2c6   : > { %v3751_v23 = vadd.f32 %v1139_v20, %v1111_v1  ;;  %v3753_v35 = vadd.f32 %v1140_v55, %v1112_v14  ;;  %v1156_v14 = vrot.slane %v2333_v26, %v3336_v61  ;;  %v4347_v20 = vld [vmem:[#allocation27_spill] sm:$0xff] }
 0x2c8   : > { %v3755_v48 = vpop.permute.xlu1 %1351 }
 0x2cb   : > { %1814 = vperm.xlu1 %2542, %v1808_v15  }
 0x2cc   : > { %v877_v10 = vpop.permute.xlu1 %876 }
 0x2cd   : > { %v881_v54 = vsel %vm880_vm8, %v877_v10, %v879_v24  ;;  %v882_v1 = vsel %vm880_vm8, %v879_v24, %v877_v10  ;;  %vm1177_vm8 = vcmp.lt.s32.totalorder %v3330_v50, 94  ;;  %v4348_v10 = vld [vmem:[#allocation50_spill] sm:$0xff] }
 0x2ce   : > { %v896_v39 = vmul.f32 %v889_v47, %v881_v54  ;;  %v897_v6 = vmul.f32 %v893_v52, %v882_v1  ;;  %v2750_v54 = vmov 0.0  }
 0x2cf   : > { %1846 = vperm.xlu1 %2542, %v1840_v58   ;;  %1977 = vmatprep.mubr.f32.mxu0 %v2750_v54 }
 0x2d0   : > { %v1144_v53 = vpop.permute.xlu1 %1143  ;;  %v902_v60 = vmul.f32 %v4345_v5, %v896_v39  ;;  %v903_v28 = vmul.f32 %v4345_v5, %v897_v6  ;;  %2178 = vmatprep.mubr.f32.mxu1 %v2750_v54  ;;  %v2339_v39 = vld [vmem:[%s4168_s1 + $0x27] ss:$8 sm:$0x3] }
 0x2d1   : > { %v1148_v17 = vsel %vm1147_vm6, %v1144_v53, %v1146_v0  ;;  %v1149_v13 = vsel %vm1147_vm6, %v1146_v0, %v1144_v53  ;;  %v1879_v0 = vld [vmem:[%s4178_s11 + $0x18] sm:$0xff]  ;;  %v1362_v5 = vrot.slane %v2339_v39, %v3336_v61 }
 0x2d2   : > { %v1163_v27 = vmul.f32 %v1156_v14, %v1148_v17  ;;  %v904_v12 = vadd.f32 %v902_v60, %v874_v18  ;;  %v1164_v42 = vmul.f32 %v1160_v31, %v1149_v13  ;;  %v905_v24 = vadd.f32 %v903_v28, %v3743_v38  ;;  %v4349_v38 = vld [vmem:[#allocation31_spill] sm:$0xff] }
 0x2d3   : > { %1851 = vperm.xlu1 %2542, %v1841_v4   ;;  %v1877_v4 = vld [vmem:[%s4178_s11 + $0x8] sm:$0xff]  ;;  %v1354_v60 = vsel %vm1353_vm9, %v3749_v37, %v3755_v48  ;;  %v1355_v31 = vsel %vm1353_vm9, %v3755_v48, %v3749_v37  ;;  %v2341_v37 = vld [vmem:[%s4168_s1 + $0x31] ss:$8 sm:$0x3] }
 0x2d4   : > { %v3766_v19 = vpop.permute.xlu1 %1379  ;;  %v1169_v18 = vmul.f32 %v4347_v20, %v1163_v27  ;;  %v1170_v55 = vmul.f32 %v4347_v20, %v1164_v42  ;;  %v1369_v42 = vmul.f32 %v1362_v5, %v1354_v60  ;;  %v4351_v20 = vld [vmem:[#allocation45_spill] sm:$0xff] }
 0x2d6   : > { %v1171_v29 = vadd.f32 %v1169_v18, %v3751_v23  ;;  %v1172_v26 = vadd.f32 %v1170_v55, %v3753_v35  ;;  %v2340_v23 = vld [vmem:[%s4168_s1 + $0x30] ss:$8 sm:$0x3]  ;;  %v1366_v35 = vrot.slane %v2339_v39, %v3343_v63  ;;  %v4352_v18 = vld [vmem:[#allocation20_spill] sm:$0xff] }
 0x2d7   : > { %1824 = vperm.xlu1 %2542, %v1810_v51   ;;  %v1392_v6 = vrot.slane %v2340_v23, %v3336_v61  ;;  %v1345_v55 = vmul.f32 %v4352_v18, %v4351_v20  ;;  %v4359_v20 = vld [vmem:[#allocation37_spill] sm:$0xff] }
 0x2d8   : > { %v3775_v62 = vpop.permute.xlu1 %1616 }
 0x2db   : > { %1829 = vperm.xlu1 %2542, %v1811_v21  }
 0x2dc   : > { %v907_v8 = vpop.permute.xlu1 %906 }
 0x2df   : > { %1856 = vperm.xlu1 %2542, %v1842_v40  }
 0x2e0   : > { %v909_v46 = vpop.permute.xlu1 %908 }
 0x2e1   : > { %v911_v59 = vsel %vm910_vm7, %v907_v8, %v909_v46  ;;  %v912_v3 = vsel %vm910_vm7, %v909_v46, %v907_v8 }
 0x2e2   : > { %v926_v22 = vmul.f32 %v919_v45, %v911_v59  ;;  %v927_v9 = vmul.f32 %v923_v43, %v912_v3  ;;  %v4350_v43 = vld [vmem:[#allocation38_spill] sm:$0xff]  ;;  %v2079_v59 = vld [vmem:[%s4180_s13 + $0x8] sm:$0xff]  ;;  %v1382_v3 = vpop.permute.xlu0 %1381 }
 0x2e3   : > { %1861 = vperm.xlu1 %2542, %v1843_v25   ;;  %v1384_v48 = vsel %vm1383_vm10, %v3766_v19, %v1382_v3  ;;  %v1385_v27 = vsel %vm1383_vm10, %v1382_v3, %v3766_v19  ;;  %v2081_v19 = vld [vmem:[%s4180_s13 + $0x18] sm:$0xff] }
 0x2e4   : > { %v932_v34 = vmul.f32 %v4346_v41, %v926_v22  ;;  %v1174_v49 = vpop.permute.xlu1 %1173  ;;  %v933_v15 = vmul.f32 %v4346_v41, %v927_v9  ;;  %v1396_v22 = vrot.slane %v2340_v23, %v3343_v63  ;;  %v1370_v9 = vmul.f32 %v1366_v35, %v1355_v31  ;;  %v4356_v31 = vld [vmem:[#allocation33_spill] sm:$0xff] }
 0x2e5   : > { %v1422_v41 = vrot.slane %v2341_v37, %v3336_v61 }
 0x2e6   : > { %v934_v33 = vadd.f32 %v932_v34, %v904_v12  ;;  %v935_v8 = vadd.f32 %v933_v15, %v905_v24  ;;  %v1426_v34 = vrot.slane %v2341_v37, %v3343_v63  ;;  %v1400_v28 = vmul.f32 %v1396_v22, %v1385_v27  ;;  %v1615_v15 = vpop.permute.xlu0 %1614  ;;  %v2342_v24 = vld [vmem:[%s4168_s1 + $0x32] ss:$8 sm:$0x3] }
 0x2e7   : > { %1882 = vperm.xlu1 %2542, %v1876_v44   ;;  %v1399_v44 = vmul.f32 %v1392_v6, %v1384_v48  ;;  %v1452_v23 = vrot.slane %v2342_v24, %v3336_v61  ;;  %v1620_v60 = vsel %vm1618_vm12, %v3775_v62, %v1615_v15 }
 0x2e8   : > { %v3819_v58 = vadd.f32 %v4348_v10, %v934_v33  ;;  %v1176_v53 = vpop.permute.xlu1 %1175  ;;  %v3853_v17 = vadd.f32 %v4348_v10, %v935_v8  ;;  %v2347_v33 = vld [vmem:[%s4168_s1 + $0x40] ss:$8 sm:$0x3] }
 0x2e9   : > { %v1178_v51 = vsel %vm1177_vm8, %v1174_v49, %v1176_v53  ;;  %v1179_v36 = vsel %vm1177_vm8, %v1176_v53, %v1174_v49  ;;  %v4353_v10 = vld [vmem:[#allocation48_spill] sm:$0xff] }
 0x2ea   : > { %v1193_v47 = vmul.f32 %v1186_v56, %v1178_v51  ;;  %v1194_v21 = vmul.f32 %v1190_v57, %v1179_v36  ;;  %v1346_v53 = vmul.f32 %v4352_v18, %v4353_v10  ;;  %v1645_v3 = vpop.permute.xlu0 %1644 }
 0x2eb   : > { %1887 = vperm.xlu1 %2542, %v1877_v4   ;;  %v4354_v4 = vld [vmem:[#allocation22_spill] sm:$0xff] }
 0x2ec   : > { %v1199_v40 = vmul.f32 %v4349_v38, %v1193_v47  ;;  %v1200_v52 = vmul.f32 %v4349_v38, %v1194_v21  ;;  %v1410_v45 = vpop.permute.xlu1 %1409  ;;  %v1375_v51 = vmul.f32 %v4354_v4, %v1369_v42  ;;  %v1376_v36 = vmul.f32 %v4354_v4, %v1370_v9 }
 0x2ed   : > { %v1627_v47 = vrot.slane %v2347_v33, %v3336_v61  ;;  %v1631_v21 = vrot.slane %v2347_v33, %v3343_v63  ;;  %v1347_v38 = vadd.f32 %v1345_v55, %v3595_v30 }
 0x2ee   : > { %v1201_v1 = vadd.f32 %v1199_v40, %v1171_v29  ;;  %v1202_v14 = vadd.f32 %v1200_v52, %v1172_v26  ;;  %v2348_v26 = vld [vmem:[%s4168_s1 + $0x41] ss:$8 sm:$0x3]  ;;  %v1348_v40 = vadd.f32 %v1346_v53, %v3597_v32  ;;  %v1619_v32 = vsel %vm1618_vm12, %v1615_v15, %v3775_v62 }
 0x2ef   : > { %1897 = vperm.xlu1 %2542, %v1879_v0   ;;  %v4355_v52 = vld [vmem:[#allocation32_spill] sm:$0xff]  ;;  %v1657_v35 = vrot.slane %v2348_v26, %v3336_v61  ;;  %v1661_v30 = vrot.slane %v2348_v26, %v3343_v63  ;;  %v1635_v33 = vmul.f32 %v1631_v21, %v1620_v60 }
 0x2f0   : > { %v3856_v46 = vadd.f32 %v4350_v43, %v1201_v1  ;;  %v3859_v25 = vadd.f32 %v4350_v43, %v1202_v14  ;;  %v1412_v13 = vpop.permute.xlu1 %1411  ;;  %v1406_v0 = vmul.f32 %v4355_v52, %v1400_v28  ;;  %v1456_v1 = vrot.slane %v2342_v24, %v3343_v63 }
 0x2f1   : > { %v1414_v56 = vsel %vm1413_vm11, %v1410_v45, %v1412_v13  ;;  %v1415_v57 = vsel %vm1413_vm11, %v1412_v13, %v1410_v45  ;;  %v1405_v45 = vmul.f32 %v4355_v52, %v1399_v44  ;;  %v1377_v14 = vadd.f32 %v1375_v51, %v1347_v38 }
 0x2f2   : > { %v3874_v16 = vadd.f32 %v3856_v46, %v3819_v58  ;;  %v3878_v12 = vadd.f32 %v3859_v25, %v3853_v17  ;;  %v1429_v29 = vmul.f32 %v1422_v41, %v1414_v56  ;;  %v1430_v39 = vmul.f32 %v1426_v34, %v1415_v57  ;;  %v2349_v41 = vld [vmem:[%s4168_s1 + $0x42] ss:$8 sm:$0x3] }
 0x2f3   : > { %2089 = vperm.xlu1 %2542, %v2079_v59   ;;  %v1378_v5 = vadd.f32 %v1376_v36, %v1348_v40  ;;  %v1407_v6 = vadd.f32 %v1405_v45, %v1377_v14  ;;  %v4357_v34 = vld [vmem:[#allocation47_spill] sm:$0xff]  ;;  %v1634_v28 = vmul.f32 %v1627_v47, %v1619_v32  ;;  %v1686_v51 = vrot.slane %v2349_v41, %v3336_v61  ;;  %v4361_v40 = vld [vmem:[#allocation40_spill] sm:$0xff] }
 0x2f4   : > { %v1647_v49 = vpop.permute.xlu1 %1646  ;;  %v1435_v43 = vmul.f32 %v4356_v31, %v1429_v29  ;;  %v1436_v13 = vmul.f32 %v4356_v31, %v1430_v39  ;;  %v1690_v47 = vrot.slane %v2349_v41, %v3343_v63  ;;  %v4363_v31 = vld [vmem:[#allocation35_spill] sm:$0xff] }
 0x2f5   : > { %v1408_v22 = vadd.f32 %v1406_v0, %v1378_v5  ;;  %v1649_v27 = vsel %vm1648_vm13, %v1645_v3, %v1647_v49  ;;  %v1650_v62 = vsel %vm1648_vm13, %v1647_v49, %v1645_v3  ;;  %v2350_v49 = vld [vmem:[%s4168_s1 + $0x43] ss:$8 sm:$0x3] }
 0x2f6   : > { %v1437_v56 = vadd.f32 %v1435_v43, %v1407_v6  ;;  %v1664_v53 = vmul.f32 %v1657_v35, %v1649_v27  ;;  %v1665_v4 = vmul.f32 %v1661_v30, %v1650_v62  ;;  %v1716_v39 = vrot.slane %v2350_v49, %v3336_v61  ;;  %v1704_v30 = vpop.permute.xlu0 %1703  ;;  %v4364_v62 = vld [vmem:[#allocation39_spill] sm:$0xff] }
 0x2f7   : > { %2099 = vperm.xlu1 %2542, %v2081_v19   ;;  %v4358_v19 = vld [vmem:[#allocation23_spill] sm:$0xff]  ;;  %v1438_v57 = vadd.f32 %v1436_v13, %v1408_v22  ;;  %v1720_v26 = vrot.slane %v2350_v49, %v3343_v63 }
 0x2f8   : > { %v1440_v8 = vpop.permute.xlu1 %1439  ;;  %v1610_v44 = vmul.f32 %v4358_v19, %v4357_v34  ;;  %v1611_v10 = vmul.f32 %v4358_v19, %v3211_v7  ;;  %v4365_v19 = vld [vmem:[#allocation41_spill] sm:$0xff] }
 0x2fa   : > { %v1612_v21 = vadd.f32 %v1610_v44, %v3731_v11  ;;  %v1613_v29 = vadd.f32 %v1611_v10, %v3734_v2 }
 0x2fc   : > { %v1442_v59 = vpop.permute.xlu1 %1441 }
 0x2fd   : > { %v1444_v37 = vsel %vm1443_vm14, %v1440_v8, %v1442_v59  ;;  %v1445_v48 = vsel %vm1443_vm14, %v1442_v59, %v1440_v8  ;;  %v4360_v8 = vld [vmem:[#allocation34_spill] sm:$0xff] }
 0x2fe   : > { %v1459_v42 = vmul.f32 %v1452_v23, %v1444_v37  ;;  %v1460_v9 = vmul.f32 %v1456_v1, %v1445_v48  ;;  %v1640_v7 = vmul.f32 %v4360_v8, %v1634_v28  ;;  %v1641_v38 = vmul.f32 %v4360_v8, %v1635_v33  ;;  %v4362_v23 = vld [vmem:[#allocation36_spill] sm:$0xff] }
 0x2ff   : > { %v1670_v1 = vmul.f32 %v4362_v23, %v1664_v53  ;;  %v1671_v14 = vmul.f32 %v4362_v23, %v1665_v4 }
 0x300   : > { %v1465_v18 = vmul.f32 %v4359_v20, %v1459_v42  ;;  %v1466_v55 = vmul.f32 %v4359_v20, %v1460_v9  ;;  %v1675_v15 = vpop.permute.xlu1 %1674  ;;  %v1642_v32 = vadd.f32 %v1640_v7, %v1612_v21  ;;  %v1643_v60 = vadd.f32 %v1641_v38, %v1613_v29 }
 0x302   : > { %v1467_v36 = vadd.f32 %v1465_v18, %v1437_v56  ;;  %v1468_v24 = vadd.f32 %v1466_v55, %v1438_v57  ;;  %v1672_v22 = vadd.f32 %v1670_v1, %v1642_v32 }
 0x304   : > { %v1473_v52 = vadd.f32 %v4361_v40, %v1467_v36  ;;  %v1474_v45 = vadd.f32 %v4361_v40, %v1468_v24  ;;  %v1677_v0 = vpop.permute.xlu1 %1676 }
 0x305   : > { %v1678_v11 = vsel %vm722_vm2, %v1675_v15, %v1677_v0  ;;  %v1679_v61 = vsel %vm722_vm2, %v1677_v0, %v1675_v15  ;;  %vm1900_vm2 = vcmask 261120  }
 0x306   : > { %v1740_v63 = vadd.f32 %v3874_v16, %v1473_v52  ;;  %v1749_v2 = vadd.f32 %v3878_v12, %v1474_v45  ;;  %v1693_v5 = vmul.f32 %v1686_v51, %v1678_v11  ;;  %v1694_v35 = vmul.f32 %v1690_v47, %v1679_v61 }
 0x307   : > { %v1673_v16 = vadd.f32 %v1671_v14, %v1643_v60 }
 0x308   : > { %v1699_v43 = vmul.f32 %v4363_v31, %v1693_v5  ;;  %v1700_v13 = vmul.f32 %v4363_v31, %v1694_v35  ;;  %v1706_v59 = vpop.permute.xlu1 %1705 }
 0x309   : > { %v1708_v3 = vsel %vm1707_vm15, %v1704_v30, %v1706_v59  ;;  %v1709_v6 = vsel %vm1707_vm15, %v1706_v59, %v1704_v30 }
 0x30a   : > { %v1723_v37 = vmul.f32 %v1716_v39, %v1708_v3  ;;  %v1724_v12 = vmul.f32 %v1720_v26, %v1709_v6  ;;  %v1701_v48 = vadd.f32 %v1699_v43, %v1672_v22  ;;  %v1702_v27 = vadd.f32 %v1700_v13, %v1673_v16  ;;  %v558_v43 = vpop.xlane.xlu0 %557 }
 0x30c   : > { %v1729_v42 = vmul.f32 %v4364_v62, %v1723_v37  ;;  %v1730_v9 = vmul.f32 %v4364_v62, %v1724_v12 }
 0x30e   : > { %v1731_v41 = vadd.f32 %v1729_v42, %v1701_v48  ;;  %v1732_v34 = vadd.f32 %v1730_v9, %v1702_v27  ;;  %v592_v37 = vpop.xlane.xlu0 %591 }
 0x30f   : > { %v596_v42 = vadd.f32 %v592_v37, %v558_v43 }
 0x310   : > { %v1737_v44 = vadd.f32 %v4365_v19, %v1731_v41  ;;  %v1738_v28 = vadd.f32 %v4365_v19, %v1732_v34 }
 0x311   : > { %v2319_v9 = vmul.f32 -1.442695, %v596_v42  ;;  %v2075_v42 = vld [vmem:[%s4179_s12 + $0x8] sm:$0xff] }
 0x312   : > { %v1741_v33 = vadd.f32 %v1740_v63, %v1737_v44  ;;  %v1750_v56 = vadd.f32 %v1749_v2, %v1738_v28 }
 0x314   : > { %v1742_v50 = vrot.slane %v1741_v33, 4  ;;  %v1751_v57 = vrot.slane %v1750_v56, 4 }
 0x316   : > { %v1743_v20 = vadd.f32 %v1742_v50, %v1741_v33  ;;  %v1752_v18 = vadd.f32 %v1751_v57, %v1750_v56 }
 0x318   : > { %v1744_v55 = vrot.slane %v1743_v20, 2  ;;  %v1753_v15 = vrot.slane %v1752_v18, 2 }
 0x31a   : > { %v1745_v49 = vadd.f32 %v1744_v55, %v1743_v20  ;;  %v1754_v10 = vadd.f32 %v1753_v15, %v1752_v18 }
 0x31c   : > { %v1746_v53 = vrot.slane %v1745_v49, 1  ;;  %v1755_v4 = vrot.slane %v1754_v10, 1 }
 0x31e   : > { %v1747_v51 = vadd.f32 %v1746_v53, %v1745_v49  ;;  %v1756_v36 = vadd.f32 %v1755_v4, %v1754_v10 }
 0x320   : > { %v1758_v24 = vmul.f32 0.03125, %v1747_v51  ;;  %v1759_v47 = vmul.f32 0.03125, %v1756_v36  ;;  %v1820_v36 = vpop.permute.xlu0 %1819 }
 0x322   : > { %v1762_v21 = vsub.f32 %v3856_v46, %v1758_v24  ;;  %v1763_v29 = vsub.f32 %v3859_v25, %v1759_v47  ;;  %v1766_v39 = vsub.f32 %v1737_v44, %v1758_v24  ;;  %v1767_v26 = vsub.f32 %v1738_v28, %v1759_v47  ;;  %v4366_v44 = vld [vmem:[#allocation49_spill] sm:$0xff] }
 0x323   : > { %v1760_v8 = vsub.f32 %v3819_v58, %v1758_v24  ;;  %v1761_v7 = vsub.f32 %v3853_v17, %v1759_v47  ;;  %v1764_v38 = vsub.f32 %v1473_v52, %v1758_v24  ;;  %v1765_v40 = vsub.f32 %v1474_v45, %v1759_v47 }
 0x324   : > { %v1770_v0 = vmul.f32 %v1762_v21, %v1762_v21  ;;  %v1771_v23 = vmul.f32 %v1763_v29, %v1763_v29  ;;  %v1774_v5 = vmul.f32 %v1766_v39, %v1766_v39  ;;  %v1775_v46 = vmul.f32 %v1767_v26, %v1767_v26 }
 0x325   : > { %v1768_v1 = vmul.f32 %v1760_v8, %v1760_v8  ;;  %v1769_v14 = vmul.f32 %v1761_v7, %v1761_v7  ;;  %v1772_v11 = vmul.f32 %v1764_v38, %v1764_v38  ;;  %v1773_v61 = vmul.f32 %v1765_v40, %v1765_v40 }
 0x327   : > { %v1776_v63 = vadd.f32 %v1770_v0, %v1768_v1  ;;  %v1785_v2 = vadd.f32 %v1771_v23, %v1769_v14 }
 0x329   : > { %v1777_v35 = vadd.f32 %v1776_v63, %v1772_v11  ;;  %v1786_v25 = vadd.f32 %v1785_v2, %v1773_v61 }
 0x32b   : > { %v1778_v30 = vadd.f32 %v1777_v35, %v1774_v5  ;;  %v1787_v32 = vadd.f32 %v1786_v25, %v1775_v46 }
 0x32d   : > { %v1779_v60 = vrot.slane %v1778_v30, 4  ;;  %v1788_v58 = vrot.slane %v1787_v32, 4 }
 0x32f   : > { %v1780_v31 = vadd.f32 %v1779_v60, %v1778_v30  ;;  %v1789_v17 = vadd.f32 %v1788_v58, %v1787_v32  ;;  %v2583_v58 = vld [vmem:[%s2917_s25 + $0x38] sm:$0xff] }
 0x331   : > { %v1781_v52 = vrot.slane %v1780_v31, 2  ;;  %v1790_v45 = vrot.slane %v1789_v17, 2 }
 0x333   : > { %v1782_v13 = vadd.f32 %v1781_v52, %v1780_v31  ;;  %v1791_v59 = vadd.f32 %v1790_v45, %v1789_v17  ;;  %v2584_v17 = vld [vmem:[%s2917_s25 + $0x30] sm:$0xff] }
 0x335   : > { %v1783_v3 = vrot.slane %v1782_v13, 1  ;;  %v1792_v6 = vrot.slane %v1791_v59, 1 }
 0x337   : > { %v1784_v22 = vadd.f32 %v1783_v3, %v1782_v13  ;;  %v1793_v16 = vadd.f32 %v1792_v6, %v1791_v59  ;;  %v2585_v13 = vld [vmem:[%s2917_s25 + $0x28] sm:$0xff]  ;;  %v2586_v3 = vld [vmem:[%s2917_s25 + $0x20] sm:$0xff]  ;;  %s4125_s25 = scalar_lea.sflag [#allocation4], %s471_s15 }
 0x339   : > { %v1794_v12 = vmul.f32 0.03125, %v1784_v22  ;;  %v1795_v48 = vmul.f32 0.03125, %v1793_v16 }
 0x33b   : > { %v1796_v27 = vadd.f32 1e-06, %v1794_v12  ;;  %v1797_v62 = vadd.f32 1e-06, %v1795_v48  ;;  %v1872_v48 = vld [vmem:[%s4177_s10] sm:$0xff] }
 0x33d   : > { %2555 = vrsqrt.f32 %v1796_v27  ;;  %v2074_v27 = vld [vmem:[%s4179_s12] sm:$0xff] }
 0x33e   : > { %2557 = vrsqrt.f32 %v1797_v62  ;;  %v1873_v62 = vld [vmem:[%s4177_s10 + $0x8] sm:$0xff] }
 0x33f   : > { %2559 = vpow2.f32 %v2319_v9  ;;  %v1874_v9 = vld [vmem:[%s4177_s10 + $0x10] sm:$0xff] }
 0x347   : > { %v2556_v41 = vpop.eup %2555  ;;  %v589_v34 = vpop.xlane.xlu1 %588 }
 0x348   : > { %v2558_v19 = vpop.eup %2557  ;;  %v595_v28 = vadd.f32 %v589_v34, %v4366_v44  ;;  %v1800_v33 = vmul.f32 %v2556_v41, %v1760_v8  ;;  %v1802_v56 = vmul.f32 %v2556_v41, %v1762_v21  ;;  %v1804_v50 = vmul.f32 %v2556_v41, %v1764_v38  ;;  %v1875_v34 = vld [vmem:[%s4177_s10 + $0x18] sm:$0xff] }
 0x349   : > { %v1801_v57 = vmul.f32 %v2558_v19, %v1761_v7  ;;  %v1803_v20 = vmul.f32 %v2558_v19, %v1763_v29  ;;  %v1805_v18 = vmul.f32 %v2558_v19, %v1765_v40  ;;  %v1806_v55 = vmul.f32 %v2556_v41, %v1766_v39  ;;  %v2560_v53 = vpop.eup %2559  ;;  %v2076_v41 = vld [vmem:[%s4179_s12 + $0x10] sm:$0xff] }
 0x34a   : > { %v2318_v15 = vmul.f32 -1.442695, %v595_v28  ;;  %v1807_v49 = vmul.f32 %v2558_v19, %v1767_v26  ;;  %v612_v51 = vadd.f32 1.0, %v2560_v53  ;;  %v1834_v0 = vmul.f32 %v1820_v36, %v1802_v56  ;;  %v2077_v19 = vld [vmem:[%s4179_s12 + $0x18] sm:$0xff] }
 0x34b   : > { %v1815_v10 = vpop.permute.xlu1 %1814  ;;  %v1835_v23 = vmul.f32 %v1820_v36, %v1803_v20 }
 0x34c   : > { %2561 = vpow2.f32 %v2318_v15  ;;  %v1832_v24 = vmul.f32 %v1815_v10, %v1800_v33  ;;  %v1833_v47 = vmul.f32 %v1815_v10, %v1801_v57 }
 0x34d   : > { %2563 = vrcp.f32 %v612_v51 }
 0x34f   : > { %v1847_v4 = vpop.permute.xlu1 %1846 }
 0x350   : > { %v1864_v8 = vadd.f32 %v1847_v4, %v1832_v24  ;;  %v1865_v21 = vadd.f32 %v1847_v4, %v1833_v47  ;;  %v1893_v47 = vpop.permute.xlu0 %1892 }
 0x353   : > { %v1852_v1 = vpop.permute.xlu1 %1851 }
 0x354   : > { %v1866_v38 = vadd.f32 %v1852_v1, %v1834_v0  ;;  %v1867_v7 = vadd.f32 %v1852_v1, %v1835_v23 }
 0x356   : > { %v2562_v29 = vpop.eup %2561  ;;  %v2366_v39 = vpack.c.bf16 %v1867_v7, %v1865_v21  ;;  %v2368_v40 = vpack.c.bf16 %v1866_v38, %v1864_v8 }
 0x357   : > { %v611_v26 = vadd.f32 1.0, %v2562_v29  ;;  %v1825_v14 = vpop.permute.xlu1 %1824  ;;  %v2564_v63 = vpop.eup %2563 }
 0x358   : > { %2367 = vmatprep.subr.bf16.mxu0 %v2366_v39  ;;  %v1836_v2 = vmul.f32 %v1825_v14, %v1804_v50  ;;  %v1837_v5 = vmul.f32 %v1825_v14, %v1805_v18  ;;  %v628_v31 = vmul.f32 %v2583_v58, %v2564_v63  ;;  %v627_v52 = vmul.f32 %v2584_v17, %v2564_v63 }
 0x359   : > { %2565 = vrcp.f32 %v611_v26  ;;  %2369 = vmatpush1.bf16.msra.mxu0 %v2368_v40 }
 0x35b   : > { %v1830_v11 = vpop.permute.xlu1 %1829 }
 0x35c   : > { %v1838_v46 = vmul.f32 %v1830_v11, %v1806_v55  ;;  %v1839_v35 = vmul.f32 %v1830_v11, %v1807_v49 }
 0x35f   : > { %v1857_v61 = vpop.permute.xlu1 %1856 }
 0x360   : > { %v1868_v30 = vadd.f32 %v1857_v61, %v1836_v2  ;;  %v1869_v32 = vadd.f32 %v1857_v61, %v1837_v5 }
 0x363   : > { %v2566_v25 = vpop.eup %2565  ;;  %v1862_v60 = vpop.permute.xlu1 %1861 }
 0x364   : > { %v1870_v45 = vadd.f32 %v1862_v60, %v1838_v46  ;;  %v1871_v43 = vadd.f32 %v1862_v60, %v1839_v35  ;;  %v626_v59 = vmul.f32 %v2585_v13, %v2566_v25  ;;  %v625_v6 = vmul.f32 %v2586_v3, %v2566_v25 }
 0x366   : > { %v2370_v22 = vpack.c.bf16 %v1871_v43, %v1869_v32  ;;  %v2372_v16 = vpack.c.bf16 %v1870_v45, %v1868_v30  ;;  %v2378_v37 = vpack.c.bf16 %v628_v31, %v626_v59  ;;  %v2380_v12 = vpack.c.bf16 %v627_v52, %v625_v6 }
 0x367   : > { %v1883_v44 = vpop.permute.xlu1 %1882 }
 0x368   : > { %2371 = vmatprep.subr.bf16.mxu0 %v2370_v22  ;;  %2379 = vmatprep.subr.bf16.mxu1 %v2378_v37 }
 0x369   : > { %2373 = vmatpush1.bf16.msra.mxu0 %v2372_v16  ;;  %2381 = vmatpush1.bf16.msra.mxu1 %v2380_v12 }
 0x36b   : > { %v1888_v20 = vpop.permute.xlu1 %1887 }
 0x36c   : > { %2351 = vmatmul.mubr.msk.f32.vlgmr.msra.gmra.mrb[0].mxu0 %vm1900_vm2, %v1872_v48  ;;  %2355 = vmatmul.mubr.msk.f32.vlgmr.msra.gmra.mrb[0].mxu1 %vm1900_vm2, %v2074_v27 }
 0x36d   : > { %1983 = vmatprep.mubr.f32.mxu0 %v2750_v54  ;;  %2184 = vmatprep.mubr.f32.mxu1 %v2750_v54 }
 0x36f   : > { %v1898_v46 = vpop.permute.xlu1 %1897 }
 0x370   : > { %2352 = vmatmul.mubr.msk.f32.gmra.mrb[2].mxu0 %vm1900_vm2, %v1873_v62  ;;  %2356 = vmatmul.mubr.msk.f32.gmra.mrb[2].mxu1 %vm1900_vm2, %v2075_v42 }
 0x371   : > { %1989 = vmatprep.mubr.f32.mxu0 %v2750_v54  ;;  %2190 = vmatprep.mubr.f32.mxu1 %v2750_v54 }
 0x374   : > { %2353 = vmatmul.mubr.msk.f32.gmra.mrb[4].mxu0 %vm1900_vm2, %v1874_v9  ;;  %2357 = vmatmul.mubr.msk.f32.gmra.mrb[4].mxu1 %vm1900_vm2, %v2076_v41 }
 0x375   : > { %1995 = vmatprep.mubr.f32.mxu0 %v2750_v54  ;;  %2196 = vmatprep.mubr.f32.mxu1 %v2750_v54 }
 0x378   : > { %2354 = vmatmul.mubr.msk.f32.gmra.mrb[6].mxu0 %vm1900_vm2, %v1875_v34  ;;  %2358 = vmatmul.mubr.msk.f32.gmra.mrb[6].mxu1 %vm1900_vm2, %v2077_v19 }
 0x43f   : > { %v1979_v28 = vpop.f32.mrb[0].mxu0  ;;  %v4021_v33 = vpop.f32.mrb[0].mxu1 }
 0x440   : > { %v4023_v56 = vadd.f32 %v1979_v28, %v1883_v44  ;;  %v1981_v50 = vpop.f32.mrb[1].mxu0  ;;  %v4025_v54 = vpop.f32.mrb[1].mxu1 }
 0x441   : > { %v4027_v57 = vadd.f32 %v1981_v50, %v1883_v44 }
 0x442   : > { %v2010_v18 = vmul.f32 0.044715, %v4023_v56 }
 0x443   : > { %v2011_v55 = vmul.f32 0.044715, %v4027_v57  ;;  %v1985_v15 = vpop.f32.mrb[2].mxu0  ;;  %v4031_v49 = vpop.f32.mrb[2].mxu1 }
 0x444   : > { %v2018_v10 = vmul.f32 %v2010_v18, %v4023_v56  ;;  %v4034_v53 = vadd.f32 %v1985_v15, %v1888_v20  ;;  %v1987_v4 = vpop.f32.mrb[3].mxu0  ;;  %v4036_v51 = vpop.f32.mrb[3].mxu1  ;;  %v2002_v18 = vmul.f32 0.5, %v4023_v56 }
 0x445   : > { %v2019_v36 = vmul.f32 %v2011_v55, %v4027_v57  ;;  %v4039_v24 = vadd.f32 %v1987_v4, %v1888_v20  ;;  %v2003_v4 = vmul.f32 0.5, %v4027_v57 }
 0x446   : > { %v2026_v0 = vmul.f32 %v2018_v10, %v4023_v56  ;;  %v2012_v23 = vmul.f32 0.044715, %v4034_v53  ;;  %v2085_v10 = vpop.permute.xlu0 %2084 }
 0x447   : > { %v2027_v1 = vmul.f32 %v2019_v36, %v4027_v57  ;;  %v2013_v8 = vmul.f32 0.044715, %v4039_v24  ;;  %v1991_v21 = vpop.f32.mrb[4].mxu0  ;;  %v4045_v38 = vpop.f32.mrb[4].mxu1 }
 0x448   : > { %v2034_v7 = vadd.f32 %v2026_v0, %v4023_v56  ;;  %v2020_v29 = vmul.f32 %v2012_v23, %v4034_v53  ;;  %v4049_v39 = vadd.f32 %v1991_v21, %v1893_v47  ;;  %v1993_v40 = vpop.f32.mrb[5].mxu0  ;;  %v4051_v26 = vpop.f32.mrb[5].mxu1  ;;  %v2181_v0 = vadd.f32 %v4021_v33, %v2085_v10 }
 0x449   : > { %v2035_v14 = vadd.f32 %v2027_v1, %v4027_v57  ;;  %v2021_v11 = vmul.f32 %v2013_v8, %v4039_v24  ;;  %v4055_v61 = vadd.f32 %v1993_v40, %v1893_v47  ;;  %v2183_v21 = vadd.f32 %v4025_v54, %v2085_v10 }
 0x44a   : > { %v2042_v63 = vmul.f32 0.7978846, %v2034_v7  ;;  %v2028_v2 = vmul.f32 %v2020_v29, %v4034_v53  ;;  %v2014_v5 = vmul.f32 0.044715, %v4049_v39  ;;  %v2004_v56 = vmul.f32 0.5, %v4034_v53 }
 0x44b   : > { %v2043_v35 = vmul.f32 0.7978846, %v2035_v14  ;;  %v2029_v25 = vmul.f32 %v2021_v11, %v4039_v24  ;;  %v2015_v30 = vmul.f32 0.044715, %v4055_v61  ;;  %v1997_v32 = vpop.f32.mrb[6].mxu0  ;;  %v4065_v17 = vpop.f32.mrb[6].mxu1 }
 0x44c   : > { %2567 = vtanh.f32 %v2042_v63  ;;  %v2036_v60 = vadd.f32 %v2028_v2, %v4034_v53  ;;  %v2022_v58 = vmul.f32 %v2014_v5, %v4049_v39  ;;  %v4063_v31 = vadd.f32 %v1997_v32, %v1898_v46  ;;  %v1999_v52 = vpop.f32.mrb[7].mxu0  ;;  %v4069_v13 = vpop.f32.mrb[7].mxu1 }
 0x44d   : > { %2569 = vtanh.f32 %v2043_v35  ;;  %v2037_v45 = vadd.f32 %v2029_v25, %v4039_v24  ;;  %v2023_v43 = vmul.f32 %v2015_v30, %v4055_v61  ;;  %v4074_v37 = vadd.f32 %v1999_v52, %v1898_v46  ;;  %v2090_v14 = vpop.permute.xlu1 %2089  ;;  %v2095_v30 = vpop.permute.xlu0 %2094 }
 0x44e   : > { %v2044_v59 = vmul.f32 0.7978846, %v2036_v60  ;;  %v2030_v3 = vmul.f32 %v2022_v58, %v4049_v39  ;;  %v2016_v6 = vmul.f32 0.044715, %v4063_v31  ;;  %v2005_v57 = vmul.f32 0.5, %v4039_v24 }
 0x44f   : > { %v2045_v22 = vmul.f32 0.7978846, %v2037_v45  ;;  %v2031_v16 = vmul.f32 %v2023_v43, %v4055_v61  ;;  %v2017_v62 = vmul.f32 0.044715, %v4074_v37  ;;  %v2187_v54 = vadd.f32 %v4031_v49, %v2090_v14 }
 0x450   : > { %2571 = vtanh.f32 %v2044_v59  ;;  %v2038_v12 = vadd.f32 %v2030_v3, %v4049_v39  ;;  %v2024_v48 = vmul.f32 %v2016_v6, %v4063_v31  ;;  %v2189_v5 = vadd.f32 %v4036_v51, %v2090_v14 }
 0x451   : > { %2573 = vtanh.f32 %v2045_v22  ;;  %v2039_v27 = vadd.f32 %v2031_v16, %v4055_v61  ;;  %v2025_v34 = vmul.f32 %v2017_v62, %v4074_v37  ;;  %v2006_v24 = vmul.f32 0.5, %v4049_v39  ;;  %v2100_v6 = vpop.permute.xlu1 %2099 }
 0x452   : > { %v2046_v42 = vmul.f32 0.7978846, %v2038_v12  ;;  %v2032_v9 = vmul.f32 %v2024_v48, %v4063_v31  ;;  %v2007_v60 = vmul.f32 0.5, %v4055_v61  ;;  %v2193_v52 = vadd.f32 %v4045_v38, %v2095_v30 }
 0x453   : > { %v2047_v41 = vmul.f32 0.7978846, %v2039_v27  ;;  %v2033_v44 = vmul.f32 %v2025_v34, %v4074_v37  ;;  %v2195_v43 = vadd.f32 %v4051_v26, %v2095_v30  ;;  %v2008_v59 = vmul.f32 0.5, %v4063_v31 }
 0x454   : > { %2575 = vtanh.f32 %v2046_v42  ;;  %v2040_v19 = vadd.f32 %v2032_v9, %v4063_v31  ;;  %v2199_v38 = vadd.f32 %v4065_v17, %v2100_v6  ;;  %v2009_v12 = vmul.f32 0.5, %v4074_v37 }
 0x455   : > { %2577 = vtanh.f32 %v2047_v41  ;;  %v2041_v15 = vadd.f32 %v2033_v44, %v4074_v37  ;;  %v2201_v27 = vadd.f32 %v4069_v13, %v2100_v6 }
 0x456   : > { %v2568_v28 = vpop.eup %2567  ;;  %v2048_v50 = vmul.f32 0.7978846, %v2040_v19 }
 0x457   : > { %v2570_v20 = vpop.eup %2569  ;;  %v2058_v55 = vadd.f32 1.0, %v2568_v28  ;;  %v2049_v23 = vmul.f32 0.7978846, %v2041_v15 }
 0x458   : > { %v2059_v36 = vadd.f32 1.0, %v2570_v20  ;;  %2579 = vtanh.f32 %v2048_v50 }
 0x459   : > { %v2066_v47 = vmul.f32 %v2058_v55, %v2002_v18  ;;  %2581 = vtanh.f32 %v2049_v23 }
 0x45a   : > { %v2572_v1 = vpop.eup %2571  ;;  %v2067_v8 = vmul.f32 %v2059_v36, %v2003_v4 }
 0x45b   : > { %v2574_v7 = vpop.eup %2573  ;;  %v2203_v29 = vadd.f32 %v2181_v0, %v2066_v47  ;;  %v2060_v40 = vadd.f32 1.0, %v2572_v1 }
 0x45c   : > { %v2204_v11 = vadd.f32 %v2183_v21, %v2067_v8  ;;  %v2061_v63 = vadd.f32 1.0, %v2574_v7 }
 0x45d   : > { %2211 = vst [vmem:[%s4094_s27] sm:$0xff] %v2203_v29  ;;  %v2068_v33 = vmul.f32 %v2060_v40, %v2004_v56 }
 0x45e   : > { %v2576_v2 = vpop.eup %2575  ;;  %2212 = vst [vmem:[%s4094_s27 + $0x8] sm:$0xff] %v2204_v11  ;;  %v2069_v53 = vmul.f32 %v2061_v63, %v2005_v57 }
 0x45f   : > { %v2578_v46 = vpop.eup %2577  ;;  %v2205_v35 = vadd.f32 %v2187_v54, %v2068_v33  ;;  %v2062_v25 = vadd.f32 1.0, %v2576_v2 }
 0x460   : > { %v2206_v32 = vadd.f32 %v2189_v5, %v2069_v53  ;;  %v2063_v58 = vadd.f32 1.0, %v2578_v46 }
 0x461   : > { %2213 = vst [vmem:[%s4094_s27 + $0x10] sm:$0xff] %v2205_v35  ;;  %v2070_v49 = vmul.f32 %v2062_v25, %v2006_v24 }
 0x462   : > { %v2580_v45 = vpop.eup %2579  ;;  %2214 = vst [vmem:[%s4094_s27 + $0x18] sm:$0xff] %v2206_v32  ;;  %v2071_v51 = vmul.f32 %v2063_v58, %v2007_v60 }
 0x463   : > { %v2207_v39 = vadd.f32 %v2193_v52, %v2070_v49  ;;  %v2064_v3 = vadd.f32 1.0, %v2580_v45  ;;  %v2582_v22 = vpop.eup %2581 }
 0x464   : > { %v2208_v61 = vadd.f32 %v2195_v43, %v2071_v51  ;;  %v2065_v26 = vadd.f32 1.0, %v2582_v22 }
 0x465   : > { %2215 = vst [vmem:[%s4094_s27 + $0x20] sm:$0xff] %v2207_v39  ;;  %v2072_v16 = vmul.f32 %v2064_v3, %v2008_v59 }
 0x466   : > { %2216 = vst [vmem:[%s4094_s27 + $0x28] sm:$0xff] %v2208_v61  ;;  %v2073_v31 = vmul.f32 %v2065_v26, %v2009_v12 }
 0x467   : > { %v2209_v48 = vadd.f32 %v2199_v38, %v2072_v16 }
 0x468   : > { %v2210_v62 = vadd.f32 %v2201_v27, %v2073_v31 }
 0x469   : > { %2217 = vst [vmem:[%s4094_s27 + $0x30] sm:$0xff] %v2209_v48 }
 0x46a   : > { %2218 = vst [vmem:[%s4094_s27 + $0x38] sm:$0xff] %v2210_v62 }
 0x46b   : > { %2628 = shalt.err (!%p2625_p7)
}
 0x46c   : > { %s2629_s15 = scalar_lea.hbm %s4120_s21, 1024  ;;  %s2633_s20 = scalar_lea.hbm %s4181_s14, 2048 }
 0x46d   : > { %p2630_p8 = scmp.ne.s32.totalorder %s4120_s21, %s2629_s15  ;;  %p2634_p1 = scmp.lt.u32.totalorder %s4120_s21, %s4181_s14 }
 0x46e   : > { %p2635_p0 = scmp.lt.u32.totalorder %s2633_s20, %s2629_s15  ;;  %p2637_p5 = scmp.lt.u32.totalorder %s2629_s15, %s4120_s21 }
 0x46f   : > { %p2631_p11 = pnand %p2630_p8, %p4367_p9 }
 0x470   : > { %p2636_p6 = por %p2635_p0, %p2634_p1 }
 0x471   : > { %p2632_p13 = pneg %p2631_p11 }
 0x472   : > { %p2638_p10 = por %p2637_p5, %p2636_p6 }
 0x474   : > { %p2639_p12 = pnand %p2638_p10, %p2632_p13 }
 0x476   : > { %2642 = shalt.err (!%p2639_p12)
}
 0x477   : > { %s2752_s0 = smov 256  }
 0x478   : > { %2386 = dma.vmem_to_hbm [thread:$0]  (%p4367_p9), %s4114_s28, 1024, %s4120_s21, %s4125_s25, %s2752_s0, %s2752_s0, %s4304_s26  }
 0x479 PF: > { %s4368_s17 = sld [smem:[#allocation11_spill]]  ;;  %p2398_p2 = scmp.ge.s32.totalorder %s2681_s16, 2 }
 0x47a   : > { %s2248_s19 = sand.u32 1, %s2669_s29  }
 0x47b   : > { %s2249_s15 = scalar_lea.sflag [#allocation4], %s2248_s19 }
 0x47f   : > { %p4369_p3 = scmp.ne.s32.totalorder %s4368_s17, 0 }
 0x481   : > { %p2393_p4 = pnand %p2398_p2, %p4369_p3 }
 0x483   : > { %2664 = dma.done.wait (!%p2393_p4), %s2249_s15, 1024  }
 0x484   : > { %2666 = vsyncadd (!%p2393_p4), %s2249_s15, 4294966272  ;;  %s4370_s16 = sld [smem:[#allocation9_spill]]  ;;  %s4371_s27 = sld [smem:[#allocation8_spill]] }
 0x485   : > { %s4372_s15 = sld [smem:[#allocation10_spill]]  ;;  %s4373_s29 = smov %s2673_s30 }
 0x48a   : > { %p25_p7 = scmp.ge.s32.totalorder %s4370_s16, 4   ;;  %s4374_s30 = smov %s4371_s27 }
 0x48c   :  { %27 = sbr.rel (!%p25_p7) target bundleno = 6 (0x6), region = 147 }
 0x493   :  { %2254 = vsyncpa [#allocation3], 1 }
 0x494   :  { %2256 = vsyncpa [#allocation3 + $0x1], 1 }
 0x495   :  { %2257 = vsyncpa [#allocation4], 1 }
 0x496   :  { %2259 = vsyncpa [#allocation4 + $0x1], 1 }

</bundles_post_ra>
